<compile_context>
chip_gen: v5e
topology: v5e:2x2
jax: 0.10.0
libtpu: 0.0.40
codegen_flags: <defaults>
</compile_context>

<pallas_src>
import functools

import jax
import jax.numpy as jnp
from jax.experimental import pallas as pl
from jax.experimental.pallas import tpu as pltpu

_LAYER_DIMS = [(1280, 640), (640, 320), (320, 160), (160, 80), (80, 1)]


def _round_up(n, m):
    return ((n + m - 1) // m) * m


def _gelu(x, approximate):
    return jax.nn.gelu(x, approximate=approximate)


# ----------------------------------------------------------------------------
# Kernel
# ----------------------------------------------------------------------------
def bmi_head_kernel(x_ref,
                    w1_ref, b1_ref,
                    w2_ref, b2_ref,
                    w3_ref, b3_ref,
                    w4_ref, b4_ref,
                    w5_ref, b5_ref,
                    o_ref,
                    *, approximate_gelu, compute_dtype):
    act = lambda v: _gelu(v, approximate_gelu)

    # In-kernel downcast: x lives in HBM as f32 (no wrapper-side cast pass);
    # the cast to the bf16 MXU datapath happens in VMEM.
    x = x_ref[...].astype(compute_dtype)

    # layer 1: (tb,1280) @ (1280,640).  Dropout(0.5) after it is eval-mode identity.
    h = jnp.dot(x, w1_ref[...], preferred_element_type=jnp.float32)
    h = act(h + b1_ref[...])

    # layer 2: 640 -> 320  (MXU underfill on N accepted: <25% of total FLOPs)
    h = jnp.dot(h.astype(compute_dtype), w2_ref[...],
                preferred_element_type=jnp.float32)
    h = act(h + b2_ref[...])

    # layer 3: 320 -> 160
    h = jnp.dot(h.astype(compute_dtype), w3_ref[...],
                preferred_element_type=jnp.float32)
    h = act(h + b3_ref[...])

    # layer 4: 160 -> 80
    h = jnp.dot(h.astype(compute_dtype), w4_ref[...],
                preferred_element_type=jnp.float32)
    h = act(h + b4_ref[...])

    # layer 5: 80 -> 1.  N=1, K=80 is below the MXU tile, so do it on the VPU
    # (elementwise multiply) + XLU (lane reduction) instead of an MXU push.
    w5 = w5_ref[...].astype(jnp.float32)                        # (1, 80)
    h = jnp.sum(h * w5, axis=-1, keepdims=True) + b5_ref[...]   # (tb, 1)
    o_ref[...] = act(h).astype(o_ref.dtype)


# ----------------------------------------------------------------------------
# Generation-aware tiling
# ----------------------------------------------------------------------------
def _vmem_capacity_bytes():
    try:
        info = pltpu.get_tpu_info()
    except Exception:
        return None
    for attr in ("vmem_capacity_bytes", "vmem_bytes", "vmem_size_bytes"):
        v = getattr(info, attr, None)
        if v:
            return int(v)
    return None


def _select_tiling(B, tb):
    """Pick (batch_tile, scoped_vmem_limit) for the current TPU generation."""
    vmem = _vmem_capacity_bytes()
    if vmem is None:
        # Unknown part: conservative settings that fit every generation.
        tb_max, vmem_limit, small_vmem = 1024, 40 << 20, True
    elif vmem >= (100 << 20):
        # v5e / v6e: 128 MiB VMEM, 1 TensorCore -> big tile, raised VMEM limit.
        tb_max, vmem_limit, small_vmem = 2048, 64 << 20, False
    else:
        # v7x: 64 MiB VMEM, 2 TensorCores -> cap the tile, moderate VMEM limit.
        tb_max, vmem_limit, small_vmem = 1024, 44 << 20, True

    if tb is not None:
        tb_max = tb

    # bf16 packs 16 rows per vreg -> keep the batch tile a multiple of 16.
    tb_eff = max(16, min(_round_up(tb_max, 16), _round_up(B, 16)))

    # 2-TensorCore parts: guarantee >= 2 grid steps for batches big enough to
    # be worth splitting, so the "parallel" axis can shard across both cores.
    if small_vmem and tb is None and B > 256 and pl.cdiv(B, tb_eff) < 2:
        tb_eff = max(16, _round_up(pl.cdiv(B, 2), 16))

    return tb_eff, vmem_limit


# ----------------------------------------------------------------------------
# Wrapper
# ----------------------------------------------------------------------------
def bmi_head(x, params, *, tb=None, compute_dtype=jnp.bfloat16,
             approximate_gelu=True):
    """x: (B, 1280) f32 (or already bf16).  params: w1..w4 as (in, out),
    w5 as (1, 80) [PyTorch (out,in) layout], b as (1, out)."""
    B, D = x.shape
    assert D == 1280

    tb_eff, vmem_limit = _select_tiling(B, tb)
    grid = (pl.cdiv(B, tb_eff),)

    ws = [params[f"w{i}"].astype(compute_dtype) for i in range(1, 6)]
    bs = [params[f"b{i}"].astype(jnp.float32) for i in range(1, 6)]

    def invariant_spec(shape):
        # Whole array, VMEM-resident, same block every grid step -> single-buffer
        # (double-buffering a grid-invariant operand only doubles its footprint).
        return pl.BlockSpec(shape, lambda i: (0, 0), pipeline_mode=pl.Buffered(1))

    in_specs = [pl.BlockSpec((tb_eff, 1280), lambda i: (i, 0))]
    operands = [x]
    for w, b in zip(ws, bs):
        in_specs += [invariant_spec(w.shape), invariant_spec(b.shape)]
        operands += [w, b]

    matmul_flops = 2 * sum(fi * fo for fi, fo in _LAYER_DIMS)
    gelu_elems = sum(fo for _, fo in _LAYER_DIMS)
    weight_bytes = (sum(int(w.size) * w.dtype.itemsize for w in ws)
                    + sum(int(b.size) * 4 for b in bs))
    cost = pl.CostEstimate(
        flops=B * matmul_flops,
        transcendentals=B * gelu_elems,
        # x is read as f32 (4 B/elem) directly by the kernel.
        bytes_accessed=B * 1280 * x.dtype.itemsize + weight_bytes + B * 4,
    )

    out = pl.pallas_call(
        functools.partial(bmi_head_kernel,
                          approximate_gelu=approximate_gelu,
                          compute_dtype=compute_dtype),
        out_shape=jax.ShapeDtypeStruct((B, 1), jnp.float32),
        grid_spec=pltpu.PrefetchScalarGridSpec(
            num_scalar_prefetch=0,
            grid=grid,
            in_specs=in_specs,
            out_specs=pl.BlockSpec((tb_eff, 1), lambda i: (i, 0)),
        ),
        compiler_params=pltpu.CompilerParams(
            dimension_semantics=("parallel",),
            vmem_limit_bytes=vmem_limit,
        ),
        cost_estimate=cost,
    )(*operands)
    return out


# ----------------------------------------------------------------------------
# Params + pure-JAX reference (same dtype policy as the kernel)
# ----------------------------------------------------------------------------
def init_params(key):
    params = {}
    for idx, (fan_in, fan_out) in enumerate(_LAYER_DIMS, start=1):
        key, kw, kb = jax.random.split(key, 3)
        bound = 1.0 / jnp.sqrt(fan_in)
        if idx < 5:
            # stored pre-transposed: (in, out)
            w = jax.random.uniform(kw, (fan_in, fan_out), jnp.float32, -bound, bound)
        else:
            # final layer kept in PyTorch (out, in) layout for the VPU/XLU path
            w = jax.random.uniform(kw, (fan_out, fan_in), jnp.float32, -bound, bound)
        params[f"w{idx}"] = w
        params[f"b{idx}"] = jax.random.uniform(
            kb, (1, fan_out), jnp.float32, -bound, bound)
    return params


def bmi_head_ref(x, params, *, compute_dtype=jnp.bfloat16, approximate_gelu=True):
    h = x
    for i in range(1, 5):
        w = params[f"w{i}"].astype(compute_dtype)
        h = jnp.dot(h.astype(compute_dtype), w,
                    preferred_element_type=jnp.float32) + params[f"b{i}"]
        h = _gelu(h, approximate_gelu)
    w5 = params["w5"].astype(compute_dtype).astype(jnp.float32)   # (1, 80)
    h = jnp.sum(h * w5, axis=-1, keepdims=True) + params["b5"]
    return _gelu(h, approximate_gelu)


if __name__ == "__main__":
    key = jax.random.PRNGKey(0)
    key, kx = jax.random.split(key)
    B = 48                                    # small batch, multiple of 16
    x = jax.random.normal(kx, (B, 1280), jnp.float32)
    params = init_params(key)

    # small explicit tile -> exercises the multi-step grid path (grid=(3,))
    out_small_tile = jax.block_until_ready(bmi_head(x, params, tb=16))
    # default generation-aware path; tile shrinks adaptively to the batch
    out_default = jax.block_until_ready(bmi_head(x, params))

    ref = bmi_head_ref(x, params)
    assert out_small_tile.shape == (B, 1)
    assert out_default.shape == (B, 1)
    assert jnp.allclose(out_small_tile, ref, atol=1e-2, rtol=1e-2)
    assert jnp.allclose(out_default, ref, atol=1e-2, rtol=1e-2)

    print("KERNEL_OK")
</pallas_src>

<mosaic_0001>
module attributes {stable_mosaic.version = 11 : i64} {
  func.func @bmi_head_kernel(%arg0: i32, %arg1: memref<16x1280xf32, #tpu.memory_space<vmem>>, %arg2: memref<1280x640xbf16, #tpu.memory_space<vmem>>, %arg3: memref<1x640xf32, #tpu.memory_space<vmem>>, %arg4: memref<640x320xbf16, #tpu.memory_space<vmem>>, %arg5: memref<1x320xf32, #tpu.memory_space<vmem>>, %arg6: memref<320x160xbf16, #tpu.memory_space<vmem>>, %arg7: memref<1x160xf32, #tpu.memory_space<vmem>>, %arg8: memref<160x80xbf16, #tpu.memory_space<vmem>>, %arg9: memref<1x80xf32, #tpu.memory_space<vmem>>, %arg10: memref<1x80xbf16, #tpu.memory_space<vmem>>, %arg11: memref<1x1xf32, #tpu.memory_space<vmem>>, %arg12: memref<16x1xf32, #tpu.memory_space<vmem>>) attributes {dimension_semantics = [#tpu.dimension_semantics<parallel>], iteration_bounds = array<i64: 3>, scalar_prefetch = 0 : i64, scratch_operands = 0 : i64, tpu.core_type = #tpu.core_type<tc>, window_params = [{transform_indices = @transform_0, window_bounds = array<i64: 16, 1280>}, {pipeline_mode = #tpu.pipeline_mode<synchronous>, transform_indices = @transform_1, window_bounds = array<i64: 1280, 640>}, {pipeline_mode = #tpu.pipeline_mode<synchronous>, transform_indices = @transform_2, window_bounds = array<i64: 1, 640>}, {pipeline_mode = #tpu.pipeline_mode<synchronous>, transform_indices = @transform_3, window_bounds = array<i64: 640, 320>}, {pipeline_mode = #tpu.pipeline_mode<synchronous>, transform_indices = @transform_4, window_bounds = array<i64: 1, 320>}, {pipeline_mode = #tpu.pipeline_mode<synchronous>, transform_indices = @transform_5, window_bounds = array<i64: 320, 160>}, {pipeline_mode = #tpu.pipeline_mode<synchronous>, transform_indices = @transform_6, window_bounds = array<i64: 1, 160>}, {pipeline_mode = #tpu.pipeline_mode<synchronous>, transform_indices = @transform_7, window_bounds = array<i64: 160, 80>}, {pipeline_mode = #tpu.pipeline_mode<synchronous>, transform_indices = @transform_8, window_bounds = array<i64: 1, 80>}, {pipeline_mode = #tpu.pipeline_mode<synchronous>, transform_indices = @transform_9, window_bounds = array<i64: 1, 80>}, {pipeline_mode = #tpu.pipeline_mode<synchronous>, transform_indices = @transform_10, window_bounds = array<i64: 1, 1>}, {transform_indices = @transform_11, window_bounds = array<i64: 16, 1>}]} {
    %c0 = arith.constant 0 : index
    %c0_0 = arith.constant 0 : index
    %0 = vector.load %arg1[%c0, %c0_0] : memref<16x1280xf32, #tpu.memory_space<vmem>>, vector<16x1280xf32>
    %1 = arith.truncf %0 : vector<16x1280xf32> to vector<16x1280xbf16>
    %c0_1 = arith.constant 0 : index
    %c0_2 = arith.constant 0 : index
    %2 = vector.load %arg2[%c0_1, %c0_2] : memref<1280x640xbf16, #tpu.memory_space<vmem>>, vector<1280x640xbf16>
    %cst = arith.constant dense<0.000000e+00> : vector<16x640xf32>
    %3 = tpu.matmul %1, %2, %cst {dimension_numbers = #tpu.dot_dimension_numbers<[1], [0], [0], [1], [0, 0, 1, 1], [], []>} : vector<16x1280xbf16>, vector<1280x640xbf16>, vector<16x640xf32> -> vector<16x640xf32>
    %c0_3 = arith.constant 0 : index
    %c0_4 = arith.constant 0 : index
    %4 = vector.load %arg3[%c0_3, %c0_4] : memref<1x640xf32, #tpu.memory_space<vmem>>, vector<1x640xf32>
    %5 = vector.broadcast %4 : vector<1x640xf32> to vector<16x640xf32>
    %6 = arith.addf %3, %5 : vector<16x640xf32>
    %7 = arith.mulf %6, %6 : vector<16x640xf32>
    %8 = arith.mulf %6, %7 : vector<16x640xf32>
    %cst_5 = arith.constant 4.471500e-02 : f32
    %9 = vector.broadcast %cst_5 : f32 to vector<16x640xf32>
    %10 = arith.mulf %9, %8 : vector<16x640xf32>
    %11 = arith.addf %6, %10 : vector<16x640xf32>
    %cst_6 = arith.constant 0.797884583 : f32
    %12 = vector.broadcast %cst_6 : f32 to vector<16x640xf32>
    %13 = arith.mulf %12, %11 : vector<16x640xf32>
    %14 = math.tanh %13 : vector<16x640xf32>
    %cst_7 = arith.constant 1.000000e+00 : f32
    %15 = vector.broadcast %cst_7 : f32 to vector<16x640xf32>
    %16 = arith.addf %15, %14 : vector<16x640xf32>
    %cst_8 = arith.constant 5.000000e-01 : f32
    %17 = vector.broadcast %cst_8 : f32 to vector<16x640xf32>
    %18 = arith.mulf %17, %16 : vector<16x640xf32>
    %19 = arith.mulf %6, %18 : vector<16x640xf32>
    %20 = arith.truncf %19 : vector<16x640xf32> to vector<16x640xbf16>
    %c0_9 = arith.constant 0 : index
    %c0_10 = arith.constant 0 : index
    %21 = vector.load %arg4[%c0_9, %c0_10] : memref<640x320xbf16, #tpu.memory_space<vmem>>, vector<640x320xbf16>
    %cst_11 = arith.constant dense<0.000000e+00> : vector<16x320xf32>
    %22 = tpu.matmul %20, %21, %cst_11 {dimension_numbers = #tpu.dot_dimension_numbers<[1], [0], [0], [1], [0, 0, 1, 1], [], []>} : vector<16x640xbf16>, vector<640x320xbf16>, vector<16x320xf32> -> vector<16x320xf32>
    %c0_12 = arith.constant 0 : index
    %c0_13 = arith.constant 0 : index
    %23 = vector.load %arg5[%c0_12, %c0_13] : memref<1x320xf32, #tpu.memory_space<vmem>>, vector<1x320xf32>
    %24 = vector.broadcast %23 : vector<1x320xf32> to vector<16x320xf32>
    %25 = arith.addf %22, %24 : vector<16x320xf32>
    %26 = arith.mulf %25, %25 : vector<16x320xf32>
    %27 = arith.mulf %25, %26 : vector<16x320xf32>
    %cst_14 = arith.constant 4.471500e-02 : f32
    %28 = vector.broadcast %cst_14 : f32 to vector<16x320xf32>
    %29 = arith.mulf %28, %27 : vector<16x320xf32>
    %30 = arith.addf %25, %29 : vector<16x320xf32>
    %cst_15 = arith.constant 0.797884583 : f32
    %31 = vector.broadcast %cst_15 : f32 to vector<16x320xf32>
    %32 = arith.mulf %31, %30 : vector<16x320xf32>
    %33 = math.tanh %32 : vector<16x320xf32>
    %cst_16 = arith.constant 1.000000e+00 : f32
    %34 = vector.broadcast %cst_16 : f32 to vector<16x320xf32>
    %35 = arith.addf %34, %33 : vector<16x320xf32>
    %cst_17 = arith.constant 5.000000e-01 : f32
    %36 = vector.broadcast %cst_17 : f32 to vector<16x320xf32>
    %37 = arith.mulf %36, %35 : vector<16x320xf32>
    %38 = arith.mulf %25, %37 : vector<16x320xf32>
    %39 = arith.truncf %38 : vector<16x320xf32> to vector<16x320xbf16>
    %c0_18 = arith.constant 0 : index
    %c0_19 = arith.constant 0 : index
    %40 = vector.load %arg6[%c0_18, %c0_19] : memref<320x160xbf16, #tpu.memory_space<vmem>>, vector<320x160xbf16>
    %cst_20 = arith.constant dense<0.000000e+00> : vector<16x160xf32>
    %41 = tpu.matmul %39, %40, %cst_20 {dimension_numbers = #tpu.dot_dimension_numbers<[1], [0], [0], [1], [0, 0, 1, 1], [], []>} : vector<16x320xbf16>, vector<320x160xbf16>, vector<16x160xf32> -> vector<16x160xf32>
    %c0_21 = arith.constant 0 : index
    %c0_22 = arith.constant 0 : index
    %42 = vector.load %arg7[%c0_21, %c0_22] : memref<1x160xf32, #tpu.memory_space<vmem>>, vector<1x160xf32>
    %43 = vector.broadcast %42 : vector<1x160xf32> to vector<16x160xf32>
    %44 = arith.addf %41, %43 : vector<16x160xf32>
    %45 = arith.mulf %44, %44 : vector<16x160xf32>
    %46 = arith.mulf %44, %45 : vector<16x160xf32>
    %cst_23 = arith.constant 4.471500e-02 : f32
    %47 = vector.broadcast %cst_23 : f32 to vector<16x160xf32>
    %48 = arith.mulf %47, %46 : vector<16x160xf32>
    %49 = arith.addf %44, %48 : vector<16x160xf32>
    %cst_24 = arith.constant 0.797884583 : f32
    %50 = vector.broadcast %cst_24 : f32 to vector<16x160xf32>
    %51 = arith.mulf %50, %49 : vector<16x160xf32>
    %52 = math.tanh %51 : vector<16x160xf32>
    %cst_25 = arith.constant 1.000000e+00 : f32
    %53 = vector.broadcast %cst_25 : f32 to vector<16x160xf32>
    %54 = arith.addf %53, %52 : vector<16x160xf32>
    %cst_26 = arith.constant 5.000000e-01 : f32
    %55 = vector.broadcast %cst_26 : f32 to vector<16x160xf32>
    %56 = arith.mulf %55, %54 : vector<16x160xf32>
    %57 = arith.mulf %44, %56 : vector<16x160xf32>
    %58 = arith.truncf %57 : vector<16x160xf32> to vector<16x160xbf16>
    %c0_27 = arith.constant 0 : index
    %c0_28 = arith.constant 0 : index
    %59 = vector.load %arg8[%c0_27, %c0_28] : memref<160x80xbf16, #tpu.memory_space<vmem>>, vector<160x80xbf16>
    %cst_29 = arith.constant dense<0.000000e+00> : vector<16x80xf32>
    %60 = tpu.matmul %58, %59, %cst_29 {dimension_numbers = #tpu.dot_dimension_numbers<[1], [0], [0], [1], [0, 0, 1, 1], [], []>} : vector<16x160xbf16>, vector<160x80xbf16>, vector<16x80xf32> -> vector<16x80xf32>
    %c0_30 = arith.constant 0 : index
    %c0_31 = arith.constant 0 : index
    %61 = vector.load %arg9[%c0_30, %c0_31] : memref<1x80xf32, #tpu.memory_space<vmem>>, vector<1x80xf32>
    %62 = vector.broadcast %61 : vector<1x80xf32> to vector<16x80xf32>
    %63 = arith.addf %60, %62 : vector<16x80xf32>
    %64 = arith.mulf %63, %63 : vector<16x80xf32>
    %65 = arith.mulf %63, %64 : vector<16x80xf32>
    %cst_32 = arith.constant 4.471500e-02 : f32
    %66 = vector.broadcast %cst_32 : f32 to vector<16x80xf32>
    %67 = arith.mulf %66, %65 : vector<16x80xf32>
    %68 = arith.addf %63, %67 : vector<16x80xf32>
    %cst_33 = arith.constant 0.797884583 : f32
    %69 = vector.broadcast %cst_33 : f32 to vector<16x80xf32>
    %70 = arith.mulf %69, %68 : vector<16x80xf32>
    %71 = math.tanh %70 : vector<16x80xf32>
    %cst_34 = arith.constant 1.000000e+00 : f32
    %72 = vector.broadcast %cst_34 : f32 to vector<16x80xf32>
    %73 = arith.addf %72, %71 : vector<16x80xf32>
    %cst_35 = arith.constant 5.000000e-01 : f32
    %74 = vector.broadcast %cst_35 : f32 to vector<16x80xf32>
    %75 = arith.mulf %74, %73 : vector<16x80xf32>
    %76 = arith.mulf %63, %75 : vector<16x80xf32>
    %c0_36 = arith.constant 0 : index
    %c0_37 = arith.constant 0 : index
    %77 = vector.load %arg10[%c0_36, %c0_37] : memref<1x80xbf16, #tpu.memory_space<vmem>>, vector<1x80xbf16>
    %78 = arith.extf %77 : vector<1x80xbf16> to vector<1x80xf32>
    %79 = vector.broadcast %78 : vector<1x80xf32> to vector<16x80xf32>
    %80 = arith.mulf %76, %79 : vector<16x80xf32>
    %cst_38 = arith.constant dense<0.000000e+00> : vector<16xf32>
    %81 = vector.multi_reduction <add>, %80, %cst_38 [1] : vector<16x80xf32> to vector<16xf32>
    %82 = vector.shape_cast %81 : vector<16xf32> to vector<16x1xf32>
    %c0_39 = arith.constant 0 : index
    %c0_40 = arith.constant 0 : index
    %83 = vector.load %arg11[%c0_39, %c0_40] : memref<1x1xf32, #tpu.memory_space<vmem>>, vector<1x1xf32>
    %84 = vector.broadcast %83 : vector<1x1xf32> to vector<16x1xf32>
    %85 = arith.addf %82, %84 : vector<16x1xf32>
    %86 = arith.mulf %85, %85 : vector<16x1xf32>
    %87 = arith.mulf %85, %86 : vector<16x1xf32>
    %cst_41 = arith.constant 4.471500e-02 : f32
    %88 = vector.broadcast %cst_41 : f32 to vector<16x1xf32>
    %89 = arith.mulf %88, %87 : vector<16x1xf32>
    %90 = arith.addf %85, %89 : vector<16x1xf32>
    %cst_42 = arith.constant 0.797884583 : f32
    %91 = vector.broadcast %cst_42 : f32 to vector<16x1xf32>
    %92 = arith.mulf %91, %90 : vector<16x1xf32>
    %93 = math.tanh %92 : vector<16x1xf32>
    %cst_43 = arith.constant 1.000000e+00 : f32
    %94 = vector.broadcast %cst_43 : f32 to vector<16x1xf32>
    %95 = arith.addf %94, %93 : vector<16x1xf32>
    %cst_44 = arith.constant 5.000000e-01 : f32
    %96 = vector.broadcast %cst_44 : f32 to vector<16x1xf32>
    %97 = arith.mulf %96, %95 : vector<16x1xf32>
    %98 = arith.mulf %85, %97 : vector<16x1xf32>
    %c0_45 = arith.constant 0 : index
    %c0_46 = arith.constant 0 : index
    %99 = vector.load %arg12[%c0_45, %c0_46] : memref<16x1xf32, #tpu.memory_space<vmem>>, vector<16x1xf32>
    tpu.vector_store %arg12[%c0_45, %c0_46], %98 {strides = array<i32>} : memref<16x1xf32, #tpu.memory_space<vmem>>, vector<16x1xf32>,
    return
  }
  func.func @transform_0(%arg0: i32) -> (i32, i32) {
    %c0_i32 = arith.constant 0 : i32
    %c0_i32_0 = arith.constant 0 : i32
    return %arg0, %c0_i32 : i32, i32
  }
  func.func @transform_1(%arg0: i32) -> (i32, i32) {
    %c0_i32 = arith.constant 0 : i32
    %c0_i32_0 = arith.constant 0 : i32
    %c0_i32_1 = arith.constant 0 : i32
    return %c0_i32, %c0_i32_0 : i32, i32
  }
  func.func @transform_2(%arg0: i32) -> (i32, i32) {
    %c0_i32 = arith.constant 0 : i32
    %c0_i32_0 = arith.constant 0 : i32
    %c0_i32_1 = arith.constant 0 : i32
    return %c0_i32, %c0_i32_0 : i32, i32
  }
  func.func @transform_3(%arg0: i32) -> (i32, i32) {
    %c0_i32 = arith.constant 0 : i32
    %c0_i32_0 = arith.constant 0 : i32
    %c0_i32_1 = arith.constant 0 : i32
    return %c0_i32, %c0_i32_0 : i32, i32
  }
  func.func @transform_4(%arg0: i32) -> (i32, i32) {
    %c0_i32 = arith.constant 0 : i32
    %c0_i32_0 = arith.constant 0 : i32
    %c0_i32_1 = arith.constant 0 : i32
    return %c0_i32, %c0_i32_0 : i32, i32
  }
  func.func @transform_5(%arg0: i32) -> (i32, i32) {
    %c0_i32 = arith.constant 0 : i32
    %c0_i32_0 = arith.constant 0 : i32
    %c0_i32_1 = arith.constant 0 : i32
    return %c0_i32, %c0_i32_0 : i32, i32
  }
  func.func @transform_6(%arg0: i32) -> (i32, i32) {
    %c0_i32 = arith.constant 0 : i32
    %c0_i32_0 = arith.constant 0 : i32
    %c0_i32_1 = arith.constant 0 : i32
    return %c0_i32, %c0_i32_0 : i32, i32
  }
  func.func @transform_7(%arg0: i32) -> (i32, i32) {
    %c0_i32 = arith.constant 0 : i32
    %c0_i32_0 = arith.constant 0 : i32
    %c0_i32_1 = arith.constant 0 : i32
    return %c0_i32, %c0_i32_0 : i32, i32
  }
  func.func @transform_8(%arg0: i32) -> (i32, i32) {
    %c0_i32 = arith.constant 0 : i32
    %c0_i32_0 = arith.constant 0 : i32
    %c0_i32_1 = arith.constant 0 : i32
    return %c0_i32, %c0_i32_0 : i32, i32
  }
  func.func @transform_9(%arg0: i32) -> (i32, i32) {
    %c0_i32 = arith.constant 0 : i32
    %c0_i32_0 = arith.constant 0 : i32
    %c0_i32_1 = arith.constant 0 : i32
    return %c0_i32, %c0_i32_0 : i32, i32
  }
  func.func @transform_10(%arg0: i32) -> (i32, i32) {
    %c0_i32 = arith.constant 0 : i32
    %c0_i32_0 = arith.constant 0 : i32
    %c0_i32_1 = arith.constant 0 : i32
    return %c0_i32, %c0_i32_0 : i32, i32
  }
  func.func @transform_11(%arg0: i32) -> (i32, i32) {
    %c0_i32 = arith.constant 0 : i32
    %c0_i32_0 = arith.constant 0 : i32
    return %arg0, %c0_i32 : i32, i32
  }
}

</mosaic_0001>

<bundles_post_ra>
// kernel: tpu_custom_call.1
= control target key start
LH: loop header
LB: loop body
LE: loop exit
PB: predicated region body
PF: predicated region fallthrough
CT: control target
= control target key end

     0   :  { %s10566_s0 = inlined_call_operand.hbm [shape: f32[48,1280], index: 0, kind: input, shape index: {}]   ;;  %s10567_s1 = inlined_call_operand.hbm [shape: bf16[1280,640], index: 1, kind: input, shape index: {}]   ;;  %s10568_s2 = inlined_call_operand.hbm [shape: f32[1,640], index: 2, kind: input, shape index: {}]   ;;  %s10569_s3 = inlined_call_operand.vmem [shape: bf16[640,320], index: 3, kind: input, shape index: {}]   ;;  %s10570_s4 = inlined_call_operand.hbm [shape: f32[1,320], index: 4, kind: input, shape index: {}]   ;;  %s10571_s5 = inlined_call_operand.vmem [shape: bf16[320,160], index: 5, kind: input, shape index: {}]   ;;  %s10572_s6 = inlined_call_operand.hbm [shape: f32[1,160], index: 6, kind: input, shape index: {}]   ;;  %s10573_s7 = inlined_call_operand.hbm [shape: bf16[160,80], index: 7, kind: input, shape index: {}]   ;;  %s10574_s8 = inlined_call_operand.hbm [shape: f32[1,80], index: 8, kind: input, shape index: {}]   ;;  %s10575_s9 = inlined_call_operand.hbm [shape: bf16[1,80], index: 9, kind: input, shape index: {}]   ;;  %s10576_s10 = inlined_call_operand.<no memory space> [shape: f32[1,1], index: 10, kind: input, shape index: {}]   ;;  %s10577_s11 = inlined_call_operand.vmem [shape: f32[48,1], index: 11, kind: output, shape index: {}]  }
   0x1   :  { %10580 = sst [smem:[#allocation21_spill]] %s10567_s1  ;;  %v16_v0 = vstv %s10576_s10 }
   0x2   :  { %10581 = sst [smem:[#allocation22_spill]] %s10568_s2  ;;  %17 = vst [vmem:[#allocation2] sm:$0x1] %v16_v0 }
   0x3   :  { %10582 = sst [smem:[#allocation23_spill]] %s10570_s4 }
   0x4   :  { %18 = vsyncpa [#allocation4], 0 }
   0x5   :  { %20 = vsyncpa [#allocation4 + $0x1], 0 }
   0x6   :  { %21 = vsyncpa [#allocation6], 0 }
   0x7   :  { %22 = vsyncpa [#allocation9], 0 }
   0x8   :  { %23 = vsyncpa [#allocation12], 0 }
   0x9   :  { %24 = vsyncpa [#allocation15], 0  ;;  %s9090_s19 = smov 0   ;;  %s9092_s20 = smov 0  }
   0xa   :  { %s9094_s21 = smov 0   ;;  %s9096_s22 = smov 0  }
   0xb LB: > { %s10583_s1 = sld [smem:[#allocation21_spill]]  ;;  %s10578_s25 = sadd.s32 4294967295, %s9012_s22   ;;  %s9012_s22 = sphi %s9096_s22, %s10596_s22   ;;  %s9008_s21 = sphi %s9094_s21, %s10595_s21   ;;  %s9004_s20 = sphi %s9092_s20, %s10594_s20   ;;  %s9000_s19 = sphi %s9090_s19, %s10593_s19  }
   0xc   : > { %p5674_p0 = scmp.ge.s32.totalorder %s9012_s22, 1  ;;  %p9117_p1 = scmp.eq.s32.totalorder %s10578_s25, 0 }
   0xd   : > { %p297_p2 = scmp.lt.s32.totalorder %s9012_s22, 4  ;;  %s9014_s28 = smov [#allocation5]  }
   0xe   : > { %s310_s29 = sshll.u32 %s9014_s28, 4  ;;  %s10586_s4 = sld [smem:[#allocation23_spill]]  ;;  %s311_s29 = int_to_ptr.vmem [resolvable:$true] %s310_s29 }
   0xf   : > { %p9122_p3 = pnand %p5674_p0, %p297_p2  ;;  %s364_s17 = sshll.u32 %s10573_s7, 4  ;;  %s365_s17 = int_to_ptr.hbm [resolvable:$true] %s364_s17 }
  0x10   : > { %s9015_s18 = smov [#allocation8]   ;;  %s9016_s23 = smov 320  }
  0x11   : > { %s308_s24 = sshll.u32 %s10583_s1, 4  ;;  %p8584_p4 = pneg %p9122_p3  ;;  %s309_s24 = int_to_ptr.hbm [resolvable:$true] %s308_s24 }
  0x12   : > { %s340_s10 = sshll.u32 %s9015_s18, 4  ;;  %s9017_s28 = smov 20   ;;  %s341_s10 = int_to_ptr.vmem [resolvable:$true] %s340_s10 }
  0x13   : > { %p9133_p5 = pnand %p8584_p4, %p9117_p1  ;;  %s9018_s30 = smov [#allocation11]  }
  0x14   : > { %s338_s13 = sshll.u32 %s10586_s4, 4  ;;  %s366_s12 = sshll.u32 %s9018_s30, 4  ;;  %s339_s13 = int_to_ptr.hbm [resolvable:$true] %s338_s13  ;;  %s367_s12 = int_to_ptr.vmem [resolvable:$true] %s366_s12 }
  0x15   : > { %8587 = dma.hbm_to_vmem [thread:$0]  (!%p9133_p5), %s309_s24, 51200, %s311_s29, [#allocation6], %s9016_s23, %s9016_s23, %s9017_s28  }
  0x16   : > { %8593 = dma.hbm_to_vmem [thread:$0]  (!%p9133_p5), %s339_s13, 48, %s341_s10, [#allocation9]  }
  0x17   : > { %s10588_s2 = sld [smem:[#allocation22_spill]]  ;;  %s9019_s16 = smov 64  }
  0x18   : > { %s9020_s4 = smov 4   ;;  %s9021_s18 = smov [#allocation7]  }
  0x19   : > { %8599 = dma.hbm_to_vmem [thread:$0]  (!%p9133_p5), %s365_s17, 1280, %s367_s12, [#allocation12], %s9019_s16, %s9019_s16, %s9020_s4  }
  0x1a   : > { %s325_s24 = sshll.u32 %s9021_s18, 4  ;;  %s353_s13 = sshll.u32 %s10572_s6, 4  ;;  %s326_s24 = int_to_ptr.vmem [resolvable:$true] %s325_s24  ;;  %s354_s13 = int_to_ptr.hbm [resolvable:$true] %s353_s13 }
  0x1b   : > { %s379_s25 = sshll.u32 %s10574_s8, 4  ;;  %s9022_s28 = smov [#allocation10]   ;;  %s380_s25 = int_to_ptr.hbm [resolvable:$true] %s379_s25 }
  0x1c   : > { %s355_s4 = sshll.u32 %s9022_s28, 4  ;;  %s9023_s17 = smov [#allocation13]   ;;  %s356_s4 = int_to_ptr.vmem [resolvable:$true] %s355_s4 }
  0x1d   : > { %s323_s15 = sshll.u32 %s10588_s2, 4  ;;  %s381_s30 = sshll.u32 %s9023_s17, 4  ;;  %s324_s15 = int_to_ptr.hbm [resolvable:$true] %s323_s15  ;;  %s382_s30 = int_to_ptr.vmem [resolvable:$true] %s381_s30 }
  0x1e   : > { %8590 = dma.hbm_to_vmem [thread:$0]  (!%p9133_p5), %s324_s15, 80, %s326_s24, [#allocation6]  }
  0x1f   : > { %8596 = dma.hbm_to_vmem [thread:$0]  (!%p9133_p5), %s354_s13, 32, %s356_s4, [#allocation9]  }
  0x20   : > { %s391_s16 = sshll.u32 %s10575_s9, 4  ;;  %s9024_s18 = smov [#allocation14]   ;;  %s392_s16 = int_to_ptr.hbm [resolvable:$true] %s391_s16 }
  0x21   : > { %8602 = dma.hbm_to_vmem [thread:$0]  (!%p9133_p5), %s380_s25, 16, %s382_s30, [#allocation12]  }
  0x22   : > { %s393_s24 = sshll.u32 %s9024_s18, 4  ;;  %s9167_s29 = sadd.s32 1, %s9012_s22   ;;  %s394_s24 = int_to_ptr.vmem [resolvable:$true] %s393_s24 }
  0x23   : > { %8605 = dma.hbm_to_vmem [thread:$0]  (!%p9133_p5), %s392_s16, 16, %s394_s24, [#allocation15]  }
  0x24   : > { %s34_s23 = ssub.s32 %s9012_s22, %s9167_s29  ;;  %s37_s13 = sadd.s32 1, %s9008_s21 }
  0x25   : > { %p35_p6 = scmp.eq.s32.totalorder %s34_s23, 0  ;;  %p44_p7 = scmp.ne.s32.totalorder %s9008_s21, %s9004_s20 }
  0x26   : > { %p45_p8 = scmp.eq.s32.totalorder %s9012_s22, 0  ;;  %p50_p9 = scmp.ne.s32.totalorder %s9004_s20, %s9000_s19 }
  0x27   : > { %s9178_s10 = scalar_select %p35_p6, %s9008_s21, %s37_s13  }
  0x28   : > { %p46_p10 = por %p45_p8, %p44_p7  ;;  %p9182_p11 = por %p9117_p1, %p50_p9 }
  0x29   : > { %p8617_p12 = scmp.lt.s32.totalorder %s9012_s22, 3  ;;  %s407_s14 = sand.u32 1, %s9008_s21  }
  0x2a   : > { %s8551_s25 = smul.u32 160, %s407_s14  ;;  %s408_s18 = scalar_lea.sflag [#allocation4], %s407_s14 }
  0x2b   : > { %s8552_s28 = smul.u32 160, %s9012_s22  ;;  %p9189_p13 = pnand %p8617_p12, %p46_p10 }
  0x2c   : > { %s411_s12 = scalar_lea.vmem [#allocation3], %s8551_s25  ;;  %s8939_s17 = scalar_lea.hbm %s10566_s0, 480 }
  0x2d   : > { %s417_s19 = scalar_lea.hbm %s10566_s0, %s8552_s28  ;;  %s420_s15 = sshll.u32 %s411_s12, 4  ;;  %s421_s15 = int_to_ptr.vmem [resolvable:$true] %s420_s15 }
  0x2e   : > { %s418_s16 = sshll.u32 %s417_s19, 4  ;;  %p8936_p2 = pneg %p9189_p13  ;;  %s419_s16 = int_to_ptr.hbm [resolvable:$true] %s418_s16 }
  0x2f   : > { %s8932_s24 = sshra.s32 %s419_s16, 4  ;;  %s8933_s24 = int_to_ptr.hbm [resolvable:$true] %s8932_s24 }
  0x30   : > { %s8934_s23 = scalar_lea.hbm %s8933_s24, 160  ;;  %p8940_p6 = scmp.lt.s32.totalorder %s8933_s24, %s10566_s0 }
  0x31   : > { %p8935_p0 = scmp.ne.s32.totalorder %s8933_s24, %s8934_s23  ;;  %p8941_p7 = scmp.lt.s32.totalorder %s8939_s17, %s8934_s23 }
  0x33   : > { %p8937_p4 = pnand %p8936_p2, %p8935_p0  ;;  %p8942_p8 = por %p8941_p7, %p8940_p6 }
  0x35   : > { %p8938_p5 = pneg %p8937_p4 }
  0x37   : > { %p8943_p9 = pnand %p8942_p8, %p8938_p5 }
  0x39   : > { %8946 = shalt.err (!%p8943_p9)
}
  0x3a   : > { %s9025_s14 = smov 1280   ;;  %s9026_s25 = smov 80  }
  0x3b   : > { %8609 = dma.hbm_to_vmem [thread:$0]  (!%p9189_p13), %s419_s16, 2560, %s421_s15, %s408_s18, %s9025_s14, %s9025_s14, %s9026_s25  }
  0x3c   : > { %432 = sbr.rel (%p9122_p3) target bundleno = 1349 (0x545), region = 64  ;;  %s434_s2 = sand.u32 (!%p9122_p3), 1, %s9004_s20  }
  0x3d   : > { %s8553_s19 = smul.u32 (!%p9122_p3), 160, %s434_s2  ;;  %s435_s12 = scalar_lea.sflag (!%p9122_p3), [#allocation4], %s434_s2 }
  0x3f   : > { %s9209_s13 = scalar_lea.vmem (!%p9122_p3), [#allocation3], %s8553_s19 }
  0x41   : > { %8979 = dma.done.wait (%p9182_p11), %s435_s12, 2560  }
  0x42   : > { %8981 = vsyncadd (%p9182_p11), %s435_s12, 4294964736 }
  0x43   : > { %8983 = dma.done.wait (%p9117_p1), [#allocation6], 51280  }
  0x44   : > { %8985 = vsyncadd (%p9117_p1), [#allocation6], 4294916016 }
  0x45   : > { %8987 = dma.done.wait (%p9117_p1), [#allocation9], 80  }
  0x46   : > { %8989 = vsyncadd (%p9117_p1), [#allocation9], 4294967216 }
  0x47   : > { %8991 = dma.done.wait (%p9117_p1), [#allocation12], 1296  }
  0x48   : > { %8993 = vsyncadd (%p9117_p1), [#allocation12], 4294966000 }
  0x49   : > { %8995 = dma.done.wait (%p9117_p1), [#allocation15], 16  }
  0x4a   : > { %8997 = vsyncadd (%p9117_p1), [#allocation15], 4294967280  ;;  %v5838_v1 = vld [vmem:[#allocation5 + $0x118] sm:$0xf]  ;;  %v8018_v2 = vld [vmem:[#allocation5 + $0x128] sm:$0xf0] }
  0x4b   : > { %v5998_v3 = vld [vmem:[#allocation5 + $0x258] sm:$0xf]  ;;  %v5839_v4 = vor.u32 %v8018_v2, %v5838_v1  ;;  %v8058_v5 = vld [vmem:[#allocation5 + $0x268] sm:$0xf0]  ;;  %v5818_v12 = vld [vmem:[#allocation5 + $0xf0] sm:$0xf] }
  0x4c   : > { %v6158_v6 = vld [vmem:[#allocation5 + $0x398] sm:$0xf]  ;;  %v8098_v7 = vld [vmem:[#allocation5 + $0x3a8] sm:$0xf0]  ;;  %v5999_v8 = vor.u32 %v8058_v5, %v5998_v3  ;;  %v8013_v14 = vld [vmem:[#allocation5 + $0x100] sm:$0xf0] }
  0x4d   : > { %v6159_v9 = vor.u32 %v8098_v7, %v6158_v6  ;;  %v6318_v10 = vld [vmem:[#allocation5 + $0x4d8] sm:$0xf]  ;;  %v8138_v11 = vld [vmem:[#allocation5 + $0x4e8] sm:$0xf0]  ;;  %3123 = vmatpush.bf16.msra.mxu0 %v5839_v4  ;;  %v5978_v15 = vld [vmem:[#allocation5 + $0x230] sm:$0xf]  ;;  %v5819_v17 = vor.u32 %v8013_v14, %v5818_v12 }
  0x4e   : > { %v6319_v13 = vor.u32 %v8138_v11, %v6318_v10  ;;  %v8053_v16 = vld [vmem:[#allocation5 + $0x240] sm:$0xf0]  ;;  %3137 = vmatpush.bf16.msra.mxu1 %v5999_v8  ;;  %v6138_v19 = vld [vmem:[#allocation5 + $0x370] sm:$0xf]  ;;  %v5798_v24 = vld [vmem:[#allocation5 + $0xc8] sm:$0xf] }
  0x4f   : > { %3151 = vmatpush.bf16.msra.mxu2 %v6159_v9  ;;  %v5979_v18 = vor.u32 %v8053_v16, %v5978_v15  ;;  %v8093_v20 = vld [vmem:[#allocation5 + $0x380] sm:$0xf0]  ;;  %v6298_v21 = vld [vmem:[#allocation5 + $0x4b0] sm:$0xf]  ;;  %v8008_v25 = vld [vmem:[#allocation5 + $0xd8] sm:$0xf0] }
  0x50   : > { %3165 = vmatpush.bf16.msra.mxu3 %v6319_v13  ;;  %v6139_v22 = vor.u32 %v8093_v20, %v6138_v19  ;;  %v8133_v23 = vld [vmem:[#allocation5 + $0x4c0] sm:$0xf0]  ;;  %v5958_v27 = vld [vmem:[#allocation5 + $0x208] sm:$0xf]  ;;  %v8048_v28 = vld [vmem:[#allocation5 + $0x218] sm:$0xf0]  ;;  %v5799_v30 = vor.u32 %v8008_v25, %v5798_v24 }
  0x51   : > { %v6299_v26 = vor.u32 %v8133_v23, %v6298_v21  ;;  %v6118_v29 = vld [vmem:[#allocation5 + $0x348] sm:$0xf]  ;;  %3124 = vmatpush.bf16.msra.mxu0 %v5819_v17  ;;  %v8088_v31 = vld [vmem:[#allocation5 + $0x358] sm:$0xf0]  ;;  %v5959_v34 = vor.u32 %v8048_v28, %v5958_v27  ;;  %v5778_v36 = vld [vmem:[#allocation5 + $0xa0] sm:$0xf] }
  0x52   : > { %v6278_v32 = vld [vmem:[#allocation5 + $0x488] sm:$0xf]  ;;  %v8128_v33 = vld [vmem:[#allocation5 + $0x498] sm:$0xf0]  ;;  %3138 = vmatpush.bf16.msra.mxu1 %v5979_v18  ;;  %v6119_v35 = vor.u32 %v8088_v31, %v6118_v29  ;;  %v8003_v37 = vld [vmem:[#allocation5 + $0xb0] sm:$0xf0] }
  0x53   : > { %3152 = vmatpush.bf16.msra.mxu2 %v6139_v22  ;;  %v5938_v38 = vld [vmem:[#allocation5 + $0x1e0] sm:$0xf]  ;;  %v6279_v39 = vor.u32 %v8128_v33, %v6278_v32  ;;  %v8043_v40 = vld [vmem:[#allocation5 + $0x1f0] sm:$0xf0]  ;;  %v5779_v45 = vor.u32 %v8003_v37, %v5778_v36  ;;  %v5758_v48 = vld [vmem:[#allocation5 + $0x78] sm:$0xf] }
  0x54   : > { %3166 = vmatpush.bf16.msra.mxu3 %v6299_v26  ;;  %v6098_v41 = vld [vmem:[#allocation5 + $0x320] sm:$0xf]  ;;  %v8083_v42 = vld [vmem:[#allocation5 + $0x330] sm:$0xf0]  ;;  %v5939_v46 = vor.u32 %v8043_v40, %v5938_v38  ;;  %v7998_v49 = vld [vmem:[#allocation5 + $0x88] sm:$0xf0] }
  0x55   : > { %v6258_v43 = vld [vmem:[#allocation5 + $0x460] sm:$0xf]  ;;  %v8123_v44 = vld [vmem:[#allocation5 + $0x470] sm:$0xf0]  ;;  %3125 = vmatpush.bf16.msra.mxu0 %v5799_v30  ;;  %v6099_v47 = vor.u32 %v8083_v42, %v6098_v41  ;;  %v5918_v50 = vld [vmem:[#allocation5 + $0x1b8] sm:$0xf]  ;;  %v5759_v57 = vor.u32 %v7998_v49, %v5758_v48 }
  0x56   : > { %3139 = vmatpush.bf16.msra.mxu1 %v5959_v34  ;;  %v6259_v51 = vor.u32 %v8123_v44, %v6258_v43  ;;  %v8038_v52 = vld [vmem:[#allocation5 + $0x1c8] sm:$0xf0]  ;;  %v6078_v53 = vld [vmem:[#allocation5 + $0x2f8] sm:$0xf]  ;;  %v5738_v60 = vld [vmem:[#allocation5 + $0x50] sm:$0xf] }
  0x57   : > { %3153 = vmatpush.bf16.msra.mxu2 %v6119_v35  ;;  %v8078_v54 = vld [vmem:[#allocation5 + $0x308] sm:$0xf0]  ;;  %v6238_v55 = vld [vmem:[#allocation5 + $0x438] sm:$0xf]  ;;  %v5919_v58 = vor.u32 %v8038_v52, %v5918_v50  ;;  %v7993_v61 = vld [vmem:[#allocation5 + $0x60] sm:$0xf0] }
  0x58   : > { %3167 = vmatpush.bf16.msra.mxu3 %v6279_v39  ;;  %v8118_v56 = vld [vmem:[#allocation5 + $0x448] sm:$0xf0]  ;;  %v6079_v59 = vor.u32 %v8078_v54, %v6078_v53  ;;  %v5898_v62 = vld [vmem:[#allocation5 + $0x190] sm:$0xf]  ;;  %v8033_v0 = vld [vmem:[#allocation5 + $0x1a0] sm:$0xf0]  ;;  %v5739_v5 = vor.u32 %v7993_v61, %v5738_v60 }
  0x59   : > { %3126 = vmatpush.bf16.msra.mxu0 %v5779_v45  ;;  %v6239_v63 = vor.u32 %v8118_v56, %v6238_v55  ;;  %v6058_v1 = vld [vmem:[#allocation5 + $0x2d0] sm:$0xf]  ;;  %v8073_v2 = vld [vmem:[#allocation5 + $0x2e0] sm:$0xf0]  ;;  %v5899_v6 = vor.u32 %v8033_v0, %v5898_v62  ;;  %v5718_v8 = vld [vmem:[#allocation5 + $0x28] sm:$0xf] }
  0x5a   : > { %3140 = vmatpush.bf16.msra.mxu1 %v5939_v46  ;;  %v6218_v3 = vld [vmem:[#allocation5 + $0x410] sm:$0xf]  ;;  %v8113_v4 = vld [vmem:[#allocation5 + $0x420] sm:$0xf0]  ;;  %v6059_v7 = vor.u32 %v8073_v2, %v6058_v1  ;;  %v7988_v9 = vld [vmem:[#allocation5 + $0x38] sm:$0xf0] }
  0x5b   : > { %3154 = vmatpush.bf16.msra.mxu2 %v6099_v47  ;;  %v5878_v10 = vld [vmem:[#allocation5 + $0x168] sm:$0xf]  ;;  %v6219_v11 = vor.u32 %v8113_v4, %v6218_v3  ;;  %v8028_v12 = vld [vmem:[#allocation5 + $0x178] sm:$0xf0]  ;;  %v5719_v17 = vor.u32 %v7988_v9, %v5718_v8  ;;  %v5698_v18 = vld [vmem:[#allocation5] sm:$0xf] }
  0x5c   : > { %3168 = vmatpush.bf16.msra.mxu3 %v6259_v51  ;;  %v6038_v13 = vld [vmem:[#allocation5 + $0x2a8] sm:$0xf]  ;;  %v8068_v14 = vld [vmem:[#allocation5 + $0x2b8] sm:$0xf0]  ;;  %v7983_v19 = vld [vmem:[#allocation5 + $0x10] sm:$0xf0]  ;;  %v5879_v20 = vor.u32 %v8028_v12, %v5878_v10 }
  0x5d   : > { %3127 = vmatpush.bf16.msra.mxu0 %v5759_v57  ;;  %v6198_v15 = vld [vmem:[#allocation5 + $0x3e8] sm:$0xf]  ;;  %v8108_v16 = vld [vmem:[#allocation5 + $0x3f8] sm:$0xf0]  ;;  %v6039_v21 = vor.u32 %v8068_v14, %v6038_v13  ;;  %v5858_v22 = vld [vmem:[#allocation5 + $0x140] sm:$0xf]  ;;  %v5699_v32 = vor.u32 %v7983_v19, %v5698_v18 }
  0x5e   : > { %3141 = vmatpush.bf16.msra.mxu1 %v5919_v58  ;;  %v8023_v23 = vld [vmem:[#allocation5 + $0x150] sm:$0xf0]  ;;  %v6018_v24 = vld [vmem:[#allocation5 + $0x280] sm:$0xf]  ;;  %v6199_v25 = vor.u32 %v8108_v16, %v6198_v15  ;;  %v6478_v29 = vld [vmem:[#allocation5 + $0x618] sm:$0xf] }
  0x5f   : > { %3155 = vmatpush.bf16.msra.mxu2 %v6079_v59  ;;  %v8063_v26 = vld [vmem:[#allocation5 + $0x290] sm:$0xf0]  ;;  %v6178_v27 = vld [vmem:[#allocation5 + $0x3c0] sm:$0xf]  ;;  %v8178_v30 = vld [vmem:[#allocation5 + $0x628] sm:$0xf0]  ;;  %v5859_v36 = vor.u32 %v8023_v23, %v5858_v22 }
  0x60   : > { %3169 = vmatpush.bf16.msra.mxu3 %v6239_v63  ;;  %v8103_v28 = vld [vmem:[#allocation5 + $0x3d0] sm:$0xf0]  ;;  %v6638_v31 = vld [vmem:[#allocation5 + $0x758] sm:$0xf]  ;;  %v8218_v33 = vld [vmem:[#allocation5 + $0x768] sm:$0xf0]  ;;  %v6019_v37 = vor.u32 %v8063_v26, %v6018_v24  ;;  %v6479_v41 = vor.u32 %v8178_v30, %v6478_v29 }
  0x61   : > { %3128 = vmatpush.bf16.msra.mxu0 %v5739_v5  ;;  %v6798_v34 = vld [vmem:[#allocation5 + $0x898] sm:$0xf]  ;;  %v8258_v35 = vld [vmem:[#allocation5 + $0x8a8] sm:$0xf0]  ;;  %v6179_v40 = vor.u32 %v8103_v28, %v6178_v27  ;;  %v6458_v42 = vld [vmem:[#allocation5 + $0x5f0] sm:$0xf]  ;;  %v6639_v44 = vor.u32 %v8218_v33, %v6638_v31 }
  0x62   : > { %3142 = vmatpush.bf16.msra.mxu1 %v5899_v6  ;;  %v6958_v38 = vld [vmem:[#allocation5 + $0x9d8] sm:$0xf]  ;;  %v8298_v39 = vld [vmem:[#allocation5 + $0x9e8] sm:$0xf0]  ;;  %v8173_v43 = vld [vmem:[#allocation5 + $0x600] sm:$0xf0]  ;;  %v6799_v45 = vor.u32 %v8258_v35, %v6798_v34 }
  0x63   : > { %3156 = vmatpush.bf16.msra.mxu2 %v6059_v7  ;;  %v6618_v46 = vld [vmem:[#allocation5 + $0x730] sm:$0xf]  ;;  %v8213_v47 = vld [vmem:[#allocation5 + $0x740] sm:$0xf0]  ;;  %v6959_v49 = vor.u32 %v8298_v39, %v6958_v38  ;;  %v6459_v56 = vor.u32 %v8173_v43, %v6458_v42  ;;  %v6438_v57 = vld [vmem:[#allocation5 + $0x5c8] sm:$0xf] }
  0x64   : > { %3170 = vmatpush.bf16.msra.mxu3 %v6219_v11  ;;  %v6778_v48 = vld [vmem:[#allocation5 + $0x870] sm:$0xf]  ;;  %v8253_v50 = vld [vmem:[#allocation5 + $0x880] sm:$0xf0]  ;;  %v8168_v58 = vld [vmem:[#allocation5 + $0x5d8] sm:$0xf0]  ;;  %v6619_v61 = vor.u32 %v8213_v47, %v6618_v46 }
  0x65   : > { %3129 = vmatpush.bf16.msra.mxu0 %v5719_v17  ;;  %v6938_v51 = vld [vmem:[#allocation5 + $0x9b0] sm:$0xf]  ;;  %v8293_v52 = vld [vmem:[#allocation5 + $0x9c0] sm:$0xf0]  ;;  %v6779_v62 = vor.u32 %v8253_v50, %v6778_v48  ;;  %v6598_v63 = vld [vmem:[#allocation5 + $0x708] sm:$0xf]  ;;  %v6439_v10 = vor.u32 %v8168_v58, %v6438_v57 }
  0x66   : > { %3143 = vmatpush.bf16.msra.mxu1 %v5879_v20  ;;  %v521_v53 = vld [vmem:[%s9209_s13] sm:$0xff]  ;;  %v531_v54 = vld [vmem:[%s9209_s13 + $0x50] sm:$0xff]  ;;  %v8208_v0 = vld [vmem:[#allocation5 + $0x718] sm:$0xf0]  ;;  %v6939_v3 = vor.u32 %v8293_v52, %v6938_v51  ;;  %vm5239_vm0 = vcmask 523264   ;;  %vm5449_vm1 = vcmask 261120  }
  0x67   : > { %3157 = vmatpush.bf16.msra.mxu2 %v6039_v21  ;;  %v523_v55 = vld [vmem:[%s9209_s13 + $0x10] sm:$0xff]  ;;  %v9234_v59 = vpack.c.bf16 %v531_v54, %v521_v53  ;;  %v533_v60 = vld [vmem:[%s9209_s13 + $0x60] sm:$0xff]  ;;  %v6758_v1 = vld [vmem:[#allocation5 + $0x848] sm:$0xf]  ;;  %v6599_v13 = vor.u32 %v8208_v0, %v6598_v63  ;;  %vm5504_vm2 = vcmask 654336   ;;  %s10592_s30 = sadd.s32 4294967295, %s9012_s22  }
  0x68   : > { %3171 = vmatpush.bf16.msra.mxu3 %v6199_v25  ;;  %v9237_v2 = vpack.c.bf16 %v533_v60, %v523_v55  ;;  %v8248_v4 = vld [vmem:[#allocation5 + $0x858] sm:$0xf0]  ;;  %v6918_v5 = vld [vmem:[#allocation5 + $0x988] sm:$0xf]  ;;  %v6418_v15 = vld [vmem:[#allocation5 + $0x5a0] sm:$0xf] }
  0x69   : > { %3130 = vmatpush.bf16.msra.mxu0 %v5699_v32  ;;  %v8288_v6 = vld [vmem:[#allocation5 + $0x998] sm:$0xf0]  ;;  %v522_v7 = vld [vmem:[%s9209_s13 + $0x8] sm:$0xff]  ;;  %v6759_v14 = vor.u32 %v8248_v4, %v6758_v1  ;;  %v8163_v16 = vld [vmem:[#allocation5 + $0x5b0] sm:$0xf0]  ;;  %s5694_s28 = sshll.u32 %s10592_s30, 1 }
  0x6a   : > { %3144 = vmatpush.bf16.msra.mxu1 %v5859_v36  ;;  %v532_v8 = vld [vmem:[%s9209_s13 + $0x58] sm:$0xff]  ;;  %v534_v12 = vld [vmem:[%s9209_s13 + $0x68] sm:$0xff]  ;;  %v6578_v17 = vld [vmem:[#allocation5 + $0x6e0] sm:$0xf]  ;;  %v6919_v19 = vor.u32 %v8288_v6, %v6918_v5  ;;  %v6419_v25 = vor.u32 %v8163_v16, %v6418_v15  ;;  %p515_p1 = scmp.lt.s32.totalorder %s5694_s28, 5  ;;  %vm5535_vm3 = vcmask 7168  }
  0x6b   : > { %3158 = vmatpush.bf16.msra.mxu2 %v6019_v37  ;;  %v524_v9 = vld [vmem:[%s9209_s13 + $0x18] sm:$0xff]  ;;  %v9244_v11 = vpack.c.bf16 %v532_v8, %v522_v7  ;;  %v8203_v20 = vld [vmem:[#allocation5 + $0x6f0] sm:$0xf0]  ;;  %v6738_v21 = vld [vmem:[#allocation5 + $0x820] sm:$0xf] }
  0x6c   : > { %3172 = vmatpush.bf16.msra.mxu3 %v6179_v40  ;;  %3131 = vmatmul.bf16.vlgmr.msra.gmra.mxu0 %v9234_v59  ;;  %v9247_v18 = vpack.c.bf16 %v534_v12, %v524_v9  ;;  %v8243_v22 = vld [vmem:[#allocation5 + $0x830] sm:$0xf0]  ;;  %v6898_v23 = vld [vmem:[#allocation5 + $0x960] sm:$0xf]  ;;  %v6579_v26 = vor.u32 %v8203_v20, %v6578_v17  ;;  %v6398_v28 = vld [vmem:[#allocation5 + $0x578] sm:$0xf] }
  0x6d   : > { %3179 = vmatpush.bf16.msrb.mxu0 %v6479_v41  ;;  %3145 = vmatmul.bf16.vlgmr.msra.gmra.mxu1 %v9244_v11  ;;  %v8283_v24 = vld [vmem:[#allocation5 + $0x970] sm:$0xf0]  ;;  %v6739_v27 = vor.u32 %v8243_v22, %v6738_v21  ;;  %v8158_v29 = vld [vmem:[#allocation5 + $0x588] sm:$0xf0]  ;;  %v6558_v30 = vld [vmem:[#allocation5 + $0x6b8] sm:$0xf] }
  0x6e   : > { %3193 = vmatpush.bf16.msrb.mxu1 %v6639_v44  ;;  %3159 = vmatmul.bf16.vlgmr.msra.gmra.mxu2 %v9237_v2  ;;  %v6899_v31 = vor.u32 %v8283_v24, %v6898_v23  ;;  %v8198_v32 = vld [vmem:[#allocation5 + $0x6c8] sm:$0xf0]  ;;  %v6718_v33 = vld [vmem:[#allocation5 + $0x7f8] sm:$0xf]  ;;  %v6399_v37 = vor.u32 %v8158_v29, %v6398_v28  ;;  %v6378_v40 = vld [vmem:[#allocation5 + $0x550] sm:$0xf] }
  0x6f   : > { %3207 = vmatpush.bf16.msrb.mxu2 %v6799_v45  ;;  %3173 = vmatmul.bf16.vlgmr.msra.gmra.mxu3 %v9247_v18  ;;  %v8238_v34 = vld [vmem:[#allocation5 + $0x808] sm:$0xf0]  ;;  %v6878_v35 = vld [vmem:[#allocation5 + $0x938] sm:$0xf]  ;;  %v6559_v38 = vor.u32 %v8198_v32, %v6558_v30  ;;  %v8153_v41 = vld [vmem:[#allocation5 + $0x560] sm:$0xf0] }
  0x70   : > { %3221 = vmatpush.bf16.msrb.mxu3 %v6959_v49  ;;  %v8278_v36 = vld [vmem:[#allocation5 + $0x948] sm:$0xf0]  ;;  %v6719_v39 = vor.u32 %v8238_v34, %v6718_v33  ;;  %v6538_v42 = vld [vmem:[#allocation5 + $0x690] sm:$0xf]  ;;  %v8193_v44 = vld [vmem:[#allocation5 + $0x6a0] sm:$0xf0]  ;;  %v6379_v49 = vor.u32 %v8153_v41, %v6378_v40 }
  0x71   : > { %3180 = vmatpush.bf16.msrb.mxu0 %v6459_v56  ;;  %v6879_v43 = vor.u32 %v8278_v36, %v6878_v35  ;;  %v6698_v45 = vld [vmem:[#allocation5 + $0x7d0] sm:$0xf]  ;;  %v8233_v46 = vld [vmem:[#allocation5 + $0x7e0] sm:$0xf0]  ;;  %v6358_v50 = vld [vmem:[#allocation5 + $0x528] sm:$0xf]  ;;  %v6539_v51 = vor.u32 %v8193_v44, %v6538_v42 }
  0x72   : > { %3194 = vmatpush.bf16.msrb.mxu1 %v6619_v61  ;;  %v6858_v47 = vld [vmem:[#allocation5 + $0x910] sm:$0xf]  ;;  %v8273_v48 = vld [vmem:[#allocation5 + $0x920] sm:$0xf0]  ;;  %v6699_v52 = vor.u32 %v8233_v46, %v6698_v45  ;;  %v8148_v53 = vld [vmem:[#allocation5 + $0x538] sm:$0xf0] }
  0x73   : > { %3208 = vmatpush.bf16.msrb.mxu2 %v6779_v62  ;;  %v6518_v54 = vld [vmem:[#allocation5 + $0x668] sm:$0xf]  ;;  %v8188_v55 = vld [vmem:[#allocation5 + $0x678] sm:$0xf0]  ;;  %v6859_v56 = vor.u32 %v8273_v48, %v6858_v47  ;;  %v6338_v62 = vld [vmem:[#allocation5 + $0x500] sm:$0xf]  ;;  %v6359_v0 = vor.u32 %v8148_v53, %v6358_v50 }
  0x74   : > { %3222 = vmatpush.bf16.msrb.mxu3 %v6939_v3  ;;  %v6678_v57 = vld [vmem:[#allocation5 + $0x7a8] sm:$0xf]  ;;  %v8228_v58 = vld [vmem:[#allocation5 + $0x7b8] sm:$0xf0]  ;;  %v8143_v63 = vld [vmem:[#allocation5 + $0x510] sm:$0xf0]  ;;  %v6519_v6 = vor.u32 %v8188_v55, %v6518_v54 }
  0x75   : > { %3181 = vmatpush.bf16.msrb.mxu0 %v6439_v10  ;;  %v6838_v60 = vld [vmem:[#allocation5 + $0x8e8] sm:$0xf]  ;;  %v8268_v61 = vld [vmem:[#allocation5 + $0x8f8] sm:$0xf0]  ;;  %v6498_v1 = vld [vmem:[#allocation5 + $0x640] sm:$0xf]  ;;  %v6679_v7 = vor.u32 %v8228_v58, %v6678_v57  ;;  %v6339_v20 = vor.u32 %v8143_v63, %v6338_v62 }
  0x76   : > { %3195 = vmatpush.bf16.msrb.mxu1 %v6599_v13  ;;  %v8183_v3 = vld [vmem:[#allocation5 + $0x650] sm:$0xf0]  ;;  %v6658_v4 = vld [vmem:[#allocation5 + $0x780] sm:$0xf]  ;;  %v7118_v10 = vld [vmem:[#allocation5 + $0xb18] sm:$0xf]  ;;  %v6839_v12 = vor.u32 %v8268_v61, %v6838_v60 }
  0x77   : > { %3209 = vmatpush.bf16.msrb.mxu2 %v6759_v14  ;;  %v8223_v5 = vld [vmem:[#allocation5 + $0x790] sm:$0xf0]  ;;  %v6818_v8 = vld [vmem:[#allocation5 + $0x8c0] sm:$0xf]  ;;  %v8338_v13 = vld [vmem:[#allocation5 + $0xb28] sm:$0xf0]  ;;  %v6499_v24 = vor.u32 %v8183_v3, %v6498_v1 }
  0x78   : > { %3223 = vmatpush.bf16.msrb.mxu3 %v6919_v19  ;;  %v8263_v9 = vld [vmem:[#allocation5 + $0x8d0] sm:$0xf0]  ;;  %v7278_v14 = vld [vmem:[#allocation5 + $0xc58] sm:$0xf]  ;;  %v8378_v15 = vld [vmem:[#allocation5 + $0xc68] sm:$0xf0]  ;;  %v7119_v30 = vor.u32 %v8338_v13, %v7118_v10 }
  0x79   : > { %3182 = vmatpush.bf16.msrb.mxu0 %v6419_v25  ;;  %v8016_v16 = vld [vmem:[#allocation5 + $0x11c] sm:$0xf]  ;;  %v5840_v17 = vld [vmem:[#allocation5 + $0x12c] sm:$0xf0]  ;;  %v525_v22 = vld [vmem:[%s9209_s13 + $0x20] sm:$0xff]  ;;  %v6659_v25 = vor.u32 %v8223_v5, %v6658_v4  ;;  %v6819_v29 = vor.u32 %v8263_v9, %v6818_v8  ;;  %v7279_v34 = vor.u32 %v8378_v15, %v7278_v14  ;;  %s10598_s28 = smov (!%p515_p1, %s5694_s28), 5 }
  0x7a   : > { %3196 = vmatpush.bf16.msrb.mxu1 %v6579_v26  ;;  %v8056_v19 = vld [vmem:[#allocation5 + $0x25c] sm:$0xf]  ;;  %v6000_v21 = vld [vmem:[#allocation5 + $0x26c] sm:$0xf0]  ;;  %v526_v28 = vld [vmem:[%s9209_s13 + $0x28] sm:$0xff]  ;;  %v5843_v35 = vor.u32 %v8016_v16, %v5840_v17  ;;  %s5695_s14 = sshll.u32 %s10598_s28, 3 }
  0x7b   : > { %3210 = vmatpush.bf16.msrb.mxu2 %v6739_v27  ;;  %v535_v23 = vld [vmem:[%s9209_s13 + $0x70] sm:$0xff]  ;;  %v537_v27 = vld [vmem:[%s9209_s13 + $0x80] sm:$0xff]  ;;  %v528_v32 = vld [vmem:[%s9209_s13 + $0x38] sm:$0xff]  ;;  %s518_s22 = scalar_lea.vmem %s10577_s11, %s5695_s14 }
  0x7c   : > { %3224 = vmatpush.bf16.msrb.mxu3 %v6899_v31  ;;  %v527_v26 = vld [vmem:[%s9209_s13 + $0x30] sm:$0xff]  ;;  %v536_v31 = vld [vmem:[%s9209_s13 + $0x78] sm:$0xff]  ;;  %v538_v33 = vld [vmem:[%s9209_s13 + $0x88] sm:$0xff]  ;;  %v9259_v40 = vpack.c.bf16 %v535_v23, %v525_v22 }
  0x7d   : > { %3183 = vmatpush.bf16.msrb.mxu0 %v6399_v37  ;;  %v7098_v36 = vld [vmem:[#allocation5 + $0xaf0] sm:$0xf]  ;;  %v8333_v37 = vld [vmem:[#allocation5 + $0xb00] sm:$0xf0]  ;;  %v8011_v42 = vld [vmem:[#allocation5 + $0xf4] sm:$0xf]  ;;  %v9261_v44 = vpack.c.bf16 %v537_v27, %v527_v26  ;;  %v9263_v45 = vpack.c.bf16 %v536_v31, %v526_v28  ;;  %v9265_v48 = vpack.c.bf16 %v538_v33, %v528_v32 }
  0x7e   : > { %3197 = vmatpush.bf16.msrb.mxu1 %v6559_v38  ;;  %v7258_v38 = vld [vmem:[#allocation5 + $0xc30] sm:$0xf]  ;;  %v8373_v41 = vld [vmem:[#allocation5 + $0xc40] sm:$0xf0]  ;;  %v8051_v46 = vld [vmem:[#allocation5 + $0x234] sm:$0xf] }
  0x7f   : > { %3211 = vmatpush.bf16.msrb.mxu2 %v6719_v39  ;;  %v6003_v39 = vor.u32 %v8056_v19, %v6000_v21  ;;  %v5980_v47 = vld [vmem:[#allocation5 + $0x244] sm:$0xf0]  ;;  %v7259_v50 = vor.u32 %v8373_v41, %v7258_v38  ;;  %v8328_v53 = vld [vmem:[#allocation5 + $0xad8] sm:$0xf0]  ;;  %v8006_v57 = vld [vmem:[#allocation5 + $0xcc] sm:$0xf] }
  0x80   : > { %3225 = vmatpush.bf16.msrb.mxu3 %v6879_v43  ;;  %v5820_v43 = vld [vmem:[#allocation5 + $0x104] sm:$0xf0]  ;;  %v5983_v55 = vor.u32 %v8051_v46, %v5980_v47  ;;  %v5800_v58 = vld [vmem:[#allocation5 + $0xdc] sm:$0xf0]  ;;  %v8046_v60 = vld [vmem:[#allocation5 + $0x20c] sm:$0xf] }
  0x81   : > { %3184 = vmatpush.bf16.msrb.mxu0 %v6379_v49  ;;  %v7099_v49 = vor.u32 %v8333_v37, %v7098_v36  ;;  %v7238_v54 = vld [vmem:[#allocation5 + $0xc08] sm:$0xf]  ;;  %v5960_v61 = vld [vmem:[#allocation5 + $0x21c] sm:$0xf0]  ;;  %v8323_v3 = vld [vmem:[#allocation5 + $0xab0] sm:$0xf0] }
  0x82   : > { %3198 = vmatpush.bf16.msrb.mxu1 %v6539_v51  ;;  %v5823_v51 = vor.u32 %v8011_v42, %v5820_v43  ;;  %v7058_v1 = vld [vmem:[#allocation5 + $0xaa0] sm:$0xf]  ;;  %v5963_v5 = vor.u32 %v8046_v60, %v5960_v61  ;;  %v5780_v8 = vld [vmem:[#allocation5 + $0xb4] sm:$0xf0]  ;;  %v8041_v9 = vld [vmem:[#allocation5 + $0x1e4] sm:$0xf] }
  0x83   : > { %3212 = vmatpush.bf16.msrb.mxu2 %v6699_v52  ;;  %v7078_v52 = vld [vmem:[#allocation5 + $0xac8] sm:$0xf]  ;;  %v7218_v4 = vld [vmem:[#allocation5 + $0xbe0] sm:$0xf]  ;;  %v5940_v10 = vld [vmem:[#allocation5 + $0x1f4] sm:$0xf0] }
  0x84   : > { %3226 = vmatpush.bf16.msrb.mxu3 %v6859_v56  ;;  %v8368_v56 = vld [vmem:[#allocation5 + $0xc18] sm:$0xf0]  ;;  %v7079_v62 = vor.u32 %v8328_v53, %v7078_v52  ;;  %v7038_v15 = vld [vmem:[#allocation5 + $0xa78] sm:$0xf]  ;;  %v8318_v16 = vld [vmem:[#allocation5 + $0xa88] sm:$0xf0]  ;;  %v5943_v19 = vor.u32 %v8041_v9, %v5940_v10 }
  0x85   : > { %3185 = vmatpush.bf16.msrb.mxu0 %v6359_v0  ;;  %v7239_v63 = vor.u32 %v8368_v56, %v7238_v54  ;;  %v5803_v0 = vor.u32 %v8006_v57, %v5800_v58  ;;  %v7198_v17 = vld [vmem:[#allocation5 + $0xbb8] sm:$0xf]  ;;  %v7996_v21 = vld [vmem:[#allocation5 + $0x7c] sm:$0xf]  ;;  %v5760_v22 = vld [vmem:[#allocation5 + $0x8c] sm:$0xf0] }
  0x86   : > { %3199 = vmatpush.bf16.msrb.mxu1 %v6519_v6  ;;  %v8363_v6 = vld [vmem:[#allocation5 + $0xbf0] sm:$0xf0]  ;;  %v8036_v23 = vld [vmem:[#allocation5 + $0x1bc] sm:$0xf]  ;;  %v5763_v27 = vor.u32 %v7996_v21, %v5760_v22  ;;  %v7018_v28 = vld [vmem:[#allocation5 + $0xa50] sm:$0xf] }
  0x87   : > { %3213 = vmatpush.bf16.msrb.mxu2 %v6679_v7  ;;  %v8001_v7 = vld [vmem:[#allocation5 + $0xa4] sm:$0xf]  ;;  %v7219_v13 = vor.u32 %v8363_v6, %v7218_v4  ;;  %v7991_v33 = vld [vmem:[#allocation5 + $0x54] sm:$0xf]  ;;  %v5900_v36 = vld [vmem:[#allocation5 + $0x1a4] sm:$0xf0] }
  0x88   : > { %3227 = vmatpush.bf16.msrb.mxu3 %v6839_v12  ;;  %v7059_v12 = vor.u32 %v8323_v3, %v7058_v1  ;;  %v5783_v14 = vor.u32 %v8001_v7, %v5780_v8  ;;  %v8353_v32 = vld [vmem:[#allocation5 + $0xba0] sm:$0xf0]  ;;  %v6998_v41 = vld [vmem:[#allocation5 + $0xa28] sm:$0xf]  ;;  %v8308_v42 = vld [vmem:[#allocation5 + $0xa38] sm:$0xf0] }
  0x89   : > { %3186 = vmatpush.bf16.msrb.mxu0 %v6339_v20  ;;  %v8358_v20 = vld [vmem:[#allocation5 + $0xbc8] sm:$0xf0]  ;;  %v7158_v43 = vld [vmem:[#allocation5 + $0xb68] sm:$0xf]  ;;  %v8348_v47 = vld [vmem:[#allocation5 + $0xb78] sm:$0xf0]  ;;  %v6999_v53 = vor.u32 %v8308_v42, %v6998_v41 }
  0x8a   : > { %3200 = vmatpush.bf16.msrb.mxu1 %v6499_v24  ;;  %v5920_v24 = vld [vmem:[#allocation5 + $0x1cc] sm:$0xf0]  ;;  %v7199_v26 = vor.u32 %v8358_v20, %v7198_v17  ;;  %v5880_v52 = vld [vmem:[#allocation5 + $0x17c] sm:$0xf0]  ;;  %v7159_v57 = vor.u32 %v8348_v47, %v7158_v43  ;;  %v8343_v60 = vld [vmem:[#allocation5 + $0xb50] sm:$0xf0] }
  0x8b   : > { %3214 = vmatpush.bf16.msrb.mxu2 %v6659_v25  ;;  %v7039_v25 = vor.u32 %v8318_v16, %v7038_v15  ;;  %v5923_v31 = vor.u32 %v8036_v23, %v5920_v24  ;;  %v6978_v54 = vld [vmem:[#allocation5 + $0xa00] sm:$0xf]  ;;  %v7981_v61 = vld [vmem:[#allocation5 + $0x4] sm:$0xf]  ;;  %v5860_v1 = vld [vmem:[#allocation5 + $0x154] sm:$0xf0] }
  0x8c   : > { %3228 = vmatpush.bf16.msrb.mxu3 %v6819_v29  ;;  %3187 = vmatmul.bf16.vlgmr.msrb.gmra.mxu0 %v9259_v40  ;;  %v8313_v29 = vld [vmem:[#allocation5 + $0xa60] sm:$0xf0]  ;;  %v7138_v56 = vld [vmem:[#allocation5 + $0xb40] sm:$0xf]  ;;  %v8096_v3 = vld [vmem:[#allocation5 + $0x39c] sm:$0xf] }
  0x8d   : > { %3235 = vmatpush.bf16.msra.mxu0 %v7119_v30  ;;  %3201 = vmatmul.bf16.vlgmr.msrb.gmra.mxu1 %v9263_v45  ;;  %v7178_v30 = vld [vmem:[#allocation5 + $0xb90] sm:$0xf]  ;;  %v7019_v37 = vor.u32 %v8313_v29, %v7018_v28  ;;  %v8176_v8 = vld [vmem:[#allocation5 + $0x61c] sm:$0xf]  ;;  %v529_v15 = vld [vmem:[%s9209_s13 + $0x40] sm:$0xff] }
  0x8e   : > { %3249 = vmatpush.bf16.msra.mxu1 %v7279_v34  ;;  %3215 = vmatmul.bf16.vlgmr.msrb.gmra.mxu2 %v9261_v44  ;;  %v5740_v34 = vld [vmem:[#allocation5 + $0x64] sm:$0xf0]  ;;  %v7179_v38 = vor.u32 %v8353_v32, %v7178_v30  ;;  %v6160_v4 = vld [vmem:[#allocation5 + $0x3ac] sm:$0xf0]  ;;  %v8216_v10 = vld [vmem:[#allocation5 + $0x75c] sm:$0xf] }
  0x8f   : > { %3263 = vmatpush.bf16.msra.mxu2 %v5843_v35  ;;  %3229 = vmatmul.bf16.vlgmr.msrb.gmra.mxu3 %v9265_v48  ;;  %v8031_v35 = vld [vmem:[#allocation5 + $0x194] sm:$0xf]  ;;  %v6320_v6 = vld [vmem:[#allocation5 + $0x4ec] sm:$0xf0]  ;;  %v530_v20 = vld [vmem:[%s9209_s13 + $0x48] sm:$0xff] }
  0x90   : > { %3277 = vmatpush.bf16.msra.mxu3 %v6003_v39  ;;  %v5743_v39 = vor.u32 %v7991_v33, %v5740_v34  ;;  %v5903_v46 = vor.u32 %v8031_v35, %v5900_v36  ;;  %v6480_v9 = vld [vmem:[#allocation5 + $0x62c] sm:$0xf0]  ;;  %v540_v21 = vld [vmem:[%s9209_s13 + $0x98] sm:$0xff]  ;;  %v8091_v24 = vld [vmem:[#allocation5 + $0x374] sm:$0xf] }
  0x91   : > { %3236 = vmatpush.bf16.msra.mxu0 %v7099_v49  ;;  %v7986_v49 = vld [vmem:[#allocation5 + $0x2c] sm:$0xf]  ;;  %v539_v16 = vld [vmem:[%s9209_s13 + $0x90] sm:$0xff]  ;;  %v6483_v23 = vor.u32 %v8176_v8, %v6480_v9  ;;  %v6300_v29 = vld [vmem:[#allocation5 + $0x4c4] sm:$0xf0]  ;;  %v9277_v32 = vpack.c.bf16 %v540_v21, %v530_v20 }
  0x92   : > { %3250 = vmatpush.bf16.msra.mxu1 %v7259_v50  ;;  %v5720_v50 = vld [vmem:[#allocation5 + $0x3c] sm:$0xf0]  ;;  %v9275_v28 = vpack.c.bf16 %v539_v16, %v529_v15  ;;  %v8171_v30 = vld [vmem:[#allocation5 + $0x5f4] sm:$0xf]  ;;  %v6620_v34 = vld [vmem:[#allocation5 + $0x744] sm:$0xf0] }
  0x93   : > { %3264 = vmatpush.bf16.msra.mxu2 %v5823_v51  ;;  %v8026_v51 = vld [vmem:[#allocation5 + $0x16c] sm:$0xf]  ;;  %v5723_v58 = vor.u32 %v7986_v49, %v5720_v50  ;;  %v8211_v33 = vld [vmem:[#allocation5 + $0x734] sm:$0xf]  ;;  %v6280_v43 = vld [vmem:[#allocation5 + $0x49c] sm:$0xf0] }
  0x94   : > { %3278 = vmatpush.bf16.msra.mxu3 %v5983_v55  ;;  %v8303_v55 = vld [vmem:[#allocation5 + $0xa10] sm:$0xf0]  ;;  %v8126_v41 = vld [vmem:[#allocation5 + $0x48c] sm:$0xf]  ;;  %v6623_v42 = vor.u32 %v8211_v33, %v6620_v34  ;;  %v6440_v47 = vld [vmem:[#allocation5 + $0x5dc] sm:$0xf0] }
  0x95   : > { %3237 = vmatpush.bf16.msra.mxu0 %v7079_v62  ;;  %v5700_v62 = vld [vmem:[#allocation5 + $0x14] sm:$0xf0]  ;;  %v6979_v7 = vor.u32 %v8303_v55, %v6978_v54  ;;  %v8206_v49 = vld [vmem:[#allocation5 + $0x70c] sm:$0xf]  ;;  %v6600_v50 = vld [vmem:[#allocation5 + $0x71c] sm:$0xf0] }
  0x96   : > { %3251 = vmatpush.bf16.msra.mxu1 %v7239_v63  ;;  %v5883_v63 = vor.u32 %v8026_v51, %v5880_v52  ;;  %v8081_v52 = vld [vmem:[#allocation5 + $0x324] sm:$0xf]  ;;  %v6100_v55 = vld [vmem:[#allocation5 + $0x334] sm:$0xf0]  ;;  %v6240_v8 = vld [vmem:[#allocation5 + $0x44c] sm:$0xf0] }
  0x97   : > { %3265 = vmatpush.bf16.msra.mxu2 %v5803_v0  ;;  %v8021_v0 = vld [vmem:[#allocation5 + $0x144] sm:$0xf]  ;;  %v8156_v9 = vld [vmem:[#allocation5 + $0x57c] sm:$0xf]  ;;  %v8111_v20 = vld [vmem:[#allocation5 + $0x414] sm:$0xf] }
  0x98   : > { %3279 = vmatpush.bf16.msra.mxu3 %v5963_v5  ;;  %v8136_v5 = vld [vmem:[#allocation5 + $0x4dc] sm:$0xf]  ;;  %v5863_v17 = vor.u32 %v8021_v0, %v5860_v1  ;;  %v6103_v0 = vor.u32 %v8081_v52, %v6100_v55  ;;  %v6040_v33 = vld [vmem:[#allocation5 + $0x2bc] sm:$0xf0]  ;;  %v8106_v34 = vld [vmem:[#allocation5 + $0x3ec] sm:$0xf] }
  0x99   : > { %3238 = vmatpush.bf16.msra.mxu0 %v7059_v12  ;;  %v7139_v12 = vor.u32 %v8343_v60, %v7138_v56  ;;  %v6323_v22 = vor.u32 %v8136_v5, %v6320_v6  ;;  %v8121_v56 = vld [vmem:[#allocation5 + $0x464] sm:$0xf]  ;;  %v6080_v5 = vld [vmem:[#allocation5 + $0x30c] sm:$0xf0]  ;;  %v8116_v6 = vld [vmem:[#allocation5 + $0x43c] sm:$0xf] }
  0x9a   : > { %3252 = vmatpush.bf16.msra.mxu1 %v7219_v13  ;;  %v5703_v13 = vor.u32 %v7981_v61, %v5700_v62  ;;  %v8161_v60 = vld [vmem:[#allocation5 + $0x5a4] sm:$0xf]  ;;  %v6420_v61 = vld [vmem:[#allocation5 + $0x5b4] sm:$0xf0]  ;;  %v6243_v15 = vor.u32 %v8116_v6, %v6240_v8 }
  0x9b   : > { %3266 = vmatpush.bf16.msra.mxu2 %v5783_v14  ;;  %v6640_v14 = vld [vmem:[#allocation5 + $0x76c] sm:$0xf0]  ;;  %v8201_v62 = vld [vmem:[#allocation5 + $0x6e4] sm:$0xf] }
  0x9c   : > { %3280 = vmatpush.bf16.msra.mxu3 %v5943_v19  ;;  %v6163_v19 = vor.u32 %v8096_v3, %v6160_v4  ;;  %v6423_v3 = vor.u32 %v8161_v60, %v6420_v61  ;;  %v8076_v4 = vld [vmem:[#allocation5 + $0x2fc] sm:$0xf]  ;;  %v8141_v52 = vld [vmem:[#allocation5 + $0x504] sm:$0xf] }
  0x9d   : > { %3239 = vmatpush.bf16.msra.mxu0 %v7039_v25  ;;  %v6140_v25 = vld [vmem:[#allocation5 + $0x384] sm:$0xf0]  ;;  %v8181_v55 = vld [vmem:[#allocation5 + $0x644] sm:$0xf]  ;;  %v8296_v60 = vld [vmem:[#allocation5 + $0x9dc] sm:$0xf] }
  0x9e   : > { %3253 = vmatpush.bf16.msra.mxu1 %v7199_v26  ;;  %v8131_v26 = vld [vmem:[#allocation5 + $0x4b4] sm:$0xf]  ;;  %v6143_v35 = vor.u32 %v8091_v24, %v6140_v25  ;;  %v6380_v24 = vld [vmem:[#allocation5 + $0x564] sm:$0xf0] }
  0x9f   : > { %3267 = vmatpush.bf16.msra.mxu2 %v5763_v27  ;;  %v6643_v27 = vor.u32 %v8216_v10, %v6640_v14  ;;  %v6303_v36 = vor.u32 %v8131_v26, %v6300_v29  ;;  %v6400_v10 = vld [vmem:[#allocation5 + $0x58c] sm:$0xf0]  ;;  %v6083_v14 = vor.u32 %v8076_v4, %v6080_v5  ;;  %v8191_v25 = vld [vmem:[#allocation5 + $0x694] sm:$0xf]  ;;  %v6540_v26 = vld [vmem:[#allocation5 + $0x6a4] sm:$0xf0] }
  0xa0   : > { %3281 = vmatpush.bf16.msra.mxu3 %v5923_v31  ;;  %v6460_v31 = vld [vmem:[#allocation5 + $0x604] sm:$0xf0]  ;;  %v6403_v16 = vor.u32 %v8156_v9, %v6400_v10  ;;  %v8376_v4 = vld [vmem:[#allocation5 + $0xc5c] sm:$0xf]  ;;  %v7280_v5 = vld [vmem:[#allocation5 + $0xc6c] sm:$0xf0] }
  0xa1   : > { %3240 = vmatpush.bf16.msra.mxu0 %v7019_v37  ;;  %v6463_v37 = vor.u32 %v8171_v30, %v6460_v31  ;;  %v8066_v31 = vld [vmem:[#allocation5 + $0x2ac] sm:$0xf]  ;;  %v8251_v10 = vld [vmem:[#allocation5 + $0x874] sm:$0xf] }
  0xa2   : > { %3254 = vmatpush.bf16.msra.mxu1 %v7179_v38  ;;  %v8086_v38 = vld [vmem:[#allocation5 + $0x34c] sm:$0xf] }
  0xa3   : > { %3268 = vmatpush.bf16.msra.mxu2 %v5743_v39  ;;  %v6120_v39 = vld [vmem:[#allocation5 + $0x35c] sm:$0xf0] }
  0xa4   : > { %3282 = vmatpush.bf16.msra.mxu3 %v5903_v46  ;;  %v8166_v46 = vld [vmem:[#allocation5 + $0x5cc] sm:$0xf]  ;;  %v6123_v51 = vor.u32 %v8086_v38, %v6120_v39  ;;  %v6360_v38 = vld [vmem:[#allocation5 + $0x53c] sm:$0xf0] }
  0xa5   : > { %3241 = vmatpush.bf16.msra.mxu0 %v6999_v53  ;;  %v6283_v53 = vor.u32 %v8126_v41, %v6280_v43  ;;  %v6443_v54 = vor.u32 %v8166_v46, %v6440_v47  ;;  %v8186_v39 = vld [vmem:[#allocation5 + $0x66c] sm:$0xf]  ;;  %v6520_v41 = vld [vmem:[#allocation5 + $0x67c] sm:$0xf0]  ;;  %v8061_v43 = vld [vmem:[#allocation5 + $0x284] sm:$0xf] }
  0xa6   : > { %3255 = vmatpush.bf16.msra.mxu1 %v7159_v57  ;;  %v6260_v57 = vld [vmem:[#allocation5 + $0x474] sm:$0xf0] }
  0xa7   : > { %3269 = vmatpush.bf16.msra.mxu2 %v5723_v58  ;;  %v6603_v58 = vor.u32 %v8206_v49, %v6600_v50  ;;  %v6263_v1 = vor.u32 %v8121_v56, %v6260_v57  ;;  %v6020_v46 = vld [vmem:[#allocation5 + $0x294] sm:$0xf0]  ;;  %v8101_v50 = vld [vmem:[#allocation5 + $0x3c4] sm:$0xf]  ;;  %v8256_v57 = vld [vmem:[#allocation5 + $0x89c] sm:$0xf] }
  0xa8   : > { %3283 = vmatpush.bf16.msra.mxu3 %v5883_v63  ;;  %v6580_v63 = vld [vmem:[#allocation5 + $0x6f4] sm:$0xf0]  ;;  %v6023_v61 = vor.u32 %v8061_v43, %v6020_v46  ;;  %v8321_v46 = vld [vmem:[#allocation5 + $0xaa4] sm:$0xf] }
  0xa9   : > { %3242 = vmatpush.bf16.msra.mxu0 %v6979_v7  ;;  %v6583_v7 = vor.u32 %v8201_v62, %v6580_v63  ;;  %v6500_v56 = vld [vmem:[#allocation5 + $0x654] sm:$0xf0]  ;;  %v6960_v62 = vld [vmem:[#allocation5 + $0x9ec] sm:$0xf0]  ;;  %v8336_v63 = vld [vmem:[#allocation5 + $0xb1c] sm:$0xf] }
  0xaa   : > { %3256 = vmatpush.bf16.msra.mxu1 %v7139_v12  ;;  %v8196_v12 = vld [vmem:[#allocation5 + $0x6bc] sm:$0xf]  ;;  %v6503_v6 = vor.u32 %v8181_v55, %v6500_v56  ;;  %v6963_v8 = vor.u32 %v8296_v60, %v6960_v62  ;;  %v6900_v43 = vld [vmem:[#allocation5 + $0x974] sm:$0xf0]  ;;  %v6720_v55 = vld [vmem:[#allocation5 + $0x80c] sm:$0xf0] }
  0xab   : > { %3270 = vmatpush.bf16.msra.mxu2 %v5703_v13  ;;  %v6560_v13 = vld [vmem:[#allocation5 + $0x6cc] sm:$0xf0]  ;;  %v8276_v56 = vld [vmem:[#allocation5 + $0x93c] sm:$0xf] }
  0xac   : > { %3284 = vmatpush.bf16.msra.mxu3 %v5863_v17  ;;  %3243 = vmatmul.bf16.vlgmr.msra.gmra.mxu0 %v9275_v28  ;;  %v8071_v17 = vld [vmem:[#allocation5 + $0x2d4] sm:$0xf]  ;;  %v6563_v21 = vor.u32 %v8196_v12, %v6560_v13  ;;  %v6780_v12 = vld [vmem:[#allocation5 + $0x884] sm:$0xf0]  ;;  %v8316_v60 = vld [vmem:[#allocation5 + $0xa7c] sm:$0xf] }
  0xad   : > { %3291 = vmatpush.bf16.msrb.mxu0 %v6163_v19  ;;  %3257 = vmatmul.bf16.vlgmr.msra.gmra.mxu1 %v9277_v32  ;;  %v6060_v19 = vld [vmem:[#allocation5 + $0x2e4] sm:$0xf0]  ;;  %v8291_v13 = vld [vmem:[#allocation5 + $0x9b4] sm:$0xf]  ;;  %v8356_v62 = vld [vmem:[#allocation5 + $0xbbc] sm:$0xf] }
  0xae   : > { %3305 = vmatpush.bf16.msrb.mxu1 %v6323_v22  ;;  %3271 = vmatmul.bf16.vlgmr.msra.gmra.mxu2 %v9234_v59  ;;  %v6220_v22 = vld [vmem:[#allocation5 + $0x424] sm:$0xf0] }
  0xaf   : > { %3319 = vmatpush.bf16.msrb.mxu2 %v6483_v23  ;;  %3285 = vmatmul.bf16.vlgmr.msra.gmra.mxu3 %v9244_v11  ;;  %v8151_v23 = vld [vmem:[#allocation5 + $0x554] sm:$0xf]  ;;  %v6223_v29 = vor.u32 %v8111_v20, %v6220_v22  ;;  %v7260_v20 = vld [vmem:[#allocation5 + $0xc44] sm:$0xf0] }
  0xb0   : > { %3333 = vmatpush.bf16.msrb.mxu3 %v6643_v27  ;;  %v6063_v27 = vor.u32 %v8071_v17, %v6060_v19  ;;  %v6383_v30 = vor.u32 %v8151_v23, %v6380_v24  ;;  %v7100_v17 = vld [vmem:[#allocation5 + $0xb04] sm:$0xf0]  ;;  %v8371_v19 = vld [vmem:[#allocation5 + $0xc34] sm:$0xf]  ;;  %v8246_v24 = vld [vmem:[#allocation5 + $0x84c] sm:$0xf] }
  0xb1   : > { %3292 = vmatpush.bf16.msrb.mxu0 %v6143_v35  ;;  %v6543_v35 = vor.u32 %v8191_v25, %v6540_v26  ;;  %v6760_v25 = vld [vmem:[#allocation5 + $0x85c] sm:$0xf0]  ;;  %v8286_v26 = vld [vmem:[#allocation5 + $0x98c] sm:$0xf] }
  0xb2   : > { %3306 = vmatpush.bf16.msrb.mxu1 %v6303_v36  ;;  %v6200_v36 = vld [vmem:[#allocation5 + $0x3fc] sm:$0xf0] }
  0xb3   : > { %3320 = vmatpush.bf16.msrb.mxu2 %v6463_v37  ;;  %v8146_v37 = vld [vmem:[#allocation5 + $0x52c] sm:$0xf]  ;;  %v6203_v47 = vor.u32 %v8106_v34, %v6200_v36  ;;  %v7240_v34 = vld [vmem:[#allocation5 + $0xc1c] sm:$0xf0] }
  0xb4   : > { %3334 = vmatpush.bf16.msrb.mxu3 %v6623_v42  ;;  %v6043_v42 = vor.u32 %v8066_v31, %v6040_v33  ;;  %v6363_v49 = vor.u32 %v8146_v37, %v6360_v38  ;;  %v7080_v31 = vld [vmem:[#allocation5 + $0xadc] sm:$0xf0]  ;;  %v8366_v33 = vld [vmem:[#allocation5 + $0xc0c] sm:$0xf]  ;;  %v8241_v38 = vld [vmem:[#allocation5 + $0x824] sm:$0xf] }
  0xb5   : > { %3293 = vmatpush.bf16.msrb.mxu0 %v6123_v51  ;;  %v6180_v51 = vld [vmem:[#allocation5 + $0x3d4] sm:$0xf0] }
  0xb6   : > { %3307 = vmatpush.bf16.msrb.mxu1 %v6283_v53  ;;  %v6523_v53 = vor.u32 %v8186_v39, %v6520_v41  ;;  %v6740_v39 = vld [vmem:[#allocation5 + $0x834] sm:$0xf0]  ;;  %v8281_v41 = vld [vmem:[#allocation5 + $0x964] sm:$0xf] }
  0xb7   : > { %3321 = vmatpush.bf16.msrb.mxu2 %v6443_v54  ;;  %v6340_v54 = vld [vmem:[#allocation5 + $0x514] sm:$0xf0] }
  0xb8   : > { %3335 = vmatpush.bf16.msrb.mxu3 %v6603_v58  ;;  %v6800_v58 = vld [vmem:[#allocation5 + $0x8ac] sm:$0xf0] }
  0xb9   : > { %3294 = vmatpush.bf16.msrb.mxu0 %v6103_v0  ;;  %v7120_v0 = vld [vmem:[#allocation5 + $0xb2c] sm:$0xf0] }
  0xba   : > { %3308 = vmatpush.bf16.msrb.mxu1 %v6263_v1  ;;  %v6183_v1 = vor.u32 %v8101_v50, %v6180_v51  ;;  %v7123_v9 = vor.u32 %v8336_v63, %v7120_v0  ;;  %v7220_v50 = vld [vmem:[#allocation5 + $0xbf4] sm:$0xf0]  ;;  %v6743_v51 = vor.u32 %v8241_v38, %v6740_v39  ;;  %v7200_v63 = vld [vmem:[#allocation5 + $0xbcc] sm:$0xf0]  ;;  %v8341_v39 = vld [vmem:[#allocation5 + $0xb44] sm:$0xf] }
  0xbb   : > { %3322 = vmatpush.bf16.msrb.mxu2 %v6423_v3  ;;  %v6343_v3 = vor.u32 %v8141_v52, %v6340_v54  ;;  %v6903_v52 = vor.u32 %v8281_v41, %v6900_v43  ;;  %v8236_v54 = vld [vmem:[#allocation5 + $0x7fc] sm:$0xf]  ;;  %v6980_v38 = vld [vmem:[#allocation5 + $0xa14] sm:$0xf0]  ;;  %v8019_v43 = vld [vmem:[#allocation5 + $0x130] sm:$0xf0] }
  0xbc   : > { %3336 = vmatpush.bf16.msrb.mxu3 %v6583_v7  ;;  %v6803_v7 = vor.u32 %v8256_v57, %v6800_v58  ;;  %v6880_v58 = vld [vmem:[#allocation5 + $0x94c] sm:$0xf0]  ;;  %v6723_v0 = vor.u32 %v8236_v54, %v6720_v55  ;;  %v7140_v41 = vld [vmem:[#allocation5 + $0xb54] sm:$0xf0]  ;;  %v6326_v54 = vld [vmem:[#allocation5 + $0x4e0] sm:$0xf] }
  0xbd   : > { %3295 = vmatpush.bf16.msrb.mxu0 %v6083_v14  ;;  %v7283_v14 = vor.u32 %v8376_v4, %v7280_v5  ;;  %v8231_v4 = vld [vmem:[#allocation5 + $0x7d4] sm:$0xf]  ;;  %v6700_v5 = vld [vmem:[#allocation5 + $0x7e4] sm:$0xf0] }
  0xbe   : > { %3309 = vmatpush.bf16.msrb.mxu1 %v6243_v15  ;;  %v6940_v15 = vld [vmem:[#allocation5 + $0x9c4] sm:$0xf0]  ;;  %v8139_v55 = vld [vmem:[#allocation5 + $0x4f0] sm:$0xf0] }
  0xbf   : > { %3323 = vmatpush.bf16.msrb.mxu2 %v6403_v16  ;;  %v8331_v16 = vld [vmem:[#allocation5 + $0xaf4] sm:$0xf]  ;;  %v6943_v22 = vor.u32 %v8291_v13, %v6940_v15  ;;  %v7180_v13 = vld [vmem:[#allocation5 + $0xba4] sm:$0xf0] }
  0xc0   : > { %3337 = vmatpush.bf16.msrb.mxu3 %v6563_v21  ;;  %v6783_v21 = vor.u32 %v8251_v10, %v6780_v12  ;;  %v7103_v23 = vor.u32 %v8331_v16, %v7100_v17  ;;  %v7020_v10 = vld [vmem:[#allocation5 + $0xa64] sm:$0xf0]  ;;  %v8351_v12 = vld [vmem:[#allocation5 + $0xb94] sm:$0xf]  ;;  %v8226_v17 = vld [vmem:[#allocation5 + $0x7ac] sm:$0xf] }
  0xc1   : > { %3296 = vmatpush.bf16.msrb.mxu0 %v6063_v27  ;;  %v7263_v27 = vor.u32 %v8371_v19, %v7260_v20  ;;  %v6680_v19 = vld [vmem:[#allocation5 + $0x7bc] sm:$0xf0]  ;;  %v8266_v20 = vld [vmem:[#allocation5 + $0x8ec] sm:$0xf] }
  0xc2   : > { %3310 = vmatpush.bf16.msrb.mxu1 %v6223_v29  ;;  %v6920_v29 = vld [vmem:[#allocation5 + $0x99c] sm:$0xf0] }
  0xc3   : > { %3324 = vmatpush.bf16.msrb.mxu2 %v6383_v30  ;;  %v8326_v30 = vld [vmem:[#allocation5 + $0xacc] sm:$0xf]  ;;  %v6923_v36 = vor.u32 %v8286_v26, %v6920_v29  ;;  %v7160_v26 = vld [vmem:[#allocation5 + $0xb7c] sm:$0xf0]  ;;  %v8221_v29 = vld [vmem:[#allocation5 + $0x784] sm:$0xf] }
  0xc4   : > { %3338 = vmatpush.bf16.msrb.mxu3 %v6543_v35  ;;  %v6763_v35 = vor.u32 %v8246_v24, %v6760_v25  ;;  %v7083_v37 = vor.u32 %v8326_v30, %v7080_v31  ;;  %v7000_v24 = vld [vmem:[#allocation5 + $0xa3c] sm:$0xf0]  ;;  %v8346_v25 = vld [vmem:[#allocation5 + $0xb6c] sm:$0xf]  ;;  %v6660_v30 = vld [vmem:[#allocation5 + $0x794] sm:$0xf0] }
  0xc5   : > { %3297 = vmatpush.bf16.msrb.mxu0 %v6043_v42  ;;  %v7243_v42 = vor.u32 %v8366_v33, %v7240_v34  ;;  %v8261_v34 = vld [vmem:[#allocation5 + $0x8c4] sm:$0xf] }
  0xc6   : > { %3311 = vmatpush.bf16.msrb.mxu1 %v6203_v47  ;;  %v7060_v47 = vld [vmem:[#allocation5 + $0xab4] sm:$0xf0] }
  0xc7   : > { %3325 = vmatpush.bf16.msrb.mxu2 %v6363_v49  ;;  %v8361_v49 = vld [vmem:[#allocation5 + $0xbe4] sm:$0xf] }
  0xc8   : > { %3339 = vmatpush.bf16.msrb.mxu3 %v6523_v53  ;;  %v7063_v53 = vor.u32 %v8321_v46, %v7060_v47  ;;  %v7223_v57 = vor.u32 %v8361_v49, %v7220_v50  ;;  %v6006_v46 = vld [vmem:[#allocation5 + $0x260] sm:$0xf]  ;;  %v6663_v47 = vor.u32 %v8221_v29, %v6660_v30  ;;  %v8059_v49 = vld [vmem:[#allocation5 + $0x270] sm:$0xf0]  ;;  %v5946_v29 = vld [vmem:[#allocation5 + $0x1e8] sm:$0xf] }
  0xc9   : > { %3298 = vmatpush.bf16.msrb.mxu0 %v6023_v61  ;;  %v7040_v61 = vld [vmem:[#allocation5 + $0xa8c] sm:$0xf0]  ;;  %v6166_v50 = vld [vmem:[#allocation5 + $0x3a0] sm:$0xf] }
  0xca   : > { %3312 = vmatpush.bf16.msrb.mxu1 %v6183_v1  ;;  %v6883_v1 = vor.u32 %v8276_v56, %v6880_v58  ;;  %v7143_v56 = vor.u32 %v8341_v39, %v7140_v41  ;;  %v6007_v58 = vor.u32 %v8059_v49, %v6006_v46  ;;  %v7999_v46 = vld [vmem:[#allocation5 + $0x90] sm:$0xf0] }
  0xcb   : > { %3326 = vmatpush.bf16.msrb.mxu2 %v6343_v3  ;;  %v7043_v3 = vor.u32 %v8316_v60, %v7040_v61  ;;  %v5826_v61 = vld [vmem:[#allocation5 + $0xf8] sm:$0xf] }
  0xcc   : > { %3340 = vmatpush.bf16.msrb.mxu3 %v6503_v6  ;;  %3299 = vmatmul.bf16.vlgmr.msrb.gmra.mxu0 %v9237_v2  ;;  %v8271_v6 = vld [vmem:[#allocation5 + $0x914] sm:$0xf] }
  0xcd   : > { %3347 = vmatpush.bf16.msra.mxu0 %v6803_v7  ;;  %3313 = vmatmul.bf16.vlgmr.msrb.gmra.mxu1 %v9247_v18  ;;  %v7203_v7 = vor.u32 %v8356_v62, %v7200_v63  ;;  %v8014_v62 = vld [vmem:[#allocation5 + $0x108] sm:$0xf0]  ;;  %v5986_v63 = vld [vmem:[#allocation5 + $0x238] sm:$0xf] }
  0xce   : > { %3361 = vmatpush.bf16.msra.mxu1 %v6963_v8  ;;  %3327 = vmatmul.bf16.vlgmr.msrb.gmra.mxu2 %v9259_v40  ;;  %v6860_v8 = vld [vmem:[#allocation5 + $0x924] sm:$0xf0] }
  0xcf   : > { %3375 = vmatpush.bf16.msra.mxu2 %v7123_v9  ;;  %3341 = vmatmul.bf16.vlgmr.msrb.gmra.mxu3 %v9263_v45  ;;  %v8311_v9 = vld [vmem:[#allocation5 + $0xa54] sm:$0xf]  ;;  %v6863_v15 = vor.u32 %v8271_v6, %v6860_v8  ;;  %v8134_v6 = vld [vmem:[#allocation5 + $0x4c8] sm:$0xf0]  ;;  %v5806_v8 = vld [vmem:[#allocation5 + $0xd0] sm:$0xf] }
  0xd0   : > { %3389 = vmatpush.bf16.msra.mxu3 %v7283_v14  ;;  %v6703_v14 = vor.u32 %v8231_v4, %v6700_v5  ;;  %v7023_v16 = vor.u32 %v8311_v9, %v7020_v10  ;;  %v8094_v4 = vld [vmem:[#allocation5 + $0x388] sm:$0xf0]  ;;  %v6306_v5 = vld [vmem:[#allocation5 + $0x4b8] sm:$0xf] }
  0xd1   : > { %3348 = vmatpush.bf16.msra.mxu0 %v6783_v21  ;;  %v7183_v21 = vor.u32 %v8351_v12, %v7180_v13  ;;  %v8009_v12 = vld [vmem:[#allocation5 + $0xe0] sm:$0xf0]  ;;  %v5966_v13 = vld [vmem:[#allocation5 + $0x210] sm:$0xf] }
  0xd2   : > { %3362 = vmatpush.bf16.msra.mxu1 %v6943_v22  ;;  %v6840_v22 = vld [vmem:[#allocation5 + $0x8fc] sm:$0xf0] }
  0xd3   : > { %3376 = vmatpush.bf16.msra.mxu2 %v7103_v23  ;;  %v8306_v23 = vld [vmem:[#allocation5 + $0xa2c] sm:$0xf]  ;;  %v6843_v31 = vor.u32 %v8266_v20, %v6840_v22  ;;  %v6286_v20 = vld [vmem:[#allocation5 + $0x490] sm:$0xf]  ;;  %v5807_v22 = vor.u32 %v8009_v12, %v5806_v8 }
  0xd4   : > { %3390 = vmatpush.bf16.msra.mxu3 %v7263_v27  ;;  %v6683_v27 = vor.u32 %v8226_v17, %v6680_v19  ;;  %v7003_v33 = vor.u32 %v8306_v23, %v7000_v24  ;;  %v6126_v17 = vld [vmem:[#allocation5 + $0x350] sm:$0xf]  ;;  %v8089_v19 = vld [vmem:[#allocation5 + $0x360] sm:$0xf0] }
  0xd5   : > { %3349 = vmatpush.bf16.msra.mxu0 %v6763_v35  ;;  %v6820_v35 = vld [vmem:[#allocation5 + $0x8d4] sm:$0xf0] }
  0xd6   : > { %3363 = vmatpush.bf16.msra.mxu1 %v6923_v36  ;;  %v8301_v36 = vld [vmem:[#allocation5 + $0xa04] sm:$0xf] }
  0xd7   : > { %3377 = vmatpush.bf16.msra.mxu2 %v7083_v37  ;;  %v7163_v37 = vor.u32 %v8346_v25, %v7160_v26  ;;  %v6127_v25 = vor.u32 %v8089_v19, %v6126_v17  ;;  %v5786_v26 = vld [vmem:[#allocation5 + $0xa8] sm:$0xf]  ;;  %v8029_v19 = vld [vmem:[#allocation5 + $0x180] sm:$0xf0] }
  0xd8   : > { %3391 = vmatpush.bf16.msra.mxu3 %v7243_v42  ;;  %v5846_v42 = vld [vmem:[#allocation5 + $0x120] sm:$0xf] }
  0xd9   : > { %3350 = vmatpush.bf16.msra.mxu0 %v6743_v51  ;;  %v8099_v51 = vld [vmem:[#allocation5 + $0x3b0] sm:$0xf0] }
  0xda   : > { %3364 = vmatpush.bf16.msra.mxu1 %v6903_v52  ;;  %v6823_v52 = vor.u32 %v8261_v34, %v6820_v35  ;;  %v6167_v60 = vor.u32 %v8099_v51, %v6166_v50  ;;  %v8084_v34 = vld [vmem:[#allocation5 + $0x338] sm:$0xf0]  ;;  %v6266_v35 = vld [vmem:[#allocation5 + $0x468] sm:$0xf]  ;;  %v8039_v50 = vld [vmem:[#allocation5 + $0x1d0] sm:$0xf0] }
  0xdb   : > { %3378 = vmatpush.bf16.msra.mxu2 %v7063_v53  ;;  %v6983_v53 = vor.u32 %v8301_v36, %v6980_v38  ;;  %v8124_v36 = vld [vmem:[#allocation5 + $0x478] sm:$0xf0]  ;;  %v6086_v51 = vld [vmem:[#allocation5 + $0x300] sm:$0xf] }
  0xdc   : > { %3392 = vmatpush.bf16.msra.mxu3 %v7223_v57  ;;  %v5847_v57 = vor.u32 %v8019_v43, %v5846_v42  ;;  %v5766_v43 = vld [vmem:[#allocation5 + $0x80] sm:$0xf]  ;;  %v6267_v49 = vor.u32 %v8124_v36, %v6266_v35  ;;  %v8024_v35 = vld [vmem:[#allocation5 + $0x158] sm:$0xf0]  ;;  %v6026_v36 = vld [vmem:[#allocation5 + $0x288] sm:$0xf] }
  0xdd   : > { %3351 = vmatpush.bf16.msra.mxu0 %v6723_v0  ;;  %v6327_v0 = vor.u32 %v8139_v55, %v6326_v54  ;;  %v8119_v54 = vld [vmem:[#allocation5 + $0x450] sm:$0xf0] }
  0xde   : > { %3365 = vmatpush.bf16.msra.mxu1 %v6883_v1  ;;  %v8054_v1 = vld [vmem:[#allocation5 + $0x248] sm:$0xf0] }
  0xdf   : > { %3379 = vmatpush.bf16.msra.mxu2 %v7043_v3  ;;  %v6146_v3 = vld [vmem:[#allocation5 + $0x378] sm:$0xf]  ;;  %v5987_v9 = vor.u32 %v8054_v1, %v5986_v63  ;;  %v8034_v1 = vld [vmem:[#allocation5 + $0x1a8] sm:$0xf0] }
  0xe0   : > { %3393 = vmatpush.bf16.msra.mxu3 %v7203_v7  ;;  %v5827_v7 = vor.u32 %v8014_v62, %v5826_v61  ;;  %v6147_v10 = vor.u32 %v8094_v4, %v6146_v3  ;;  %v5746_v61 = vld [vmem:[#allocation5 + $0x58] sm:$0xf]  ;;  %v7994_v62 = vld [vmem:[#allocation5 + $0x68] sm:$0xf0] }
  0xe1   : > { %3352 = vmatpush.bf16.msra.mxu0 %v6703_v14  ;;  %v9287_v14 = vld [vmem:[#allocation7] sm:$0x1f]  ;;  %v5906_v63 = vld [vmem:[#allocation5 + $0x198] sm:$0xf]  ;;  %v8074_v4 = vld [vmem:[#allocation5 + $0x2e8] sm:$0xf0] }
  0xe2   : > { %3366 = vmatpush.bf16.msra.mxu1 %v6863_v15  ;;  %v6307_v15 = vor.u32 %v8134_v6, %v6306_v5  ;;  %v10579_v23 = vperm.slane %v9287_v14, 0  ;;  %v6066_v3 = vld [vmem:[#allocation5 + $0x2d8] sm:$0xf] }
  0xe3   : > { %3380 = vmatpush.bf16.msra.mxu2 %v7023_v16  ;;  %v8049_v16 = vld [vmem:[#allocation5 + $0x220] sm:$0xf0]  ;;  %v6226_v6 = vld [vmem:[#allocation5 + $0x418] sm:$0xf]  ;;  %v6067_v12 = vor.u32 %v8074_v4, %v6066_v3  ;;  %v8214_v3 = vld [vmem:[#allocation5 + $0x748] sm:$0xf0] }
  0xe4   : > { %3394 = vmatpush.bf16.msra.mxu3 %v7183_v21  ;;  %v8129_v21 = vld [vmem:[#allocation5 + $0x4a0] sm:$0xf0]  ;;  %v5967_v24 = vor.u32 %v8049_v16, %v5966_v13  ;;  %v5726_v13 = vld [vmem:[#allocation5 + $0x30] sm:$0xf]  ;;  %v6786_v4 = vld [vmem:[#allocation5 + $0x878] sm:$0xf] }
  0xe5   : > { %3353 = vmatpush.bf16.msra.mxu0 %v6683_v27  ;;  %v8004_v27 = vld [vmem:[#allocation5 + $0xb8] sm:$0xf0]  ;;  %v6287_v30 = vor.u32 %v8129_v21, %v6286_v20  ;;  %v5886_v16 = vld [vmem:[#allocation5 + $0x170] sm:$0xf]  ;;  %v8069_v21 = vld [vmem:[#allocation5 + $0x2c0] sm:$0xf0] }
  0xe6   : > { %3367 = vmatpush.bf16.msra.mxu1 %v6843_v31  ;;  %v8044_v31 = vld [vmem:[#allocation5 + $0x1f8] sm:$0xf0]  ;;  %v5787_v38 = vor.u32 %v8004_v27, %v5786_v26  ;;  %v6046_v20 = vld [vmem:[#allocation5 + $0x2b0] sm:$0xf] }
  0xe7   : > { %3381 = vmatpush.bf16.msra.mxu2 %v7003_v33  ;;  %v6106_v33 = vld [vmem:[#allocation5 + $0x328] sm:$0xf]  ;;  %v5947_v41 = vor.u32 %v8044_v31, %v5946_v29  ;;  %v5887_v31 = vor.u32 %v8029_v19, %v5886_v16  ;;  %v6606_v16 = vld [vmem:[#allocation5 + $0x710] sm:$0xf]  ;;  %v8209_v19 = vld [vmem:[#allocation5 + $0x720] sm:$0xf0] }
  0xe8   : > { %3395 = vmatpush.bf16.msra.mxu3 %v7163_v37  ;;  %v6107_v42 = vor.u32 %v8084_v34, %v6106_v33  ;;  %v5706_v29 = vld [vmem:[#allocation5 + $0x8] sm:$0xf]  ;;  %v6047_v33 = vor.u32 %v8069_v21, %v6046_v20  ;;  %v6766_v20 = vld [vmem:[#allocation5 + $0x850] sm:$0xf]  ;;  %v8249_v21 = vld [vmem:[#allocation5 + $0x860] sm:$0xf0] }
  0xe9   : > { %3354 = vmatpush.bf16.msra.mxu0 %v6663_v47  ;;  %v3132_v37 = vpop.f32.mrf.mxu0  ;;  %v5926_v47 = vld [vmem:[#allocation5 + $0x1c0] sm:$0xf]  ;;  %v5866_v34 = vld [vmem:[#allocation5 + $0x148] sm:$0xf] }
  0xea   : > { %3368 = vmatpush.bf16.msra.mxu1 %v6823_v52  ;;  %v3133_v39 = vadd.f32 %v3132_v37, %v10579_v23  ;;  %v8079_v52 = vld [vmem:[#allocation5 + $0x310] sm:$0xf0]  ;;  %v3146_v55 = vpop.f32.mrf.mxu1 }
  0xeb   : > { %3382 = vmatpush.bf16.msra.mxu2 %v6983_v53  ;;  %v6246_v53 = vld [vmem:[#allocation5 + $0x440] sm:$0xf] }
  0xec   : > { %3396 = vmatpush.bf16.msra.mxu3 %v7143_v56  ;;  %3355 = vmatmul.bf16.vlgmr.msra.gmra.mxu0 %v9261_v44  ;;  %v5767_v56 = vor.u32 %v7999_v46, %v5766_v43  ;;  %v8179_v43 = vld [vmem:[#allocation5 + $0x630] sm:$0xf0]  ;;  %v6646_v46 = vld [vmem:[#allocation5 + $0x760] sm:$0xf] }
  0xed   : > { %3403 = vmatpush.bf16.msrb.mxu0 %v5847_v57  ;;  %3369 = vmatmul.bf16.vlgmr.msra.gmra.mxu1 %v9265_v48  ;;  %v3147_v57 = vadd.f32 %v3146_v55, %v3133_v39  ;;  %v6186_v39 = vld [vmem:[#allocation5 + $0x3c8] sm:$0xf]  ;;  %v8299_v55 = vld [vmem:[#allocation5 + $0x9f0] sm:$0xf0] }
  0xee   : > { %3417 = vmatpush.bf16.msrb.mxu1 %v6007_v58  ;;  %3383 = vmatmul.bf16.vlgmr.msra.gmra.mxu2 %v9275_v28  ;;  %v5927_v58 = vor.u32 %v8039_v50, %v5926_v47  ;;  %v6806_v50 = vld [vmem:[#allocation5 + $0x8a0] sm:$0xf] }
  0xef   : > { %3431 = vmatpush.bf16.msrb.mxu2 %v6167_v60  ;;  %3397 = vmatmul.bf16.vlgmr.msra.gmra.mxu3 %v9277_v32  ;;  %v6087_v60 = vor.u32 %v8079_v52, %v6086_v51  ;;  %v8259_v51 = vld [vmem:[#allocation5 + $0x8b0] sm:$0xf0]  ;;  %v5867_v52 = vor.u32 %v8024_v35, %v5866_v34  ;;  %v8204_v35 = vld [vmem:[#allocation5 + $0x6f8] sm:$0xf0] }
  0xf0   : > { %3445 = vmatpush.bf16.msrb.mxu3 %v6327_v0  ;;  %v6247_v0 = vor.u32 %v8119_v54, %v6246_v53  ;;  %v6966_v54 = vld [vmem:[#allocation5 + $0x9e0] sm:$0xf] }
  0xf1   : > { %3404 = vmatpush.bf16.msrb.mxu0 %v5827_v7  ;;  %v3160_v5 = vpop.f32.mrf.mxu2  ;;  %v8114_v7 = vld [vmem:[#allocation5 + $0x428] sm:$0xf0] }
  0xf2   : > { %3418 = vmatpush.bf16.msrb.mxu1 %v5987_v9  ;;  %v3161_v8 = vadd.f32 %v3160_v5, %v3147_v57  ;;  %v5747_v9 = vor.u32 %v7994_v62, %v5746_v61  ;;  %v6227_v17 = vor.u32 %v8114_v7, %v6226_v6  ;;  %v9298_v61 = vpop.f32.mrf.mxu0  ;;  %v6466_v62 = vld [vmem:[#allocation5 + $0x5f8] sm:$0xf]  ;;  %v8254_v5 = vld [vmem:[#allocation5 + $0x888] sm:$0xf0] }
  0xf3   : > { %3432 = vmatpush.bf16.msrb.mxu2 %v6147_v10  ;;  %v5907_v10 = vor.u32 %v8034_v1, %v5906_v63  ;;  %v8174_v63 = vld [vmem:[#allocation5 + $0x608] sm:$0xf0]  ;;  %v6967_v1 = vor.u32 %v8299_v55, %v6966_v54  ;;  %v6946_v6 = vld [vmem:[#allocation5 + $0x9b8] sm:$0xf]  ;;  %v8199_v55 = vld [vmem:[#allocation5 + $0x6d0] sm:$0xf0] }
  0xf4   : > { %3446 = vmatpush.bf16.msrb.mxu3 %v6307_v15  ;;  %v7989_v15 = vld [vmem:[#allocation5 + $0x40] sm:$0xf0]  ;;  %v8294_v7 = vld [vmem:[#allocation5 + $0x9c8] sm:$0xf0] }
  0xf5   : > { %3405 = vmatpush.bf16.msrb.mxu0 %v5807_v22  ;;  %v3174_v22 = vpop.f32.mrf.mxu3  ;;  %v5727_v27 = vor.u32 %v7989_v15, %v5726_v13  ;;  %v6446_v13 = vld [vmem:[#allocation5 + $0x5d0] sm:$0xf]  ;;  %v8169_v15 = vld [vmem:[#allocation5 + $0x5e0] sm:$0xf0] }
  0xf6   : > { %3419 = vmatpush.bf16.msrb.mxu1 %v5967_v24  ;;  %v6206_v24 = vld [vmem:[#allocation5 + $0x3f0] sm:$0xf]  ;;  %v9296_v26 = vadd.f32 %v3174_v22, %v3161_v8  ;;  %v9300_v8 = vpop.f32.mrf.mxu1 }
  0xf7   : > { %3433 = vmatpush.bf16.msrb.mxu2 %v6127_v25  ;;  %v8109_v25 = vld [vmem:[#allocation5 + $0x400] sm:$0xf0]  ;;  %v6926_v22 = vld [vmem:[#allocation5 + $0x990] sm:$0xf] }
  0xf8   : > { %3447 = vmatpush.bf16.msrb.mxu3 %v6287_v30  ;;  %v7984_v30 = vld [vmem:[#allocation5 + $0x18] sm:$0xf0]  ;;  %v6207_v37 = vor.u32 %v8109_v25, %v6206_v24  ;;  %v8289_v24 = vld [vmem:[#allocation5 + $0x9a0] sm:$0xf0]  ;;  %v6447_v25 = vor.u32 %v8169_v15, %v6446_v13 }
  0xf9   : > { %3406 = vmatpush.bf16.msrb.mxu0 %v5787_v38  ;;  %v8064_v38 = vld [vmem:[#allocation5 + $0x298] sm:$0xf0]  ;;  %v5707_v47 = vor.u32 %v7984_v30, %v5706_v29  ;;  %v6767_v29 = vor.u32 %v8249_v21, %v6766_v20  ;;  %v6426_v30 = vld [vmem:[#allocation5 + $0x5a8] sm:$0xf]  ;;  %v6927_v34 = vor.u32 %v8289_v24, %v6926_v22  ;;  %v8189_v21 = vld [vmem:[#allocation5 + $0x680] sm:$0xf0] }
  0xfa   : > { %3420 = vmatpush.bf16.msrb.mxu1 %v5947_v41  ;;  %v8104_v41 = vld [vmem:[#allocation5 + $0x3d8] sm:$0xf0]  ;;  %v6027_v53 = vor.u32 %v8064_v38, %v6026_v36  ;;  %v6746_v36 = vld [vmem:[#allocation5 + $0x828] sm:$0xf]  ;;  %v6686_v22 = vld [vmem:[#allocation5 + $0x7b0] sm:$0xf] }
  0xfb   : > { %3434 = vmatpush.bf16.msrb.mxu2 %v6107_v42  ;;  %v6486_v42 = vld [vmem:[#allocation5 + $0x620] sm:$0xf]  ;;  %v8229_v24 = vld [vmem:[#allocation5 + $0x7c0] sm:$0xf0] }
  0xfc   : > { %3448 = vmatpush.bf16.msrb.mxu3 %v6267_v49  ;;  %v8219_v49 = vld [vmem:[#allocation5 + $0x770] sm:$0xf0]  ;;  %v6487_v57 = vor.u32 %v8179_v43, %v6486_v42 }
  0xfd   : > { %3407 = vmatpush.bf16.msrb.mxu0 %v5767_v56  ;;  %v6187_v56 = vor.u32 %v8104_v41, %v6186_v39  ;;  %v6906_v39 = vld [vmem:[#allocation5 + $0x968] sm:$0xf]  ;;  %v8284_v41 = vld [vmem:[#allocation5 + $0x978] sm:$0xf0] }
  0xfe   : > { %3421 = vmatpush.bf16.msrb.mxu1 %v5927_v58  ;;  %v6647_v58 = vor.u32 %v8219_v49, %v6646_v46 }
  0xff   : > { %3435 = vmatpush.bf16.msrb.mxu2 %v6087_v60  ;;  %v6807_v60 = vor.u32 %v8259_v51, %v6806_v50  ;;  %v6406_v50 = vld [vmem:[#allocation5 + $0x580] sm:$0xf]  ;;  %v8159_v51 = vld [vmem:[#allocation5 + $0x590] sm:$0xf0] }
 0x100   : > { %3449 = vmatpush.bf16.msrb.mxu3 %v6247_v0  ;;  %v6626_v0 = vld [vmem:[#allocation5 + $0x738] sm:$0xf] }
 0x101   : > { %3408 = vmatpush.bf16.msrb.mxu0 %v5747_v9  ;;  %v6467_v9 = vor.u32 %v8174_v63, %v6466_v62 }
 0x102   : > { %3422 = vmatpush.bf16.msrb.mxu1 %v5907_v10  ;;  %v6627_v10 = vor.u32 %v8214_v3, %v6626_v0  ;;  %v6386_v0 = vld [vmem:[#allocation5 + $0x558] sm:$0xf] }
 0x103   : > { %3436 = vmatpush.bf16.msrb.mxu2 %v6067_v12  ;;  %v6787_v12 = vor.u32 %v8254_v5, %v6786_v4  ;;  %v6546_v3 = vld [vmem:[#allocation5 + $0x698] sm:$0xf]  ;;  %v8194_v5 = vld [vmem:[#allocation5 + $0x6a8] sm:$0xf0] }
 0x104   : > { %3450 = vmatpush.bf16.msrb.mxu3 %v6227_v17  ;;  %v6947_v17 = vor.u32 %v8294_v7, %v6946_v6  ;;  %v6706_v6 = vld [vmem:[#allocation5 + $0x7d8] sm:$0xf]  ;;  %v8234_v7 = vld [vmem:[#allocation5 + $0x7e8] sm:$0xf0]  ;;  %v6547_v13 = vor.u32 %v8194_v5, %v6546_v3  ;;  %v8012_v5 = vld [vmem:[#allocation5 + $0xfc] sm:$0xf] }
 0x105   : > { %3409 = vmatpush.bf16.msrb.mxu0 %v5727_v27  ;;  %v6607_v27 = vor.u32 %v8209_v19, %v6606_v16  ;;  %v6707_v15 = vor.u32 %v8234_v7, %v6706_v6  ;;  %v6366_v16 = vld [vmem:[#allocation5 + $0x530] sm:$0xf]  ;;  %v8052_v7 = vld [vmem:[#allocation5 + $0x23c] sm:$0xf] }
 0x106   : > { %3423 = vmatpush.bf16.msrb.mxu1 %v5887_v31  ;;  %v8164_v31 = vld [vmem:[#allocation5 + $0x5b8] sm:$0xf0]  ;;  %v6526_v19 = vld [vmem:[#allocation5 + $0x670] sm:$0xf] }
 0x107   : > { %3437 = vmatpush.bf16.msrb.mxu2 %v6047_v33  ;;  %v6586_v33 = vld [vmem:[#allocation5 + $0x6e8] sm:$0xf]  ;;  %v6427_v43 = vor.u32 %v8164_v31, %v6426_v30  ;;  %v8144_v31 = vld [vmem:[#allocation5 + $0x518] sm:$0xf0]  ;;  %v5828_v6 = vld [vmem:[#allocation5 + $0x10c] sm:$0xf0] }
 0x108   : > { %3451 = vmatpush.bf16.msrb.mxu3 %v6207_v37  ;;  %v8244_v37 = vld [vmem:[#allocation5 + $0x838] sm:$0xf0]  ;;  %v6587_v46 = vor.u32 %v8204_v35, %v6586_v33  ;;  %v6346_v30 = vld [vmem:[#allocation5 + $0x508] sm:$0xf]  ;;  %v6527_v33 = vor.u32 %v8189_v21, %v6526_v19  ;;  %v8007_v21 = vld [vmem:[#allocation5 + $0xd4] sm:$0xf] }
 0x109   : > { %3410 = vmatpush.bf16.msrb.mxu0 %v5707_v47  ;;  %v3188_v38 = vpop.f32.mrf.mxu0  ;;  %v6747_v47 = vor.u32 %v8244_v37, %v6746_v36  ;;  %v6506_v35 = vld [vmem:[#allocation5 + $0x648] sm:$0xf]  ;;  %v8184_v36 = vld [vmem:[#allocation5 + $0x658] sm:$0xf0] }
 0x10a   : > { %3424 = vmatpush.bf16.msrb.mxu1 %v5867_v52  ;;  %v3189_v42 = vadd.f32 %v3188_v38, %v9296_v26  ;;  %v3202_v49 = vpop.f32.mrf.mxu1  ;;  %v6566_v52 = vld [vmem:[#allocation5 + $0x6c0] sm:$0xf]  ;;  %v6407_v26 = vor.u32 %v8159_v51, %v6406_v50  ;;  %v6666_v37 = vld [vmem:[#allocation5 + $0x788] sm:$0xf]  ;;  %v8379_v50 = vld [vmem:[#allocation5 + $0xc70] sm:$0xf0] }
 0x10b   : > { %3438 = vmatpush.bf16.msrb.mxu2 %v6027_v53  ;;  %v6907_v53 = vor.u32 %v8284_v41, %v6906_v39  ;;  %v6567_v62 = vor.u32 %v8199_v55, %v6566_v52  ;;  %v8224_v39 = vld [vmem:[#allocation5 + $0x798] sm:$0xf0]  ;;  %v6826_v41 = vld [vmem:[#allocation5 + $0x8c8] sm:$0xf]  ;;  %v8017_v51 = vld [vmem:[#allocation5 + $0x124] sm:$0xf] }
 0x10c   : > { %3452 = vmatpush.bf16.msrb.mxu3 %v6187_v56  ;;  %3411 = vmatmul.bf16.vlgmr.msrb.gmra.mxu0 %v9234_v59  ;;  %v9307_v54 = vadd.f32 %v3202_v49, %v3189_v42  ;;  %v6726_v56 = vld [vmem:[#allocation5 + $0x800] sm:$0xf]  ;;  %v8264_v42 = vld [vmem:[#allocation5 + $0x8d8] sm:$0xf0]  ;;  %v6347_v49 = vor.u32 %v8144_v31, %v6346_v30  ;;  %v5848_v52 = vld [vmem:[#allocation5 + $0x134] sm:$0xf0]  ;;  %v6667_v55 = vor.u32 %v8224_v39, %v6666_v37 }
 0x10d   : > { %3459 = vmatpush.bf16.msra.mxu0 %v6487_v57  ;;  %3425 = vmatmul.bf16.vlgmr.msrb.gmra.mxu1 %v9244_v11  ;;  %v8239_v57 = vld [vmem:[#allocation5 + $0x810] sm:$0xf0]  ;;  %v7066_v31 = vld [vmem:[#allocation5 + $0xaa8] sm:$0xf]  ;;  %v8002_v37 = vld [vmem:[#allocation5 + $0xac] sm:$0xf] }
 0x10e   : > { %3473 = vmatpush.bf16.msra.mxu1 %v6647_v58  ;;  %3439 = vmatmul.bf16.vlgmr.msrb.gmra.mxu2 %v9237_v2  ;;  %v6886_v58 = vld [vmem:[#allocation5 + $0x940] sm:$0xf]  ;;  %v6727_v63 = vor.u32 %v8239_v57, %v6726_v56  ;;  %v8057_v56 = vld [vmem:[#allocation5 + $0x264] sm:$0xf]  ;;  %v6008_v57 = vld [vmem:[#allocation5 + $0x274] sm:$0xf0] }
 0x10f   : > { %3487 = vmatpush.bf16.msra.mxu2 %v6807_v60  ;;  %3453 = vmatmul.bf16.vlgmr.msrb.gmra.mxu3 %v9247_v18  ;;  %v8279_v60 = vld [vmem:[#allocation5 + $0x950] sm:$0xf0]  ;;  %v6011_v3 = vor.u32 %v8057_v56, %v6008_v57  ;;  %v8042_v39 = vld [vmem:[#allocation5 + $0x1ec] sm:$0xf]  ;;  %v8037_v56 = vld [vmem:[#allocation5 + $0x1c4] sm:$0xf] }
 0x110   : > { %3501 = vmatpush.bf16.msra.mxu3 %v6967_v1  ;;  %v8154_v1 = vld [vmem:[#allocation5 + $0x568] sm:$0xf0]  ;;  %v6887_v4 = vor.u32 %v8279_v60, %v6886_v58  ;;  %v6827_v58 = vor.u32 %v8264_v42, %v6826_v41  ;;  %v5948_v41 = vld [vmem:[#allocation5 + $0x1fc] sm:$0xf0]  ;;  %v5928_v57 = vld [vmem:[#allocation5 + $0x1d4] sm:$0xf0] }
 0x111   : > { %3460 = vmatpush.bf16.msra.mxu0 %v6467_v9  ;;  %v6866_v9 = vld [vmem:[#allocation5 + $0x918] sm:$0xf] }
 0x112   : > { %3474 = vmatpush.bf16.msra.mxu1 %v6627_v10  ;;  %v8274_v10 = vld [vmem:[#allocation5 + $0x928] sm:$0xf0] }
 0x113   : > { %3488 = vmatpush.bf16.msra.mxu2 %v6787_v12  ;;  %v6387_v12 = vor.u32 %v8154_v1, %v6386_v0  ;;  %v6867_v20 = vor.u32 %v8274_v10, %v6866_v9  ;;  %v8334_v0 = vld [vmem:[#allocation5 + $0xb08] sm:$0xf0]  ;;  %v7266_v1 = vld [vmem:[#allocation5 + $0xc38] sm:$0xf]  ;;  %v5988_v9 = vld [vmem:[#allocation5 + $0x24c] sm:$0xf0] }
 0x114   : > { %3502 = vmatpush.bf16.msra.mxu3 %v6947_v17  ;;  %v8149_v17 = vld [vmem:[#allocation5 + $0x540] sm:$0xf0]  ;;  %v5991_v19 = vor.u32 %v8052_v7, %v5988_v9  ;;  %v5908_v7 = vld [vmem:[#allocation5 + $0x1ac] sm:$0xf0] }
 0x115   : > { %3461 = vmatpush.bf16.msra.mxu0 %v6447_v25  ;;  %v6846_v25 = vld [vmem:[#allocation5 + $0x8f0] sm:$0xf] }
 0x116   : > { %3475 = vmatpush.bf16.msra.mxu1 %v6607_v27  ;;  %v8269_v27 = vld [vmem:[#allocation5 + $0x900] sm:$0xf0] }
 0x117   : > { %3489 = vmatpush.bf16.msra.mxu2 %v6767_v29  ;;  %v6367_v29 = vor.u32 %v8149_v17, %v6366_v16  ;;  %v6847_v38 = vor.u32 %v8269_v27, %v6846_v25  ;;  %v8329_v16 = vld [vmem:[#allocation5 + $0xae0] sm:$0xf0]  ;;  %v7246_v17 = vld [vmem:[#allocation5 + $0xc10] sm:$0xf]  ;;  %v5968_v25 = vld [vmem:[#allocation5 + $0x224] sm:$0xf0] }
 0x118   : > { %3503 = vmatpush.bf16.msra.mxu3 %v6927_v34  ;;  %v6687_v34 = vor.u32 %v8229_v24, %v6686_v22  ;;  %v5808_v22 = vld [vmem:[#allocation5 + $0xe4] sm:$0xf0]  ;;  %v8047_v24 = vld [vmem:[#allocation5 + $0x214] sm:$0xf] }
 0x119   : > { %3462 = vmatpush.bf16.msra.mxu0 %v6427_v43  ;;  %v7126_v43 = vld [vmem:[#allocation5 + $0xb20] sm:$0xf]  ;;  %v5811_v30 = vor.u32 %v8007_v21, %v5808_v22  ;;  %v5728_v21 = vld [vmem:[#allocation5 + $0x44] sm:$0xf0]  ;;  %v8027_v22 = vld [vmem:[#allocation5 + $0x174] sm:$0xf] }
 0x11a   : > { %3476 = vmatpush.bf16.msra.mxu1 %v6587_v46  ;;  %v8339_v46 = vld [vmem:[#allocation5 + $0xb30] sm:$0xf0] }
 0x11b   : > { %3490 = vmatpush.bf16.msra.mxu2 %v6747_v47  ;;  %v7286_v47 = vld [vmem:[#allocation5 + $0xc60] sm:$0xf]  ;;  %v7127_v60 = vor.u32 %v8339_v46, %v7126_v43 }
 0x11c   : > { %3504 = vmatpush.bf16.msra.mxu3 %v6907_v53  ;;  %v6507_v53 = vor.u32 %v8184_v36, %v6506_v35  ;;  %v5971_v35 = vor.u32 %v8047_v24, %v5968_v25  ;;  %v8364_v36 = vld [vmem:[#allocation5 + $0xbf8] sm:$0xf0]  ;;  %v5888_v24 = vld [vmem:[#allocation5 + $0x184] sm:$0xf0] }
 0x11d   : > { %3463 = vmatpush.bf16.msra.mxu0 %v6407_v26  ;;  %v7287_v26 = vor.u32 %v8379_v50, %v7286_v47  ;;  %v7046_v47 = vld [vmem:[#allocation5 + $0xa80] sm:$0xf] }
 0x11e   : > { %3477 = vmatpush.bf16.msra.mxu1 %v6567_v62  ;;  %v5851_v62 = vor.u32 %v8017_v51, %v5848_v52  ;;  %v7206_v50 = vld [vmem:[#allocation5 + $0xbc0] sm:$0xf]  ;;  %v5951_v51 = vor.u32 %v8042_v39, %v5948_v41  ;;  %v8359_v52 = vld [vmem:[#allocation5 + $0xbd0] sm:$0xf0]  ;;  %v8097_v41 = vld [vmem:[#allocation5 + $0x3a4] sm:$0xf] }
 0x11f   : > { %3491 = vmatpush.bf16.msra.mxu2 %v6727_v63  ;;  %v7106_v63 = vld [vmem:[#allocation5 + $0xaf8] sm:$0xf]  ;;  %v5868_v39 = vld [vmem:[#allocation5 + $0x15c] sm:$0xf0] }
 0x120   : > { %3505 = vmatpush.bf16.msra.mxu3 %v6887_v4  ;;  %v8374_v4 = vld [vmem:[#allocation5 + $0xc48] sm:$0xf0]  ;;  %v7107_v10 = vor.u32 %v8334_v0, %v7106_v63  ;;  %v7186_v0 = vld [vmem:[#allocation5 + $0xb98] sm:$0xf] }
 0x121   : > { %3464 = vmatpush.bf16.msra.mxu0 %v6387_v12  ;;  %v7267_v12 = vor.u32 %v8374_v4, %v7266_v1  ;;  %v8314_v63 = vld [vmem:[#allocation5 + $0xa68] sm:$0xf0]  ;;  %v5931_v1 = vor.u32 %v8037_v56, %v5928_v57  ;;  %v7992_v4 = vld [vmem:[#allocation5 + $0x5c] sm:$0xf] }
 0x122   : > { %3478 = vmatpush.bf16.msra.mxu1 %v6547_v13  ;;  %v5831_v13 = vor.u32 %v8012_v5, %v5828_v6  ;;  %v5748_v5 = vld [vmem:[#allocation5 + $0x6c] sm:$0xf0]  ;;  %v8032_v6 = vld [vmem:[#allocation5 + $0x19c] sm:$0xf] }
 0x123   : > { %3492 = vmatpush.bf16.msra.mxu2 %v6707_v15  ;;  %v7086_v15 = vld [vmem:[#allocation5 + $0xad0] sm:$0xf] }
 0x124   : > { %3506 = vmatpush.bf16.msra.mxu3 %v6867_v20  ;;  %v8369_v20 = vld [vmem:[#allocation5 + $0xc20] sm:$0xf0]  ;;  %v7087_v27 = vor.u32 %v8329_v16, %v7086_v15  ;;  %v7166_v16 = vld [vmem:[#allocation5 + $0xb70] sm:$0xf] }
 0x125   : > { %3465 = vmatpush.bf16.msra.mxu0 %v6367_v29  ;;  %v7247_v29 = vor.u32 %v8369_v20, %v7246_v17  ;;  %v8309_v15 = vld [vmem:[#allocation5 + $0xa40] sm:$0xf0]  ;;  %v5911_v17 = vor.u32 %v8032_v6, %v5908_v7  ;;  %v7987_v20 = vld [vmem:[#allocation5 + $0x34] sm:$0xf]  ;;  %v6628_v6 = vld [vmem:[#allocation5 + $0x74c] sm:$0xf0] }
 0x126   : > { %3479 = vmatpush.bf16.msra.mxu1 %v6527_v33  ;;  %v8324_v33 = vld [vmem:[#allocation5 + $0xab8] sm:$0xf0] }
 0x127   : > { %3493 = vmatpush.bf16.msra.mxu2 %v6687_v34  ;;  %v7226_v34 = vld [vmem:[#allocation5 + $0xbe8] sm:$0xf]  ;;  %v7067_v42 = vor.u32 %v8324_v33, %v7066_v31  ;;  %v5731_v31 = vor.u32 %v7987_v20, %v5728_v21  ;;  %v8207_v21 = vld [vmem:[#allocation5 + $0x714] sm:$0xf] }
 0x128   : > { %3507 = vmatpush.bf16.msra.mxu3 %v6847_v38  ;;  %v5788_v38 = vld [vmem:[#allocation5 + $0xbc] sm:$0xf0]  ;;  %v7227_v43 = vor.u32 %v8364_v36, %v7226_v34  ;;  %v7146_v33 = vld [vmem:[#allocation5 + $0xb48] sm:$0xf]  ;;  %v8344_v34 = vld [vmem:[#allocation5 + $0xb58] sm:$0xf0]  ;;  %v5891_v36 = vor.u32 %v8027_v22, %v5888_v24 }
 0x129   : > { %3466 = vmatpush.bf16.msra.mxu0 %v6347_v49  ;;  %v5791_v46 = vor.u32 %v8002_v37, %v5788_v38  ;;  %v8319_v49 = vld [vmem:[#allocation5 + $0xa90] sm:$0xf0]  ;;  %v5708_v37 = vld [vmem:[#allocation5 + $0x1c] sm:$0xf0]  ;;  %v8022_v38 = vld [vmem:[#allocation5 + $0x14c] sm:$0xf] }
 0x12a   : > { %3480 = vmatpush.bf16.msra.mxu1 %v6507_v53  ;;  %v7997_v53 = vld [vmem:[#allocation5 + $0x84] sm:$0xf]  ;;  %v5871_v56 = vor.u32 %v8022_v38, %v5868_v39  ;;  %v6448_v20 = vld [vmem:[#allocation5 + $0x5e4] sm:$0xf0]  ;;  %v6588_v38 = vld [vmem:[#allocation5 + $0x6fc] sm:$0xf0] }
 0x12b   : > { %3494 = vmatpush.bf16.msra.mxu2 %v6667_v55  ;;  %v5768_v55 = vld [vmem:[#allocation5 + $0x94] sm:$0xf0]  ;;  %v6608_v22 = vld [vmem:[#allocation5 + $0x724] sm:$0xf0] }
 0x12c   : > { %3508 = vmatpush.bf16.msra.mxu3 %v6827_v58  ;;  %3467 = vmatmul.bf16.vlgmr.msra.gmra.mxu0 %v9259_v40  ;;  %v7047_v58 = vor.u32 %v8319_v49, %v7046_v47  ;;  %v6328_v47 = vld [vmem:[#allocation5 + $0x4f4] sm:$0xf0]  ;;  %v8177_v49 = vld [vmem:[#allocation5 + $0x624] sm:$0xf] }
 0x12d   : > { %3515 = vmatpush.bf16.msrb.mxu0 %v7127_v60  ;;  %3481 = vmatmul.bf16.vlgmr.msra.gmra.mxu1 %v9263_v45  ;;  %v7207_v60 = vor.u32 %v8359_v52, %v7206_v50  ;;  %v6488_v50 = vld [vmem:[#allocation5 + $0x634] sm:$0xf0] }
 0x12e   : > { %3529 = vmatpush.bf16.msrb.mxu1 %v7287_v26  ;;  %3495 = vmatmul.bf16.vlgmr.msra.gmra.mxu2 %v9261_v44  ;;  %v5771_v26 = vor.u32 %v7997_v53, %v5768_v55  ;;  %v8217_v53 = vld [vmem:[#allocation5 + $0x764] sm:$0xf]  ;;  %v6648_v55 = vld [vmem:[#allocation5 + $0x774] sm:$0xf0] }
 0x12f   : > { %3543 = vmatpush.bf16.msrb.mxu2 %v5851_v62  ;;  %3509 = vmatmul.bf16.vlgmr.msra.gmra.mxu3 %v9265_v48  ;;  %v7026_v62 = vld [vmem:[#allocation5 + $0xa58] sm:$0xf] }
 0x130   : > { %3557 = vmatpush.bf16.msrb.mxu3 %v6011_v3  ;;  %v8354_v3 = vld [vmem:[#allocation5 + $0xba8] sm:$0xf0]  ;;  %v7027_v9 = vor.u32 %v8314_v63, %v7026_v62  ;;  %v6148_v62 = vld [vmem:[#allocation5 + $0x38c] sm:$0xf0]  ;;  %v8132_v63 = vld [vmem:[#allocation5 + $0x4bc] sm:$0xf] }
 0x131   : > { %3516 = vmatpush.bf16.msrb.mxu0 %v7107_v10  ;;  %v7187_v10 = vor.u32 %v8354_v3, %v7186_v0  ;;  %v6651_v0 = vor.u32 %v8217_v53, %v6648_v55  ;;  %v8172_v3 = vld [vmem:[#allocation5 + $0x5fc] sm:$0xf]  ;;  %v9317_v53 = vpop.f32.mrf.mxu2  ;;  %v8197_v55 = vld [vmem:[#allocation5 + $0x6c4] sm:$0xf] }
 0x132   : > { %3530 = vmatpush.bf16.msrb.mxu1 %v7267_v12  ;;  %v5751_v12 = vor.u32 %v7992_v4, %v5748_v5  ;;  %v6468_v4 = vld [vmem:[#allocation5 + $0x60c] sm:$0xf0]  ;;  %v8212_v5 = vld [vmem:[#allocation5 + $0x73c] sm:$0xf] }
 0x133   : > { %3544 = vmatpush.bf16.msrb.mxu2 %v5831_v13  ;;  %v7006_v13 = vld [vmem:[#allocation5 + $0xa30] sm:$0xf] }
 0x134   : > { %3558 = vmatpush.bf16.msrb.mxu3 %v5991_v19  ;;  %v8349_v19 = vld [vmem:[#allocation5 + $0xb80] sm:$0xf0]  ;;  %v7007_v25 = vor.u32 %v8309_v15, %v7006_v13  ;;  %v6128_v13 = vld [vmem:[#allocation5 + $0x364] sm:$0xf0]  ;;  %v8127_v15 = vld [vmem:[#allocation5 + $0x494] sm:$0xf] }
 0x135   : > { %3517 = vmatpush.bf16.msrb.mxu0 %v7087_v27  ;;  %v6986_v27 = vld [vmem:[#allocation5 + $0xa08] sm:$0xf] }
 0x136   : > { %3531 = vmatpush.bf16.msrb.mxu1 %v7247_v29  ;;  %v8304_v29 = vld [vmem:[#allocation5 + $0xa18] sm:$0xf0] }
 0x137   : > { %3545 = vmatpush.bf16.msrb.mxu2 %v5811_v30  ;;  %v7167_v30 = vor.u32 %v8349_v19, %v7166_v16  ;;  %v6631_v16 = vor.u32 %v8212_v5, %v6628_v6  ;;  %v8167_v19 = vld [vmem:[#allocation5 + $0x5d4] sm:$0xf]  ;;  %v9319_v5 = vpop.f32.mrf.mxu3  ;;  %v8192_v6 = vld [vmem:[#allocation5 + $0x69c] sm:$0xf] }
 0x138   : > { %3559 = vmatpush.bf16.msrb.mxu3 %v5971_v35  ;;  %v7982_v35 = vld [vmem:[#allocation5 + $0xc] sm:$0xf] }
 0x139   : > { %3518 = vmatpush.bf16.msrb.mxu0 %v7067_v42  ;;  %v6168_v42 = vld [vmem:[#allocation5 + $0x3b4] sm:$0xf0]  ;;  %v5711_v52 = vor.u32 %v7982_v35, %v5708_v37  ;;  %v8162_v35 = vld [vmem:[#allocation5 + $0x5ac] sm:$0xf] }
 0x13a   : > { %3532 = vmatpush.bf16.msrb.mxu1 %v7227_v43  ;;  %v8137_v43 = vld [vmem:[#allocation5 + $0x4e4] sm:$0xf]  ;;  %v6171_v57 = vor.u32 %v8097_v41, %v6168_v42  ;;  %v8202_v37 = vld [vmem:[#allocation5 + $0x6ec] sm:$0xf] }
 0x13b   : > { %3546 = vmatpush.bf16.msrb.mxu2 %v5791_v46  ;;  %v6987_v46 = vor.u32 %v8304_v29, %v6986_v27  ;;  %v6451_v27 = vor.u32 %v8167_v19, %v6448_v20  ;;  %v8082_v29 = vld [vmem:[#allocation5 + $0x32c] sm:$0xf]  ;;  %v6208_v19 = vld [vmem:[#allocation5 + $0x404] sm:$0xf0]  ;;  %v8147_v20 = vld [vmem:[#allocation5 + $0x534] sm:$0xf] }
 0x13c   : > { %3560 = vmatpush.bf16.msrb.mxu3 %v5951_v51  ;;  %v7147_v51 = vor.u32 %v8344_v34, %v7146_v33  ;;  %v6611_v33 = vor.u32 %v8207_v21, %v6608_v22  ;;  %v6268_v34 = vld [vmem:[#allocation5 + $0x47c] sm:$0xf0]  ;;  %v6368_v21 = vld [vmem:[#allocation5 + $0x544] sm:$0xf0]  ;;  %v8187_v22 = vld [vmem:[#allocation5 + $0x674] sm:$0xf] }
 0x13d   : > { %3519 = vmatpush.bf16.msrb.mxu0 %v7047_v58  ;;  %v6331_v58 = vor.u32 %v8137_v43, %v6328_v47  ;;  %v8077_v43 = vld [vmem:[#allocation5 + $0x304] sm:$0xf] }
 0x13e   : > { %3533 = vmatpush.bf16.msrb.mxu1 %v7207_v60  ;;  %v6491_v60 = vor.u32 %v8177_v49, %v6488_v50  ;;  %v8117_v47 = vld [vmem:[#allocation5 + $0x444] sm:$0xf]  ;;  %v6591_v49 = vor.u32 %v8202_v37, %v6588_v38  ;;  %v6248_v50 = vld [vmem:[#allocation5 + $0x454] sm:$0xf0]  ;;  %v6348_v38 = vld [vmem:[#allocation5 + $0x51c] sm:$0xf0] }
 0x13f   : > { %3547 = vmatpush.bf16.msrb.mxu2 %v5771_v26  ;;  %v8092_v26 = vld [vmem:[#allocation5 + $0x37c] sm:$0xf] }
 0x140   : > { %3561 = vmatpush.bf16.msrb.mxu3 %v5931_v1  ;;  %v6308_v1 = vld [vmem:[#allocation5 + $0x4cc] sm:$0xf0]  ;;  %v6151_v7 = vor.u32 %v8092_v26, %v6148_v62  ;;  %v8072_v26 = vld [vmem:[#allocation5 + $0x2dc] sm:$0xf] }
 0x141   : > { %3520 = vmatpush.bf16.msrb.mxu0 %v7027_v9  ;;  %v6311_v9 = vor.u32 %v8132_v63, %v6308_v1  ;;  %v6068_v62 = vld [vmem:[#allocation5 + $0x2ec] sm:$0xf0]  ;;  %v8112_v63 = vld [vmem:[#allocation5 + $0x41c] sm:$0xf] }
 0x142   : > { %3534 = vmatpush.bf16.msrb.mxu1 %v7187_v10  ;;  %v6471_v10 = vor.u32 %v8172_v3, %v6468_v4  ;;  %v6228_v1 = vld [vmem:[#allocation5 + $0x42c] sm:$0xf0]  ;;  %v8152_v3 = vld [vmem:[#allocation5 + $0x55c] sm:$0xf] }
 0x143   : > { %3548 = vmatpush.bf16.msrb.mxu2 %v5751_v12  ;;  %v8087_v12 = vld [vmem:[#allocation5 + $0x354] sm:$0xf]  ;;  %v6388_v4 = vld [vmem:[#allocation5 + $0x56c] sm:$0xf0] }
 0x144   : > { %3562 = vmatpush.bf16.msrb.mxu3 %v5911_v17  ;;  %v6288_v17 = vld [vmem:[#allocation5 + $0x4a4] sm:$0xf0]  ;;  %v6131_v24 = vor.u32 %v8087_v12, %v6128_v13  ;;  %v6391_v12 = vor.u32 %v8152_v3, %v6388_v4  ;;  %v8067_v13 = vld [vmem:[#allocation5 + $0x2b4] sm:$0xf]  ;;  %v8252_v3 = vld [vmem:[#allocation5 + $0x87c] sm:$0xf] }
 0x145   : > { %3521 = vmatpush.bf16.msrb.mxu0 %v7007_v25  ;;  %v6291_v25 = vor.u32 %v8127_v15, %v6288_v17  ;;  %v6048_v15 = vld [vmem:[#allocation5 + $0x2c4] sm:$0xf0]  ;;  %v6788_v4 = vld [vmem:[#allocation5 + $0x88c] sm:$0xf0] }
 0x146   : > { %3535 = vmatpush.bf16.msrb.mxu1 %v7167_v30  ;;  %v6108_v30 = vld [vmem:[#allocation5 + $0x33c] sm:$0xf0] }
 0x147   : > { %3549 = vmatpush.bf16.msrb.mxu2 %v5731_v31  ;;  %v8122_v31 = vld [vmem:[#allocation5 + $0x46c] sm:$0xf]  ;;  %v6111_v39 = vor.u32 %v8082_v29, %v6108_v30  ;;  %v6028_v29 = vld [vmem:[#allocation5 + $0x29c] sm:$0xf0]  ;;  %v9321_v30 = vpop.f32.mrf.mxu2 }
 0x148   : > { %3563 = vmatpush.bf16.msrb.mxu3 %v5891_v36  ;;  %v6428_v36 = vld [vmem:[#allocation5 + $0x5bc] sm:$0xf0]  ;;  %v6271_v41 = vor.u32 %v8122_v31, %v6268_v34  ;;  %v8102_v34 = vld [vmem:[#allocation5 + $0x3cc] sm:$0xf] }
 0x149   : > { %3522 = vmatpush.bf16.msrb.mxu0 %v6987_v46  ;;  %v6431_v42 = vor.u32 %v8162_v35, %v6428_v36  ;;  %v6088_v46 = vld [vmem:[#allocation5 + $0x314] sm:$0xf0]  ;;  %v6188_v35 = vld [vmem:[#allocation5 + $0x3dc] sm:$0xf0]  ;;  %v8142_v36 = vld [vmem:[#allocation5 + $0x50c] sm:$0xf] }
 0x14a   : > { %3536 = vmatpush.bf16.msrb.mxu1 %v7147_v51  ;;  %v8157_v51 = vld [vmem:[#allocation5 + $0x584] sm:$0xf] }
 0x14b   : > { %3550 = vmatpush.bf16.msrb.mxu2 %v5711_v52  ;;  %v6408_v52 = vld [vmem:[#allocation5 + $0x594] sm:$0xf0] }
 0x14c   : > { %3564 = vmatpush.bf16.msrb.mxu3 %v5871_v56  ;;  %3523 = vmatmul.bf16.vlgmr.msrb.gmra.mxu0 %v9275_v28  ;;  %v6568_v56 = vld [vmem:[#allocation5 + $0x6d4] sm:$0xf0] }
 0x14d   : > { %3571 = vmatpush.bf16.msra.mxu0 %v6171_v57  ;;  %3537 = vmatmul.bf16.vlgmr.msrb.gmra.mxu1 %v9277_v32  ;;  %v6091_v57 = vor.u32 %v8077_v43, %v6088_v46  ;;  %v6808_v43 = vld [vmem:[#allocation5 + $0x8b4] sm:$0xf0]  ;;  %v8297_v46 = vld [vmem:[#allocation5 + $0x9e4] sm:$0xf] }
 0x14e   : > { %3585 = vmatpush.bf16.msra.mxu1 %v6331_v58  ;;  %3551 = vmatmul.bf16.vlgmr.msrb.gmra.mxu2 %v9234_v59  ;;  %v6251_v58 = vor.u32 %v8117_v47, %v6248_v50  ;;  %v8337_v50 = vld [vmem:[#allocation5 + $0xb24] sm:$0xf] }
 0x14f   : > { %3599 = vmatpush.bf16.msra.mxu2 %v6491_v60  ;;  %3565 = vmatmul.bf16.vlgmr.msrb.gmra.mxu3 %v9244_v11  ;;  %v6411_v60 = vor.u32 %v8157_v51, %v6408_v52  ;;  %v7128_v51 = vld [vmem:[#allocation5 + $0xb34] sm:$0xf0]  ;;  %v9323_v52 = vpop.f32.mrf.mxu0 }
 0x150   : > { %3613 = vmatpush.bf16.msra.mxu3 %v6651_v0  ;;  %v6571_v0 = vor.u32 %v8197_v55, %v6568_v56  ;;  %v9325_v55 = vpop.f32.mrf.mxu3  ;;  %v6191_v56 = vor.u32 %v8102_v34, %v6188_v35  ;;  %v8367_v34 = vld [vmem:[#allocation5 + $0xc14] sm:$0xf]  ;;  %v7248_v35 = vld [vmem:[#allocation5 + $0xc24] sm:$0xf0] }
 0x151   : > { %3572 = vmatpush.bf16.msra.mxu0 %v6151_v7  ;;  %v6548_v7 = vld [vmem:[#allocation5 + $0x6ac] sm:$0xf0] }
 0x152   : > { %3586 = vmatpush.bf16.msra.mxu1 %v6311_v9  ;;  %v6071_v9 = vor.u32 %v8072_v26, %v6068_v62  ;;  %v6551_v17 = vor.u32 %v8192_v6, %v6548_v7  ;;  %v9327_v26 = vpop.f32.mrf.mxu1  ;;  %v8292_v6 = vld [vmem:[#allocation5 + $0x9bc] sm:$0xf] }
 0x153   : > { %3600 = vmatpush.bf16.msra.mxu2 %v6471_v10  ;;  %v6231_v10 = vor.u32 %v8112_v63, %v6228_v1  ;;  %v7131_v1 = vor.u32 %v8337_v50, %v7128_v51  ;;  %v8322_v50 = vld [vmem:[#allocation5 + $0xaac] sm:$0xf]  ;;  %v7068_v51 = vld [vmem:[#allocation5 + $0xabc] sm:$0xf0] }
 0x154   : > { %3614 = vmatpush.bf16.msra.mxu3 %v6631_v16  ;;  %v8107_v16 = vld [vmem:[#allocation5 + $0x3f4] sm:$0xf] }
 0x155   : > { %3573 = vmatpush.bf16.msra.mxu0 %v6131_v24  ;;  %v6528_v24 = vld [vmem:[#allocation5 + $0x684] sm:$0xf0]  ;;  %v6211_v31 = vor.u32 %v8107_v16, %v6208_v19  ;;  %v6791_v16 = vor.u32 %v8252_v3, %v6788_v4  ;;  %v8277_v3 = vld [vmem:[#allocation5 + $0x944] sm:$0xf] }
 0x156   : > { %3587 = vmatpush.bf16.msra.mxu1 %v6291_v25  ;;  %v6051_v25 = vor.u32 %v8067_v13, %v6048_v15  ;;  %v6531_v37 = vor.u32 %v8187_v22, %v6528_v24  ;;  %v8372_v13 = vld [vmem:[#allocation5 + $0xc3c] sm:$0xf]  ;;  %v7268_v15 = vld [vmem:[#allocation5 + $0xc4c] sm:$0xf0]  ;;  %v6768_v22 = vld [vmem:[#allocation5 + $0x864] sm:$0xf0] }
 0x157   : > { %3601 = vmatpush.bf16.msra.mxu2 %v6451_v27  ;;  %v8062_v27 = vld [vmem:[#allocation5 + $0x28c] sm:$0xf]  ;;  %v8287_v24 = vld [vmem:[#allocation5 + $0x994] sm:$0xf] }
 0x158   : > { %3615 = vmatpush.bf16.msra.mxu3 %v6611_v33  ;;  %v6371_v33 = vor.u32 %v8147_v20, %v6368_v21  ;;  %v6031_v47 = vor.u32 %v8062_v27, %v6028_v29  ;;  %v8247_v21 = vld [vmem:[#allocation5 + $0x854] sm:$0xf]  ;;  %v6928_v27 = vld [vmem:[#allocation5 + $0x9a4] sm:$0xf0] }
 0x159   : > { %3574 = vmatpush.bf16.msra.mxu0 %v6111_v39  ;;  %v8182_v39 = vld [vmem:[#allocation5 + $0x64c] sm:$0xf]  ;;  %v8327_v29 = vld [vmem:[#allocation5 + $0xad4] sm:$0xf] }
 0x15a   : > { %3588 = vmatpush.bf16.msra.mxu1 %v6271_v41  ;;  %v6508_v41 = vld [vmem:[#allocation5 + $0x65c] sm:$0xf0] }
 0x15b   : > { %3602 = vmatpush.bf16.msra.mxu2 %v6431_v42  ;;  %v8257_v42 = vld [vmem:[#allocation5 + $0x8a4] sm:$0xf]  ;;  %v6511_v62 = vor.u32 %v8182_v39, %v6508_v41  ;;  %v6931_v39 = vor.u32 %v8287_v24, %v6928_v27  ;;  %v8272_v24 = vld [vmem:[#allocation5 + $0x91c] sm:$0xf] }
 0x15c   : > { %3616 = vmatpush.bf16.msra.mxu3 %v6591_v49  ;;  %v6968_v49 = vld [vmem:[#allocation5 + $0x9f4] sm:$0xf0]  ;;  %v6811_v63 = vor.u32 %v8257_v42, %v6808_v43  ;;  %v8242_v42 = vld [vmem:[#allocation5 + $0x82c] sm:$0xf]  ;;  %v6748_v43 = vld [vmem:[#allocation5 + $0x83c] sm:$0xf0] }
 0x15d   : > { %3575 = vmatpush.bf16.msra.mxu0 %v6091_v57  ;;  %v6351_v57 = vor.u32 %v8142_v36, %v6348_v38  ;;  %v9336_v36 = vpop.f32.mrf.mxu1  ;;  %v9339_v38 = vpop.f32.mrf.mxu3 }
 0x15e   : > { %3589 = vmatpush.bf16.msra.mxu1 %v6251_v58  ;;  %v8377_v58 = vld [vmem:[#allocation5 + $0xc64] sm:$0xf] }
 0x15f   : > { %3603 = vmatpush.bf16.msra.mxu2 %v6411_v60  ;;  %v7288_v60 = vld [vmem:[#allocation5 + $0xc74] sm:$0xf0] }
 0x160   : > { %3617 = vmatpush.bf16.msra.mxu3 %v6571_v0  ;;  %v6971_v0 = vor.u32 %v8297_v46, %v6968_v49  ;;  %v7291_v7 = vor.u32 %v8377_v58, %v7288_v60  ;;  %v8282_v46 = vld [vmem:[#allocation5 + $0x96c] sm:$0xf]  ;;  %v6908_v49 = vld [vmem:[#allocation5 + $0x97c] sm:$0xf0]  ;;  %v6751_v58 = vor.u32 %v8242_v42, %v6748_v43  ;;  %v8227_v43 = vld [vmem:[#allocation5 + $0x7b4] sm:$0xf] }
 0x161   : > { %3576 = vmatpush.bf16.msra.mxu0 %v6071_v9  ;;  %v6948_v9 = vld [vmem:[#allocation5 + $0x9cc] sm:$0xf0] }
 0x162   : > { %3590 = vmatpush.bf16.msra.mxu1 %v6231_v10  ;;  %v8332_v10 = vld [vmem:[#allocation5 + $0xafc] sm:$0xf]  ;;  %v6951_v19 = vor.u32 %v8292_v6, %v6948_v9  ;;  %v6888_v6 = vld [vmem:[#allocation5 + $0x954] sm:$0xf0] }
 0x163   : > { %3604 = vmatpush.bf16.msra.mxu2 %v6391_v12  ;;  %v7108_v12 = vld [vmem:[#allocation5 + $0xb0c] sm:$0xf0]  ;;  %v7048_v9 = vld [vmem:[#allocation5 + $0xa94] sm:$0xf0] }
 0x164   : > { %3618 = vmatpush.bf16.msra.mxu3 %v6551_v17  ;;  %v9329_v17 = vpop.f32.mrf.mxu2  ;;  %v7111_v20 = vor.u32 %v8332_v10, %v7108_v12  ;;  %v8357_v10 = vld [vmem:[#allocation5 + $0xbc4] sm:$0xf]  ;;  %v7208_v12 = vld [vmem:[#allocation5 + $0xbd4] sm:$0xf0] }
 0x165   : > { %3577 = vmatpush.bf16.msra.mxu0 %v6051_v25  ;;  %v7271_v25 = vor.u32 %v8372_v13, %v7268_v15  ;;  %v7211_v27 = vor.u32 %v8357_v10, %v7208_v12  ;;  %v8302_v10 = vld [vmem:[#allocation5 + $0xa0c] sm:$0xf] }
 0x166   : > { %3591 = vmatpush.bf16.msra.mxu1 %v6211_v31  ;;  %v7088_v31 = vld [vmem:[#allocation5 + $0xae4] sm:$0xf0] }
 0x167   : > { %3605 = vmatpush.bf16.msra.mxu2 %v6371_v33  ;;  %v9332_v33 = vpop.f32.mrf.mxu0  ;;  %v7091_v41 = vor.u32 %v8327_v29, %v7088_v31  ;;  %v6868_v29 = vld [vmem:[#allocation5 + $0x92c] sm:$0xf0]  ;;  %v8312_v31 = vld [vmem:[#allocation5 + $0xa5c] sm:$0xf] }
 0x168   : > { %3619 = vmatpush.bf16.msra.mxu3 %v6531_v37  ;;  %v6771_v37 = vor.u32 %v8247_v21, %v6768_v22  ;;  %v8232_v21 = vld [vmem:[#allocation5 + $0x7dc] sm:$0xf]  ;;  %v6708_v22 = vld [vmem:[#allocation5 + $0x7ec] sm:$0xf0] }
 0x169   : > { %3578 = vmatpush.bf16.msra.mxu0 %v6031_v47  ;;  %v7251_v47 = vor.u32 %v8367_v34, %v7248_v35  ;;  %v7028_v34 = vld [vmem:[#allocation5 + $0xa6c] sm:$0xf0]  ;;  %v8352_v35 = vld [vmem:[#allocation5 + $0xb9c] sm:$0xf] }
 0x16a   : > { %3592 = vmatpush.bf16.msra.mxu1 %v6191_v56  ;;  %v8362_v56 = vld [vmem:[#allocation5 + $0xbec] sm:$0xf]  ;;  %v7031_v42 = vor.u32 %v8312_v31, %v7028_v34  ;;  %v8060_v34 = vld [vmem:[#allocation5 + $0x278] sm:$0xf0] }
 0x16b   : > { %3606 = vmatpush.bf16.msra.mxu2 %v6351_v57  ;;  %v7228_v57 = vld [vmem:[#allocation5 + $0xbfc] sm:$0xf0] }
 0x16c   : > { %3620 = vmatpush.bf16.msra.mxu3 %v6511_v62  ;;  %3579 = vmatmul.bf16.vlgmr.msra.gmra.mxu0 %v9237_v2  ;;  %v9341_v60 = vpop.f32.mrf.mxu2  ;;  %v6911_v62 = vor.u32 %v8282_v46, %v6908_v49  ;;  %v7231_v4 = vor.u32 %v8362_v56, %v7228_v57  ;;  %v6688_v46 = vld [vmem:[#allocation5 + $0x7c4] sm:$0xf0] }
 0x16d   : > { %3627 = vmatpush.bf16.msrb.mxu0 %v6811_v63  ;;  %3593 = vmatmul.bf16.vlgmr.msra.gmra.mxu1 %v9247_v18  ;;  %v7071_v63 = vor.u32 %v8322_v50, %v7068_v51  ;;  %v6848_v50 = vld [vmem:[#allocation5 + $0x904] sm:$0xf0]  ;;  %v8307_v51 = vld [vmem:[#allocation5 + $0xa34] sm:$0xf] }
 0x16e   : > { %3641 = vmatpush.bf16.msrb.mxu1 %v6971_v0  ;;  %3607 = vmatmul.bf16.vlgmr.msra.gmra.mxu2 %v9259_v40  ;;  %v8237_v0 = vld [vmem:[#allocation5 + $0x804] sm:$0xf]  ;;  %v7008_v56 = vld [vmem:[#allocation5 + $0xa44] sm:$0xf0] }
 0x16f   : > { %3655 = vmatpush.bf16.msrb.mxu2 %v7131_v1  ;;  %3621 = vmatmul.bf16.vlgmr.msra.gmra.mxu3 %v9263_v45  ;;  %v6728_v1 = vld [vmem:[#allocation5 + $0x814] sm:$0xf0]  ;;  %v9343_v15 = vpop.f32.mrf.mxu0 }
 0x170   : > { %3669 = vmatpush.bf16.msrb.mxu3 %v7291_v7  ;;  %v8317_v7 = vld [vmem:[#allocation5 + $0xa84] sm:$0xf]  ;;  %v6731_v13 = vor.u32 %v8237_v0, %v6728_v1  ;;  %v8222_v0 = vld [vmem:[#allocation5 + $0x78c] sm:$0xf]  ;;  %v6668_v1 = vld [vmem:[#allocation5 + $0x79c] sm:$0xf0] }
 0x171   : > { %3628 = vmatpush.bf16.msrb.mxu0 %v6791_v16  ;;  %v9345_v16 = vpop.f32.mrf.mxu3  ;;  %v6671_v31 = vor.u32 %v8222_v0, %v6668_v1  ;;  %v6154_v0 = vld [vmem:[#allocation5 + $0x380] sm:$0xf]  ;;  %v8095_v1 = vld [vmem:[#allocation5 + $0x390] sm:$0xf0] }
 0x172   : > { %3642 = vmatpush.bf16.msrb.mxu1 %v6951_v19  ;;  %v6891_v19 = vor.u32 %v8277_v3, %v6888_v6  ;;  %v7011_v6 = vor.u32 %v8307_v51, %v7008_v56  ;;  %v5834_v51 = vld [vmem:[#allocation5 + $0x100] sm:$0xf]  ;;  %v8015_v56 = vld [vmem:[#allocation5 + $0x110] sm:$0xf0] }
 0x173   : > { %3656 = vmatpush.bf16.msrb.mxu2 %v7111_v20  ;;  %v7051_v20 = vor.u32 %v8317_v7, %v7048_v9  ;;  %v8262_v7 = vld [vmem:[#allocation5 + $0x8cc] sm:$0xf]  ;;  %v6828_v9 = vld [vmem:[#allocation5 + $0x8dc] sm:$0xf0] }
 0x174   : > { %3670 = vmatpush.bf16.msrb.mxu3 %v7271_v25  ;;  %v9347_v25 = vpop.f32.mrf.mxu1  ;;  %v9349_v57 = vpop.f32.mrf.mxu2 }
 0x175   : > { %3629 = vmatpush.bf16.msrb.mxu0 %v6771_v37  ;;  %v7188_v37 = vld [vmem:[#allocation5 + $0xbac] sm:$0xf0] }
 0x176   : > { %3643 = vmatpush.bf16.msrb.mxu1 %v6931_v39  ;;  %v6711_v39 = vor.u32 %v8232_v21, %v6708_v22  ;;  %v7191_v49 = vor.u32 %v8352_v35, %v7188_v37  ;;  %v7148_v21 = vld [vmem:[#allocation5 + $0xb5c] sm:$0xf0]  ;;  %v6174_v35 = vld [vmem:[#allocation5 + $0x3a8] sm:$0xf]  ;;  %v8100_v37 = vld [vmem:[#allocation5 + $0x3b8] sm:$0xf0] }
 0x177   : > { %3657 = vmatpush.bf16.msrb.mxu2 %v7091_v41  ;;  %v6871_v41 = vor.u32 %v8272_v24, %v6868_v29  ;;  %v9351_v3 = vpop.f32.mrf.mxu0  ;;  %v5854_v24 = vld [vmem:[#allocation5 + $0x128] sm:$0xf] }
 0x178   : > { %3671 = vmatpush.bf16.msrb.mxu3 %v7251_v47  ;;  %v8267_v47 = vld [vmem:[#allocation5 + $0x8f4] sm:$0xf]  ;;  %v6014_v29 = vld [vmem:[#allocation5 + $0x268] sm:$0xf] }
 0x179   : > { %3630 = vmatpush.bf16.msrb.mxu0 %v6751_v58  ;;  %v8347_v58 = vld [vmem:[#allocation5 + $0xb74] sm:$0xf]  ;;  %v9355_v22 = vpop.f32.mrf.mxu3 }
 0x17a   : > { %3644 = vmatpush.bf16.msrb.mxu1 %v6911_v62  ;;  %v7168_v62 = vld [vmem:[#allocation5 + $0xb84] sm:$0xf0] }
 0x17b   : > { %3658 = vmatpush.bf16.msrb.mxu2 %v7071_v63  ;;  %v6691_v63 = vor.u32 %v8227_v43, %v6688_v46  ;;  %v8140_v43 = vld [vmem:[#allocation5 + $0x4f8] sm:$0xf0] }
 0x17c   : > { %3672 = vmatpush.bf16.msrb.mxu3 %v7231_v4  ;;  %v6851_v4 = vor.u32 %v8267_v47, %v6848_v50  ;;  %v9353_v12 = vpop.f32.mrf.mxu1  ;;  %v6175_v50 = vor.u32 %v8100_v37, %v6174_v35  ;;  %v9357_v23 = vpop.f32.mrf.mxu2  ;;  %v6294_v37 = vld [vmem:[#allocation5 + $0x498] sm:$0xf] }
 0x17d   : > { %3631 = vmatpush.bf16.msrb.mxu0 %v6731_v13  ;;  %v7171_v13 = vor.u32 %v8347_v58, %v7168_v62  ;;  %v5994_v58 = vld [vmem:[#allocation5 + $0x240] sm:$0xf] }
 0x17e   : > { %3645 = vmatpush.bf16.msrb.mxu1 %v6891_v19  ;;  %v6988_v19 = vld [vmem:[#allocation5 + $0xa1c] sm:$0xf0] }
 0x17f   : > { %3659 = vmatpush.bf16.msrb.mxu2 %v7051_v20  ;;  %v8342_v20 = vld [vmem:[#allocation5 + $0xb4c] sm:$0xf] }
 0x180   : > { %3673 = vmatpush.bf16.msrb.mxu3 %v7211_v27  ;;  %v8020_v27 = vld [vmem:[#allocation5 + $0x138] sm:$0xf0]  ;;  %v7151_v46 = vor.u32 %v8342_v20, %v7148_v21  ;;  %v8010_v20 = vld [vmem:[#allocation5 + $0xe8] sm:$0xf0]  ;;  %v5974_v21 = vld [vmem:[#allocation5 + $0x218] sm:$0xf] }
 0x181   : > { %3632 = vmatpush.bf16.msrb.mxu0 %v6711_v39  ;;  %v6831_v39 = vor.u32 %v8262_v7, %v6828_v9  ;;  %v5855_v47 = vor.u32 %v8020_v27, %v5854_v24  ;;  %v5835_v7 = vor.u32 %v8015_v56, %v5834_v51  ;;  %v9359_v9 = vpop.f32.mrf.mxu0  ;;  %v9364_v35 = vpop.f32.mrf.mxu3  ;;  %v5954_v51 = vld [vmem:[#allocation5 + $0x1f0] sm:$0xf] }
 0x182   : > { %3646 = vmatpush.bf16.msrb.mxu1 %v6871_v41  ;;  %v6991_v41 = vor.u32 %v8302_v10, %v6988_v19  ;;  %v5814_v19 = vld [vmem:[#allocation5 + $0xd8] sm:$0xf] }
 0x183   : > { %3660 = vmatpush.bf16.msrb.mxu2 %v7031_v42  ;;  %v6334_v42 = vld [vmem:[#allocation5 + $0x4e8] sm:$0xf] }
 0x184   : > { %3674 = vmatpush.bf16.msrb.mxu3 %v7191_v49  ;;  %v6015_v49 = vor.u32 %v8060_v34, %v6014_v29  ;;  %v6335_v62 = vor.u32 %v8140_v43, %v6334_v42  ;;  %v9361_v24 = vpop.f32.mrf.mxu1  ;;  %v8050_v29 = vld [vmem:[#allocation5 + $0x228] sm:$0xf0]  ;;  %v5815_v43 = vor.u32 %v8010_v20, %v5814_v19 }
 0x185   : > { %3633 = vmatpush.bf16.msrb.mxu0 %v6691_v63  ;;  %v8055_v63 = vld [vmem:[#allocation5 + $0x250] sm:$0xf0]  ;;  %v8090_v34 = vld [vmem:[#allocation5 + $0x368] sm:$0xf0] }
 0x186   : > { %3647 = vmatpush.bf16.msrb.mxu1 %v6851_v4  ;;  %v6314_v4 = vld [vmem:[#allocation5 + $0x4c0] sm:$0xf]  ;;  %v5995_v10 = vor.u32 %v8055_v63, %v5994_v58  ;;  %v8045_v58 = vld [vmem:[#allocation5 + $0x200] sm:$0xf0] }
 0x187   : > { %3661 = vmatpush.bf16.msrb.mxu2 %v7011_v6  ;;  %v8135_v6 = vld [vmem:[#allocation5 + $0x4d0] sm:$0xf0]  ;;  %v8085_v63 = vld [vmem:[#allocation5 + $0x340] sm:$0xf0]  ;;  %v5955_v19 = vor.u32 %v8045_v58, %v5954_v51 }
 0x188   : > { %3675 = vmatpush.bf16.msrb.mxu3 %v7171_v13  ;;  %v6155_v13 = vor.u32 %v8095_v1, %v6154_v0  ;;  %v6315_v27 = vor.u32 %v8135_v6, %v6314_v4  ;;  %v6274_v0 = vld [vmem:[#allocation5 + $0x470] sm:$0xf]  ;;  %v8125_v1 = vld [vmem:[#allocation5 + $0x480] sm:$0xf0]  ;;  %v10591_v4 = vperm.slane %v9287_v14, 0 }
 0x189   : > { %3634 = vmatpush.bf16.msrb.mxu0 %v6671_v31  ;;  %v6134_v31 = vld [vmem:[#allocation5 + $0x358] sm:$0xf]  ;;  %v8080_v14 = vld [vmem:[#allocation5 + $0x318] sm:$0xf0]  ;;  %v9385_v51 = vpop.f32.mrf.mxu3 }
 0x18a   : > { %3648 = vmatpush.bf16.msrb.mxu1 %v6831_v39  ;;  %v8130_v39 = vld [vmem:[#allocation5 + $0x4a8] sm:$0xf0]  ;;  %v3135_v6 = vadd.f32 %v9298_v61, %v10591_v4  ;;  %v6234_v4 = vld [vmem:[#allocation5 + $0x420] sm:$0xf] }
 0x18b   : > { %3662 = vmatpush.bf16.msrb.mxu2 %v6991_v41  ;;  %v9368_v41 = vld [vmem:[#allocation7] sm:$0x1f]  ;;  %v6295_v56 = vor.u32 %v8130_v39, %v6294_v37  ;;  %v6094_v37 = vld [vmem:[#allocation5 + $0x308] sm:$0xf]  ;;  %v9379_v39 = vpop.f32.mrf.mxu0 }
 0x18c   : > { %3676 = vmatpush.bf16.msrb.mxu3 %v7151_v46  ;;  %3635 = vmatmul.bf16.vlgmr.msrb.gmra.mxu0 %v9261_v44  ;;  %v1034_v42 = vperm.slane %v9368_v41, 1  ;;  %v5975_v46 = vor.u32 %v8050_v29, %v5974_v21  ;;  %v5774_v21 = vld [vmem:[#allocation5 + $0x88] sm:$0xf]  ;;  %v6095_v58 = vor.u32 %v8080_v14, %v6094_v37  ;;  %v8030_v37 = vld [vmem:[#allocation5 + $0x188] sm:$0xf0] }
 0x18d   : > { %3683 = vmatpush.bf16.msra.mxu0 %v5855_v47  ;;  %3649 = vmatmul.bf16.vlgmr.msrb.gmra.mxu1 %v9265_v48  ;;  %v6135_v47 = vor.u32 %v8090_v34, %v6134_v31  ;;  %v5934_v29 = vld [vmem:[#allocation5 + $0x1c8] sm:$0xf]  ;;  %v6275_v31 = vor.u32 %v8125_v1, %v6274_v0  ;;  %v8040_v34 = vld [vmem:[#allocation5 + $0x1d8] sm:$0xf0]  ;;  %v8035_v0 = vld [vmem:[#allocation5 + $0x1b0] sm:$0xf0] }
 0x18e   : > { %3697 = vmatpush.bf16.msra.mxu1 %v6015_v49  ;;  %3663 = vmatmul.bf16.vlgmr.msrb.gmra.mxu2 %v9275_v28  ;;  %v5794_v49 = vld [vmem:[#allocation5 + $0xb0] sm:$0xf]  ;;  %v3275_v61 = vadd.f32 %v9349_v57, %v1034_v42  ;;  %v7995_v57 = vld [vmem:[#allocation5 + $0x70] sm:$0xf0]  ;;  %v6074_v1 = vld [vmem:[#allocation5 + $0x2e0] sm:$0xf] }
 0x18f   : > { %3711 = vmatpush.bf16.msra.mxu2 %v6175_v50  ;;  %3677 = vmatmul.bf16.vlgmr.msrb.gmra.mxu3 %v9277_v32  ;;  %v8005_v50 = vld [vmem:[#allocation5 + $0xc0] sm:$0xf0]  ;;  %v6054_v14 = vld [vmem:[#allocation5 + $0x2b8] sm:$0xf] }
 0x190   : > { %3725 = vmatpush.bf16.msra.mxu3 %v6335_v62  ;;  %v6114_v62 = vld [vmem:[#allocation5 + $0x330] sm:$0xf] }
 0x191   : > { %3684 = vmatpush.bf16.msra.mxu0 %v5835_v7  ;;  %v3273_v7 = vadd.f32 %v9341_v60, %v1034_v42  ;;  %v6115_v20 = vor.u32 %v8085_v63, %v6114_v62  ;;  %v6254_v60 = vld [vmem:[#allocation5 + $0x448] sm:$0xf]  ;;  %v5754_v62 = vld [vmem:[#allocation5 + $0x60] sm:$0xf] }
 0x192   : > { %3698 = vmatpush.bf16.msra.mxu1 %v5995_v10  ;;  %v5795_v10 = vor.u32 %v8005_v50, %v5794_v49  ;;  %v3149_v49 = vadd.f32 %v9300_v8, %v3135_v6  ;;  %v5914_v42 = vld [vmem:[#allocation5 + $0x1a0] sm:$0xf]  ;;  %v8075_v8 = vld [vmem:[#allocation5 + $0x2f0] sm:$0xf0] }
 0x193   : > { %3712 = vmatpush.bf16.msra.mxu2 %v6155_v13  ;;  %v9376_v13 = vpop.f32.mrf.mxu2  ;;  %v8115_v6 = vld [vmem:[#allocation5 + $0x430] sm:$0xf0] }
 0x194   : > { %3726 = vmatpush.bf16.msra.mxu3 %v6315_v27  ;;  %v8000_v27 = vld [vmem:[#allocation5 + $0x98] sm:$0xf0] }
 0x195   : > { %3685 = vmatpush.bf16.msra.mxu0 %v5815_v43  ;;  %v8120_v43 = vld [vmem:[#allocation5 + $0x458] sm:$0xf0]  ;;  %v5775_v50 = vor.u32 %v8000_v27, %v5774_v21  ;;  %v6075_v21 = vor.u32 %v8075_v8, %v6074_v1  ;;  %v5734_v27 = vld [vmem:[#allocation5 + $0x38] sm:$0xf]  ;;  %v6194_v8 = vld [vmem:[#allocation5 + $0x3d0] sm:$0xf] }
 0x196   : > { %3699 = vmatpush.bf16.msra.mxu1 %v5975_v46  ;;  %v3287_v46 = vadd.f32 %v9345_v16, %v3273_v7  ;;  %v6255_v63 = vor.u32 %v8120_v43, %v6254_v60  ;;  %v3289_v16 = vadd.f32 %v9355_v22, %v3275_v61  ;;  %v3163_v7 = vadd.f32 %v9317_v53, %v3149_v49  ;;  %v8070_v22 = vld [vmem:[#allocation5 + $0x2c8] sm:$0xf0]  ;;  %v6214_v53 = vld [vmem:[#allocation5 + $0x3f8] sm:$0xf] }
 0x197   : > { %3713 = vmatpush.bf16.msra.mxu2 %v6135_v47  ;;  %v9383_v47 = vpop.f32.mrf.mxu1 }
 0x198   : > { %3727 = vmatpush.bf16.msra.mxu3 %v6295_v56  ;;  %v5935_v56 = vor.u32 %v8040_v34, %v5934_v29  ;;  %v7990_v29 = vld [vmem:[#allocation5 + $0x48] sm:$0xf0]  ;;  %v6235_v34 = vor.u32 %v8115_v6, %v6234_v4  ;;  %v3303_v61 = vadd.f32 %v9359_v9, %v3289_v16  ;;  %v3177_v43 = vadd.f32 %v9319_v5, %v3163_v7  ;;  %v8025_v9 = vld [vmem:[#allocation5 + $0x160] sm:$0xf0]  ;;  %v9401_v6 = vpop.f32.mrf.mxu3  ;;  %v6494_v7 = vld [vmem:[#allocation5 + $0x628] sm:$0xf] }
 0x199   : > { %3686 = vmatpush.bf16.msra.mxu0 %v5795_v10  ;;  %v3301_v10 = vadd.f32 %v9351_v3, %v3287_v46  ;;  %v8110_v3 = vld [vmem:[#allocation5 + $0x408] sm:$0xf0]  ;;  %v5735_v46 = vor.u32 %v7990_v29, %v5734_v27  ;;  %v8105_v16 = vld [vmem:[#allocation5 + $0x3e0] sm:$0xf0]  ;;  %v8220_v27 = vld [vmem:[#allocation5 + $0x778] sm:$0xf0] }
 0x19a   : > { %3700 = vmatpush.bf16.msra.mxu1 %v5955_v19  ;;  %v5755_v19 = vor.u32 %v7995_v57, %v5754_v62  ;;  %v6055_v57 = vor.u32 %v8070_v22, %v6054_v14  ;;  %v6215_v5 = vor.u32 %v8110_v3, %v6214_v53  ;;  %v3317_v4 = vadd.f32 %v9361_v24, %v3303_v61  ;;  %v8260_v29 = vld [vmem:[#allocation5 + $0x8b8] sm:$0xf0] }
 0x19b   : > { %3714 = vmatpush.bf16.msra.mxu2 %v6115_v20  ;;  %v5915_v20 = vor.u32 %v8035_v0, %v5914_v42  ;;  %v9391_v60 = vpop.f32.mrf.mxu2  ;;  %v3315_v49 = vadd.f32 %v9353_v12, %v3301_v10  ;;  %v5874_v42 = vld [vmem:[#allocation5 + $0x150] sm:$0xf]  ;;  %v3191_v0 = vadd.f32 %v9323_v52, %v3177_v43  ;;  %v8065_v12 = vld [vmem:[#allocation5 + $0x2a0] sm:$0xf0]  ;;  %v8180_v10 = vld [vmem:[#allocation5 + $0x638] sm:$0xf0]  ;;  %v3217_v24 = vadd.f32 %v9321_v30, %v9307_v54 }
 0x19c   : > { %3728 = vmatpush.bf16.msra.mxu3 %v6275_v31  ;;  %v5894_v31 = vld [vmem:[#allocation5 + $0x178] sm:$0xf]  ;;  %v6814_v52 = vld [vmem:[#allocation5 + $0x8a8] sm:$0xf]  ;;  %v8300_v14 = vld [vmem:[#allocation5 + $0x9f8] sm:$0xf0]  ;;  %v6195_v61 = vor.u32 %v8105_v16, %v6194_v8  ;;  %v6495_v53 = vor.u32 %v8180_v10, %v6494_v7 }
 0x19d   : > { %3687 = vmatpush.bf16.msra.mxu0 %v5775_v50  ;;  %v5714_v50 = vld [vmem:[#allocation5 + $0x10] sm:$0xf]  ;;  %v5895_v62 = vor.u32 %v8030_v37, %v5894_v31  ;;  %v5875_v31 = vor.u32 %v8025_v9, %v5874_v42  ;;  %v6974_v37 = vld [vmem:[#allocation5 + $0x9e8] sm:$0xf]  ;;  %v3205_v22 = vadd.f32 %v9327_v26, %v3191_v0  ;;  %v6815_v43 = vor.u32 %v8260_v29, %v6814_v52  ;;  %v8215_v42 = vld [vmem:[#allocation5 + $0x750] sm:$0xf0] }
 0x19e   : > { %3701 = vmatpush.bf16.msra.mxu1 %v5935_v56  ;;  %v7985_v56 = vld [vmem:[#allocation5 + $0x20] sm:$0xf0]  ;;  %v6794_v54 = vld [vmem:[#allocation5 + $0x880] sm:$0xf]  ;;  %v8255_v30 = vld [vmem:[#allocation5 + $0x890] sm:$0xf0]  ;;  %v3231_v0 = vadd.f32 %v9325_v55, %v3217_v24 }
 0x19f   : > { %3715 = vmatpush.bf16.msra.mxu2 %v6095_v58  ;;  %v9395_v58 = vpop.f32.mrf.mxu0  ;;  %v9398_v1 = vpop.f32.mrf.mxu1  ;;  %v6795_v8 = vor.u32 %v8255_v30, %v6794_v54  ;;  %v6454_v16 = vld [vmem:[#allocation5 + $0x5d8] sm:$0xf]  ;;  %v8200_v30 = vld [vmem:[#allocation5 + $0x6d8] sm:$0xf0] }
 0x1a0   : > { %3729 = vmatpush.bf16.msra.mxu3 %v6255_v63  ;;  %v6034_v63 = vld [vmem:[#allocation5 + $0x290] sm:$0xf]  ;;  %v6614_v7 = vld [vmem:[#allocation5 + $0x718] sm:$0xf]  ;;  %v3400_v29 = vpop.f32.mrf.mxu3 }
 0x1a1   : > { %3688 = vmatpush.bf16.msra.mxu0 %v5755_v19  ;;  %v6654_v19 = vld [vmem:[#allocation5 + $0x768] sm:$0xf] }
 0x1a2   : > { %3702 = vmatpush.bf16.msra.mxu1 %v5915_v20  ;;  %v3329_v20 = vadd.f32 %v9357_v23, %v3315_v49  ;;  %v3331_v23 = vadd.f32 %v9376_v13, %v3317_v4  ;;  %v6655_v3 = vor.u32 %v8220_v27, %v6654_v19  ;;  %v6474_v49 = vld [vmem:[#allocation5 + $0x600] sm:$0xf]  ;;  %v8170_v4 = vld [vmem:[#allocation5 + $0x5e8] sm:$0xf0] }
 0x1a3   : > { %3716 = vmatpush.bf16.msra.mxu2 %v6075_v21  ;;  %v5715_v21 = vor.u32 %v7985_v56, %v5714_v50  ;;  %v6634_v50 = vld [vmem:[#allocation5 + $0x740] sm:$0xf]  ;;  %v3219_v56 = vadd.f32 %v9329_v17, %v3205_v22  ;;  %v3386_v26 = vpop.f32.mrf.mxu2  ;;  %v8250_v27 = vld [vmem:[#allocation5 + $0x868] sm:$0xf0] }
 0x1a4   : > { %3730 = vmatpush.bf16.msra.mxu3 %v6235_v34  ;;  %v6035_v34 = vor.u32 %v8065_v12, %v6034_v63  ;;  %v6954_v13 = vld [vmem:[#allocation5 + $0x9c0] sm:$0xf]  ;;  %v8295_v63 = vld [vmem:[#allocation5 + $0x9d0] sm:$0xf0]  ;;  %v6635_v12 = vor.u32 %v8215_v42, %v6634_v50 }
 0x1a5   : > { %3689 = vmatpush.bf16.msra.mxu0 %v5735_v46  ;;  %v8175_v46 = vld [vmem:[#allocation5 + $0x610] sm:$0xf0]  ;;  %v3233_v10 = vadd.f32 %v9339_v38, %v3219_v56  ;;  %v6955_v55 = vor.u32 %v8295_v63, %v6954_v13  ;;  %v6734_v13 = vld [vmem:[#allocation5 + $0x808] sm:$0xf]  ;;  %v8240_v63 = vld [vmem:[#allocation5 + $0x818] sm:$0xf0] }
 0x1a6   : > { %3703 = vmatpush.bf16.msra.mxu1 %v5895_v62  ;;  %v3343_v62 = vadd.f32 %v9364_v35, %v3329_v20  ;;  %v6475_v17 = vor.u32 %v8175_v46, %v6474_v49  ;;  %v3345_v35 = vadd.f32 %v9385_v51, %v3331_v23  ;;  %v8210_v20 = vld [vmem:[#allocation5 + $0x728] sm:$0xf0]  ;;  %v3245_v51 = vadd.f32 %v9332_v33, %v3231_v0  ;;  %v6434_v33 = vld [vmem:[#allocation5 + $0x5b0] sm:$0xf] }
 0x1a7   : > { %3717 = vmatpush.bf16.msra.mxu2 %v6055_v57  ;;  %v6975_v57 = vor.u32 %v8300_v14, %v6974_v37  ;;  %v9410_v9 = vpop.f32.mrf.mxu0  ;;  %v3247_v38 = vadd.f32 %v9343_v15, %v3233_v10  ;;  %v8165_v14 = vld [vmem:[#allocation5 + $0x5c0] sm:$0xf0]  ;;  %v6914_v23 = vld [vmem:[#allocation5 + $0x970] sm:$0xf]  ;;  %v1035_v49 = vperm.slane %v9368_v41, 2 }
 0x1a8   : > { %3731 = vmatpush.bf16.msra.mxu3 %v6215_v5  ;;  %v9413_v5 = vpop.f32.mrf.mxu1  ;;  %v3357_v19 = vadd.f32 %v9379_v39, %v3343_v62  ;;  %v3359_v52 = vadd.f32 %v9395_v58, %v3345_v35  ;;  %v6455_v39 = vor.u32 %v8170_v4, %v6454_v16  ;;  %v6594_v58 = vld [vmem:[#allocation5 + $0x6f0] sm:$0xf]  ;;  %v9427_v15 = vadd.f32 %v9336_v36, %v3245_v51  ;;  %v6414_v62 = vld [vmem:[#allocation5 + $0x588] sm:$0xf]  ;;  %v9443_v0 = vpop.f32.mrf.mxu3  ;;  %v8280_v35 = vld [vmem:[#allocation5 + $0x958] sm:$0xf0] }
 0x1a9   : > { %3690 = vmatpush.bf16.msra.mxu0 %v5715_v21  ;;  %v6774_v21 = vld [vmem:[#allocation5 + $0x858] sm:$0xf]  ;;  %v6394_v10 = vld [vmem:[#allocation5 + $0x560] sm:$0xf] }
 0x1aa   : > { %3704 = vmatpush.bf16.msra.mxu1 %v5875_v31  ;;  %v6934_v31 = vld [vmem:[#allocation5 + $0x998] sm:$0xf]  ;;  %v6775_v37 = vor.u32 %v8250_v27, %v6774_v21  ;;  %v3371_v24 = vadd.f32 %v9383_v47, %v3357_v19  ;;  %v6435_v47 = vor.u32 %v8165_v14, %v6434_v33  ;;  %v8155_v19 = vld [vmem:[#allocation5 + $0x570] sm:$0xf0]  ;;  %v6714_v51 = vld [vmem:[#allocation5 + $0x7e0] sm:$0xf] }
 0x1ab   : > { %3718 = vmatpush.bf16.msra.mxu2 %v6035_v34  ;;  %v8290_v34 = vld [vmem:[#allocation5 + $0x9a8] sm:$0xf0]  ;;  %v8195_v27 = vld [vmem:[#allocation5 + $0x6b0] sm:$0xf0]  ;;  %v6374_v14 = vld [vmem:[#allocation5 + $0x538] sm:$0xf] }
 0x1ac   : > { %3732 = vmatpush.bf16.msra.mxu3 %v6195_v61  ;;  %3691 = vmatmul.bf16.vlgmr.msra.gmra.mxu0 %v9234_v59  ;;  %v6615_v59 = vor.u32 %v8210_v20, %v6614_v7  ;;  %v6935_v22 = vor.u32 %v8290_v34, %v6934_v31  ;;  %v6754_v61 = vld [vmem:[#allocation5 + $0x830] sm:$0xf]  ;;  %v3385_v42 = vadd.f32 %v9391_v60, %v3371_v24  ;;  %v6874_v31 = vld [vmem:[#allocation5 + $0x920] sm:$0xf]  ;;  %v6534_v24 = vld [vmem:[#allocation5 + $0x678] sm:$0xf] }
 0x1ad   : > { %3739 = vmatpush.bf16.msrb.mxu0 %v6495_v53  ;;  %3705 = vmatmul.bf16.vlgmr.msra.gmra.mxu1 %v9244_v11  ;;  %v8245_v11 = vld [vmem:[#allocation5 + $0x840] sm:$0xf0]  ;;  %v3373_v53 = vadd.f32 %v9398_v1, %v3359_v52  ;;  %v8160_v1 = vld [vmem:[#allocation5 + $0x598] sm:$0xf0]  ;;  %v3413_v60 = vadd.f32 %v9410_v9, %v1035_v49  ;;  %v6735_v7 = vor.u32 %v8240_v63, %v6734_v13  ;;  %v8235_v52 = vld [vmem:[#allocation5 + $0x7f0] sm:$0xf0] }
 0x1ae   : > { %3753 = vmatpush.bf16.msrb.mxu1 %v6655_v3  ;;  %3719 = vmatmul.bf16.vlgmr.msra.gmra.mxu2 %v9237_v2  ;;  %v8205_v2 = vld [vmem:[#allocation5 + $0x700] sm:$0xf0]  ;;  %v6755_v56 = vor.u32 %v8245_v11, %v6754_v61  ;;  %v9453_v20 = vadd.f32 %v9401_v6, %v3385_v42  ;;  %v6715_v33 = vor.u32 %v8235_v52, %v6714_v51  ;;  %v6694_v61 = vld [vmem:[#allocation5 + $0x7b8] sm:$0xf]  ;;  %v8230_v11 = vld [vmem:[#allocation5 + $0x7c8] sm:$0xf0] }
 0x1af   : > { %3767 = vmatpush.bf16.msrb.mxu2 %v6815_v43  ;;  %3733 = vmatmul.bf16.vlgmr.msra.gmra.mxu3 %v9247_v18  ;;  %v9430_v18 = vpop.f32.mrf.mxu2  ;;  %v8285_v3 = vld [vmem:[#allocation5 + $0x980] sm:$0xf0]  ;;  %v9433_v43 = vadd.f32 %v9347_v25, %v3247_v38  ;;  %v3387_v46 = vadd.f32 %v3386_v26, %v3373_v53  ;;  %v9436_v50 = vpop.f32.mrf.mxu0  ;;  %v6595_v36 = vor.u32 %v8205_v2, %v6594_v58  ;;  %v8150_v58 = vld [vmem:[#allocation5 + $0x548] sm:$0xf0] }
 0x1b0   : > { %3781 = vmatpush.bf16.msrb.mxu3 %v6975_v57  ;;  %v6574_v57 = vld [vmem:[#allocation5 + $0x6c8] sm:$0xf]  ;;  %v9439_v54 = vpop.f32.mrf.mxu1  ;;  %v6915_v25 = vor.u32 %v8285_v3, %v6914_v23  ;;  %v3823_v26 = vmul.f32 %v9427_v15, %v9427_v15  ;;  %v3427_v38 = vadd.f32 %v9413_v5, %v3413_v60  ;;  %v8190_v5 = vld [vmem:[#allocation5 + $0x688] sm:$0xf0]  ;;  %v6854_v3 = vld [vmem:[#allocation5 + $0x8f8] sm:$0xf]  ;;  %v6695_v63 = vor.u32 %v8230_v11, %v6694_v61 }
 0x1b1   : > { %3740 = vmatpush.bf16.msrb.mxu0 %v6475_v17  ;;  %v6894_v17 = vld [vmem:[#allocation5 + $0x948] sm:$0xf]  ;;  %v9450_v16 = vadd.f32 %v3400_v29, %v3387_v46  ;;  %v6575_v4 = vor.u32 %v8200_v30, %v6574_v57  ;;  %v8275_v29 = vld [vmem:[#allocation5 + $0x930] sm:$0xf0]  ;;  %v6354_v57 = vld [vmem:[#allocation5 + $0x510] sm:$0xf]  ;;  %v9471_v30 = vpop.f32.mrf.mxu3  ;;  %v6535_v13 = vor.u32 %v8190_v5, %v6534_v24 }
 0x1b2   : > { %3754 = vmatpush.bf16.msrb.mxu1 %v6635_v12  ;;  %v3828_v12 = vmul.f32 %v9433_v43, %v9433_v43  ;;  %v6895_v21 = vor.u32 %v8280_v35, %v6894_v17  ;;  %v3833_v9 = vmul.f32 %v3823_v26, %v9427_v15  ;;  %v6875_v2 = vor.u32 %v8275_v29, %v6874_v31  ;;  %v8145_v42 = vld [vmem:[#allocation5 + $0x520] sm:$0xf0]  ;;  %v6514_v26 = vld [vmem:[#allocation5 + $0x650] sm:$0xf]  ;;  %v7134_v60 = vld [vmem:[#allocation5 + $0xb28] sm:$0xf] }
 0x1b3   : > { %3768 = vmatpush.bf16.msrb.mxu2 %v6795_v8  ;;  %v6415_v8 = vor.u32 %v8160_v1, %v6414_v62  ;;  %v6375_v1 = vor.u32 %v8150_v58, %v6374_v14  ;;  %v6674_v17 = vld [vmem:[#allocation5 + $0x790] sm:$0xf]  ;;  %v7114_v14 = vld [vmem:[#allocation5 + $0xb00] sm:$0xf]  ;;  %v8335_v58 = vld [vmem:[#allocation5 + $0xb10] sm:$0xf0] }
 0x1b4   : > { %3782 = vmatpush.bf16.msrb.mxu3 %v6955_v55  ;;  %v6554_v55 = vld [vmem:[#allocation5 + $0x6a0] sm:$0xf]  ;;  %v3838_v34 = vmul.f32 %v3828_v12, %v9433_v43  ;;  %v3843_v53 = vmul.f32 0.044715, %v3833_v9  ;;  %v6834_v35 = vld [vmem:[#allocation5 + $0x8d0] sm:$0xf] }
 0x1b5   : > { %3741 = vmatpush.bf16.msrb.mxu0 %v6455_v39  ;;  %v6395_v39 = vor.u32 %v8155_v19, %v6394_v10  ;;  %v8265_v12 = vld [vmem:[#allocation5 + $0x8e0] sm:$0xf0]  ;;  %v6355_v19 = vor.u32 %v8145_v42, %v6354_v57  ;;  %v8427_v31 = vld [vmem:[%s10569_s3 + $0x170] sm:$0xf0]  ;;  %v7274_v24 = vld [vmem:[#allocation5 + $0xc40] sm:$0xf]  ;;  %v7115_v57 = vor.u32 %v8335_v58, %v7114_v14 }
 0x1b6   : > { %3755 = vmatpush.bf16.msrb.mxu1 %v6615_v59  ;;  %v3829_v59 = vmul.f32 %v9450_v16, %v9450_v16  ;;  %v3848_v46 = vmul.f32 0.044715, %v3838_v34  ;;  %v3853_v51 = vadd.f32 %v3843_v53, %v9427_v15  ;;  %v8375_v61 = vld [vmem:[#allocation5 + $0xc50] sm:$0xf0]  ;;  %v7370_v11 = vld [vmem:[%s10569_s3 + $0x90] sm:$0xf] }
 0x1b7   : > { %3769 = vmatpush.bf16.msrb.mxu2 %v6775_v37  ;;  %v9460_v6 = vpop.f32.mrf.mxu2  ;;  %v6555_v37 = vor.u32 %v8195_v27, %v6554_v55  ;;  %v3468_v23 = vpop.f32.mrf.mxu0  ;;  %v8380_v55 = vld [vmem:[#allocation5 + $0xc78] sm:$0xf0]  ;;  %v8403_v27 = vld [vmem:[%s10569_s3 + $0xb0] sm:$0xf0] }
 0x1b8   : > { %3783 = vmatpush.bf16.msrb.mxu3 %v6935_v22  ;;  %v3824_v22 = vmul.f32 %v9453_v20, %v9453_v20  ;;  %v9468_v62 = vpop.f32.mrf.mxu1  ;;  %v3858_v29 = vadd.f32 %v3848_v46, %v9433_v43  ;;  %v8400_v53 = vld [vmem:[%s10569_s3 + $0x98] sm:$0xf0]  ;;  %v3863_v46 = vmul.f32 0.7978846, %v3853_v51  ;;  %v7346_v51 = vld [vmem:[%s10569_s3 + $0x60] sm:$0xf] }
 0x1b9   : > { %3742 = vmatpush.bf16.msrb.mxu0 %v6435_v47  ;;  %v8270_v47 = vld [vmem:[#allocation5 + $0x908] sm:$0xf0]  ;;  %v3510_v42 = vpop.f32.mrf.mxu3 }
 0x1ba   : > { %3756 = vmatpush.bf16.msrb.mxu1 %v6595_v36  ;;  %v3441_v36 = vadd.f32 %v9430_v18, %v3427_v38  ;;  %v8185_v18 = vld [vmem:[#allocation5 + $0x660] sm:$0xf0]  ;;  %v3834_v41 = vmul.f32 %v3824_v22, %v9453_v20  ;;  %v6835_v38 = vor.u32 %v8265_v12, %v6834_v35  ;;  %v7358_v35 = vld [vmem:[%s10569_s3 + $0x78] sm:$0xf]  ;;  %8672 = vtanh.f32 %v3863_v46 }
 0x1bb   : > { %3770 = vmatpush.bf16.msrb.mxu2 %v6755_v56  ;;  %v3415_v56 = vadd.f32 %v9436_v50, %v1035_v49  ;;  %v6855_v49 = vor.u32 %v8270_v47, %v6854_v3  ;;  %v8225_v50 = vld [vmem:[#allocation5 + $0x7a0] sm:$0xf0]  ;;  %v6515_v9 = vor.u32 %v8185_v18, %v6514_v26  ;;  %v8330_v26 = vld [vmem:[#allocation5 + $0xae8] sm:$0xf0]  ;;  %v7254_v18 = vld [vmem:[#allocation5 + $0xc18] sm:$0xf] }
 0x1bc   : > { %3784 = vmatpush.bf16.msrb.mxu3 %v6915_v25  ;;  %v3839_v25 = vmul.f32 %v3829_v59, %v9450_v16  ;;  %v3844_v34 = vmul.f32 0.044715, %v3834_v41  ;;  %v8397_v12 = vld [vmem:[%s10569_s3 + $0x80] sm:$0xf0] }
 0x1bd   : > { %3743 = vmatpush.bf16.msrb.mxu0 %v6415_v8  ;;  %v8340_v8 = vld [vmem:[#allocation5 + $0xb38] sm:$0xf0]  ;;  %v3429_v10 = vadd.f32 %v9439_v54, %v3415_v56  ;;  %v7478_v54 = vld [vmem:[%s10569_s3 + $0x168] sm:$0xf] }
 0x1be   : > { %3757 = vmatpush.bf16.msrb.mxu1 %v6575_v4  ;;  %v7294_v4 = vld [vmem:[#allocation5 + $0xc68] sm:$0xf]  ;;  %v3849_v52 = vmul.f32 0.044715, %v3839_v25  ;;  %v7479_v5 = vor.u32 %v8427_v31, %v7478_v54  ;;  %v3854_v56 = vadd.f32 %v3844_v34, %v9453_v20  ;;  %v7275_v25 = vor.u32 %v8375_v61, %v7274_v24 }
 0x1bf   : > { %3771 = vmatpush.bf16.msrb.mxu2 %v6735_v7  ;;  %v3455_v7 = vadd.f32 %v9443_v0, %v3441_v36  ;;  %v6675_v0 = vor.u32 %v8225_v50, %v6674_v17  ;;  %v3496_v59 = vpop.f32.mrf.mxu2  ;;  %v3443_v22 = vadd.f32 %v9460_v6, %v3429_v10  ;;  %v3470_v47 = vpop.f32.mrf.mxu0  ;;  %v7466_v6 = vld [vmem:[%s10569_s3 + $0x150] sm:$0xf]  ;;  %v3868_v36 = vmul.f32 0.7978846, %v3858_v29  ;;  %v8325_v10 = vld [vmem:[#allocation5 + $0xac0] sm:$0xf0] }
 0x1c0   : > { %3785 = vmatpush.bf16.msrb.mxu3 %v6895_v21  ;;  %v7382_v21 = vld [vmem:[%s10569_s3 + $0xa8] sm:$0xf]  ;;  %v3859_v3 = vadd.f32 %v3849_v52, %v9450_v16  ;;  %v8370_v50 = vld [vmem:[#allocation5 + $0xc28] sm:$0xf0]  ;;  %v8673_v61 = vpop.eup %8672 }
 0x1c1   : > { %3744 = vmatpush.bf16.msrb.mxu0 %v6395_v39  ;;  %v7135_v39 = vor.u32 %v8340_v8, %v7134_v60  ;;  %v3457_v17 = vadd.f32 %v9471_v30, %v3443_v22  ;;  %v3864_v30 = vmul.f32 0.7978846, %v3854_v56  ;;  %8674 = vtanh.f32 %v3868_v36  ;;  %v8418_v54 = vld [vmem:[%s10569_s3 + $0x128] sm:$0xf0]  ;;  %v8360_v22 = vld [vmem:[#allocation5 + $0xbd8] sm:$0xf0] }
 0x1c2   : > { %3758 = vmatpush.bf16.msrb.mxu1 %v6555_v37  ;;  %v7295_v37 = vor.u32 %v8380_v55, %v7294_v4  ;;  %v3869_v60 = vmul.f32 0.7978846, %v3859_v3  ;;  %v8415_v3 = vld [vmem:[%s10569_s3 + $0x110] sm:$0xf0] }
 0x1c3   : > { %3772 = vmatpush.bf16.msrb.mxu2 %v6715_v33  ;;  %v7383_v33 = vor.u32 %v8403_v27, %v7382_v21  ;;  %v3471_v8 = vadd.f32 %v3470_v47, %v3457_v17  ;;  %v8365_v27 = vld [vmem:[#allocation5 + $0xc00] sm:$0xf0]  ;;  %v3883_v17 = vadd.f32 1.0, %v8673_v61  ;;  %v8406_v61 = vld [vmem:[%s10569_s3 + $0xc8] sm:$0xf0] }
 0x1c4   : > { %3786 = vmatpush.bf16.msrb.mxu3 %v6875_v2  ;;  %v3469_v2 = vadd.f32 %v3468_v23, %v3455_v7  ;;  %v8424_v23 = vld [vmem:[%s10569_s3 + $0x158] sm:$0xf0]  ;;  %v7359_v7 = vor.u32 %v8397_v12, %v7358_v35  ;;  %8676 = vtanh.f32 %v3869_v60 }
 0x1c5   : > { %3745 = vmatpush.bf16.msrb.mxu0 %v6375_v1  ;;  %v3484_v1 = vpop.f32.mrf.mxu1  ;;  %8678 = vtanh.f32 %v3864_v30  ;;  %v8412_v35 = vld [vmem:[%s10569_s3 + $0xf8] sm:$0xf0] }
 0x1c6   : > { %3759 = vmatpush.bf16.msrb.mxu1 %v6535_v13  ;;  %v7371_v13 = vor.u32 %v8400_v53, %v7370_v11  ;;  %v3483_v41 = vadd.f32 %v9468_v62, %v3469_v2  ;;  %v7454_v62 = vld [vmem:[%s10569_s3 + $0x138] sm:$0xf]  ;;  %v3485_v31 = vadd.f32 %v3484_v1, %v3471_v8  ;;  %v7334_v2 = vld [vmem:[%s10569_s3 + $0x48] sm:$0xf]  ;;  %v3512_v11 = vpop.f32.mrf.mxu3  ;;  %v7034_v1 = vld [vmem:[#allocation5 + $0xa60] sm:$0xf] }
 0x1c7   : > { %3773 = vmatpush.bf16.msrb.mxu2 %v6695_v63  ;;  %v7094_v63 = vld [vmem:[#allocation5 + $0xad8] sm:$0xf]  ;;  %v3498_v52 = vpop.f32.mrf.mxu2  ;;  %v7430_v53 = vld [vmem:[%s10569_s3 + $0x108] sm:$0xf]  ;;  %v8675_v47 = vpop.eup %8674 }
 0x1c8   : > { %3787 = vmatpush.bf16.msrb.mxu3 %v6855_v49  ;;  %v7467_v49 = vor.u32 %v8424_v23, %v7466_v6  ;;  %v7095_v4 = vor.u32 %v8330_v26, %v7094_v63  ;;  %v3497_v55 = vadd.f32 %v3496_v59, %v3483_v41  ;;  %v7054_v59 = vld [vmem:[#allocation5 + $0xa88] sm:$0xf]  ;;  %v3499_v58 = vadd.f32 %v3498_v52, %v3485_v31  ;;  %v8355_v63 = vld [vmem:[#allocation5 + $0xbb0] sm:$0xf0]  ;;  %v7322_v26 = vld [vmem:[%s10569_s3 + $0x30] sm:$0xf] }
 0x1c9   : > { %3746 = vmatpush.bf16.msrb.mxu0 %v6355_v19  ;;  %v7234_v19 = vld [vmem:[#allocation5 + $0xbf0] sm:$0xf]  ;;  %v3888_v41 = vadd.f32 1.0, %v8675_v47 }
 0x1ca   : > { %3760 = vmatpush.bf16.msrb.mxu1 %v6515_v9  ;;  %v3524_v9 = vpop.f32.mrf.mxu0  ;;  %v3511_v14 = vadd.f32 %v3510_v42, %v3497_v55  ;;  %v8677_v46 = vpop.eup %8676  ;;  %v7194_v42 = vld [vmem:[#allocation5 + $0xba0] sm:$0xf] }
 0x1cb   : > { %3774 = vmatpush.bf16.msrb.mxu2 %v6675_v0  ;;  %v7442_v0 = vld [vmem:[%s10569_s3 + $0x120] sm:$0xf]  ;;  %v8679_v12 = vpop.eup %8678  ;;  %v3889_v60 = vadd.f32 1.0, %v8677_v46  ;;  %v7384_v46 = vld [vmem:[%s10569_s3 + $0xb4] sm:$0xf0] }
 0x1cc   : > { %3788 = vmatpush.bf16.msrb.mxu3 %v6835_v38  ;;  %3747 = vmatmul.bf16.vlgmr.msrb.gmra.mxu0 %v9259_v40  ;;  %v8421_v40 = vld [vmem:[%s10569_s3 + $0x140] sm:$0xf0]  ;;  %v7235_v38 = vor.u32 %v8365_v27, %v7234_v19  ;;  %v7443_v24 = vor.u32 %v8418_v54, %v7442_v0  ;;  %v3525_v6 = vadd.f32 %v3524_v9, %v3511_v14  ;;  %v7310_v27 = vld [vmem:[%s10569_s3 + $0x18] sm:$0xf]  ;;  %v3884_v52 = vadd.f32 1.0, %v8679_v12 }
 0x1cd   : > { %3795 = vmatpush.bf16.msra.mxu0 %v7135_v39  ;;  %3761 = vmatmul.bf16.vlgmr.msrb.gmra.mxu1 %v9263_v45  ;;  %v7074_v45 = vld [vmem:[#allocation5 + $0xab0] sm:$0xf]  ;;  %v7455_v21 = vor.u32 %v8421_v40, %v7454_v62  ;;  %v3538_v34 = vpop.f32.mrf.mxu1  ;;  %v7406_v9 = vld [vmem:[%s10569_s3 + $0xd8] sm:$0xf]  ;;  %v8409_v0 = vld [vmem:[%s10569_s3 + $0xe0] sm:$0xf0] }
 0x1ce   : > { %3809 = vmatpush.bf16.msra.mxu1 %v7295_v37  ;;  %3775 = vmatmul.bf16.vlgmr.msrb.gmra.mxu2 %v9261_v44  ;;  %v7255_v44 = vor.u32 %v8370_v50, %v7254_v18  ;;  %v7075_v29 = vor.u32 %v8325_v10, %v7074_v45  ;;  %v8320_v37 = vld [vmem:[#allocation5 + $0xa98] sm:$0xf0]  ;;  %v7418_v50 = vld [vmem:[%s10569_s3 + $0xf0] sm:$0xf]  ;;  %v9559_v62 = vadd.f32 %v3538_v34, %v3525_v6  ;;  %v7174_v10 = vld [vmem:[#allocation5 + $0xb78] sm:$0xf] }
 0x1cf   : > { %4726 = vmatpush.bf16.msra.mxu2 %v7383_v33  ;;  %3789 = vmatmul.bf16.vlgmr.msrb.gmra.mxu3 %v9265_v48  ;;  %v8394_v48 = vld [vmem:[%s10569_s3 + $0x68] sm:$0xf0]  ;;  %v7055_v23 = vor.u32 %v8320_v37, %v7054_v59  ;;  %v8388_v18 = vld [vmem:[%s10569_s3 + $0x38] sm:$0xf0]  ;;  %v7419_v19 = vor.u32 %v8412_v35, %v7418_v50  ;;  %v3899_v54 = vmul.f32 0.5, %v3889_v60 }
 0x1d0   : > { %4740 = vmatpush.bf16.msra.mxu3 %v7479_v5  ;;  %v7347_v39 = vor.u32 %v8394_v48, %v7346_v51  ;;  %v7214_v33 = vld [vmem:[#allocation5 + $0xbc8] sm:$0xf]  ;;  %v8391_v5 = vld [vmem:[%s10569_s3 + $0x50] sm:$0xf0]  ;;  %v8310_v45 = vld [vmem:[#allocation5 + $0xa48] sm:$0xf0]  ;;  %v3825_v31 = vmul.f32 %v9559_v62, %v9559_v62 }
 0x1d1   : > { %3796 = vmatpush.bf16.msra.mxu0 %v7115_v57  ;;  %v7215_v36 = vor.u32 %v8360_v22, %v7214_v33  ;;  %v7335_v56 = vor.u32 %v8391_v5, %v7334_v2  ;;  %v8315_v57 = vld [vmem:[#allocation5 + $0xa70] sm:$0xf0]  ;;  %v8385_v51 = vld [vmem:[%s10569_s3 + $0x20] sm:$0xf0]  ;;  %v3898_v48 = vmul.f32 0.5, %v3888_v41 }
 0x1d2   : > { %3810 = vmatpush.bf16.msra.mxu1 %v7275_v25  ;;  %v3513_v25 = vadd.f32 %v3512_v11, %v3499_v58  ;;  %v7035_v30 = vor.u32 %v8315_v57, %v7034_v1  ;;  %v7311_v59 = vor.u32 %v8385_v51, %v7310_v27  ;;  %v8305_v37 = vld [vmem:[#allocation5 + $0xa20] sm:$0xf0]  ;;  %v7154_v33 = vld [vmem:[#allocation5 + $0xb50] sm:$0xf]  ;;  %v7298_v22 = vld [vmem:[%s10569_s3] sm:$0xf]  ;;  %v3835_v47 = vmul.f32 %v3825_v31, %v9559_v62  ;;  %v3566_v31 = vpop.f32.mrf.mxu3 }
 0x1d3   : > { %4727 = vmatpush.bf16.msra.mxu2 %v7371_v13  ;;  %v7431_v13 = vor.u32 %v8415_v3, %v7430_v53  ;;  %v8345_v14 = vld [vmem:[#allocation5 + $0xb60] sm:$0xf0]  ;;  %v8382_v2 = vld [vmem:[%s10569_s3 + $0x8] sm:$0xf0]  ;;  %v7394_v5 = vld [vmem:[%s10569_s3 + $0xc0] sm:$0xf]  ;;  %v3908_v57 = vmul.f32 %v3898_v48, %v9433_v43  ;;  %v3552_v48 = vpop.f32.mrf.mxu2 }
 0x1d4   : > { %4741 = vmatpush.bf16.msra.mxu3 %v7467_v49  ;;  %v3526_v49 = vpop.f32.mrf.mxu0  ;;  %v7574_v11 = vld [vmem:[%s10569_s3 + $0x228] sm:$0xf]  ;;  %v8451_v53 = vld [vmem:[%s10569_s3 + $0x230] sm:$0xf0]  ;;  %v3893_v3 = vmul.f32 0.5, %v3883_v17  ;;  %v7299_v1 = vor.u32 %v8382_v2, %v7298_v22 }
 0x1d5   : > { %3797 = vmatpush.bf16.msra.mxu0 %v7095_v4  ;;  %v3527_v40 = vadd.f32 %v3526_v49, %v3513_v25  ;;  %v3540_v8 = vpop.f32.mrf.mxu1  ;;  %v7195_v4 = vor.u32 %v8355_v63, %v7194_v42  ;;  %v7395_v25 = vor.u32 %v8406_v61, %v7394_v5  ;;  %v7670_v63 = vld [vmem:[%s10569_s3 + $0x2e8] sm:$0xf]  ;;  %v7562_v41 = vld [vmem:[%s10569_s3 + $0x210] sm:$0xf]  ;;  %v8448_v43 = vld [vmem:[%s10569_s3 + $0x218] sm:$0xf0] }
 0x1d6   : > { %3811 = vmatpush.bf16.msra.mxu1 %v7255_v44  ;;  %v7323_v44 = vor.u32 %v8388_v18, %v7322_v26  ;;  %v8475_v26 = vld [vmem:[%s10569_s3 + $0x2f0] sm:$0xf0]  ;;  %v3909_v18 = vmul.f32 %v3899_v54, %v9450_v16  ;;  %v3903_v49 = vmul.f32 %v3893_v3, %v9427_v15  ;;  %v3845_v50 = vmul.f32 0.044715, %v3835_v47  ;;  %v7372_v16 = vld [vmem:[%s10569_s3 + $0x9c] sm:$0xf0] }
 0x1d7   : > { %4728 = vmatpush.bf16.msra.mxu2 %v7359_v7  ;;  %v7014_v7 = vld [vmem:[#allocation5 + $0xa38] sm:$0xf]  ;;  %v9561_v55 = vadd.f32 %v3540_v8, %v3527_v40  ;;  %v8399_v35 = vld [vmem:[%s10569_s3 + $0x94] sm:$0xf]  ;;  %v7671_v60 = vor.u32 %v8475_v26, %v7670_v63  ;;  %v7563_v15 = vor.u32 %v8448_v43, %v7562_v41  ;;  %v7658_v8 = vld [vmem:[%s10569_s3 + $0x2d0] sm:$0xf] }
 0x1d8   : > { %4742 = vmatpush.bf16.msra.mxu3 %v7455_v21  ;;  %v8350_v21 = vld [vmem:[#allocation5 + $0xb88] sm:$0xf0]  ;;  %v7015_v34 = vor.u32 %v8310_v45, %v7014_v7  ;;  %v9627_v40 = vpack.c.bf16 %v3908_v57, %v3903_v49  ;;  %v7550_v7 = vld [vmem:[%s10569_s3 + $0x1f8] sm:$0xf]  ;;  %v8445_v45 = vld [vmem:[%s10569_s3 + $0x200] sm:$0xf0] }
 0x1d9   : > { %3798 = vmatpush.bf16.msra.mxu0 %v7075_v29  ;;  %v3830_v29 = vmul.f32 %v9561_v55, %v9561_v55  ;;  %v7551_v51 = vor.u32 %v8445_v45, %v7550_v7  ;;  %v8442_v54 = vld [vmem:[%s10569_s3 + $0x1e8] sm:$0xf0]  ;;  %v9685_v22 = vld [vmem:[#allocation7] sm:$0x1f]  ;;  %v7336_v61 = vld [vmem:[%s10569_s3 + $0x54] sm:$0xf0] }
 0x1da   : > { %3812 = vmatpush.bf16.msra.mxu1 %v7235_v38  ;;  %v6994_v38 = vld [vmem:[#allocation5 + $0xa10] sm:$0xf]  ;;  %v1036_v2 = vperm.slane %v9685_v22, 3  ;;  %v8390_v5 = vld [vmem:[%s10569_s3 + $0x4c] sm:$0xf] }
 0x1db   : > { %4729 = vmatpush.bf16.msra.mxu2 %v7347_v39  ;;  %v7175_v39 = vor.u32 %v8350_v21, %v7174_v10  ;;  %v3840_v58 = vmul.f32 %v3830_v29, %v9561_v55  ;;  %v6995_v6 = vor.u32 %v8305_v37, %v6994_v38  ;;  %v3855_v10 = vadd.f32 %v3845_v50, %v9559_v62  ;;  %v7348_v38 = vld [vmem:[%s10569_s3 + $0x6c] sm:$0xf0]  ;;  %v7634_v37 = vld [vmem:[%s10569_s3 + $0x2a0] sm:$0xf]  ;;  %v7622_v3 = vld [vmem:[%s10569_s3 + $0x288] sm:$0xf] }
 0x1dc   : > { %4743 = vmatpush.bf16.msra.mxu3 %v7443_v24  ;;  %v7407_v24 = vor.u32 %v8409_v0, %v7406_v9  ;;  %v7538_v0 = vld [vmem:[%s10569_s3 + $0x1e0] sm:$0xf]  ;;  %v8463_v47 = vld [vmem:[%s10569_s3 + $0x290] sm:$0xf0]  ;;  %v7502_v50 = vld [vmem:[%s10569_s3 + $0x198] sm:$0xf] }
 0x1dd   : > { %3799 = vmatpush.bf16.msra.mxu0 %v7055_v23  ;;  %v8402_v23 = vld [vmem:[%s10569_s3 + $0xac] sm:$0xf]  ;;  %v3850_v42 = vmul.f32 0.044715, %v3840_v58  ;;  %v3865_v29 = vmul.f32 0.7978846, %v3855_v10 }
 0x1de   : > { %3813 = vmatpush.bf16.msra.mxu1 %v7215_v36  ;;  %v3894_v36 = vmul.f32 0.5, %v3884_v52  ;;  %v7387_v17 = vor.u32 %v8402_v23, %v7384_v46  ;;  %v8469_v52 = vld [vmem:[%s10569_s3 + $0x2c0] sm:$0xf0]  ;;  %v7526_v58 = vld [vmem:[%s10569_s3 + $0x1c8] sm:$0xf] }
 0x1df   : > { %4730 = vmatpush.bf16.msra.mxu2 %v7335_v56  ;;  %v7155_v56 = vor.u32 %v8345_v14, %v7154_v33  ;;  %v8466_v33 = vld [vmem:[%s10569_s3 + $0x2a8] sm:$0xf0]  ;;  %v7514_v23 = vld [vmem:[%s10569_s3 + $0x1b0] sm:$0xf]  ;;  %v8436_v46 = vld [vmem:[%s10569_s3 + $0x1b8] sm:$0xf0] }
 0x1e0   : > { %4744 = vmatpush.bf16.msra.mxu3 %v7431_v13  ;;  %v7575_v13 = vor.u32 %v8451_v53, %v7574_v11  ;;  %v3904_v12 = vmul.f32 %v3894_v36, %v9453_v20  ;;  %v7375_v20 = vor.u32 %v8399_v35, %v7372_v16  ;;  %v7635_v11 = vor.u32 %v8466_v33, %v7634_v37  ;;  %v7324_v57 = vld [vmem:[%s10569_s3 + $0x3c] sm:$0xf0]  ;;  %v8433_v35 = vld [vmem:[%s10569_s3 + $0x1a0] sm:$0xf0]  ;;  %v7598_v7 = vld [vmem:[%s10569_s3 + $0x258] sm:$0xf] }
 0x1e1   : > { %3800 = vmatpush.bf16.msra.mxu0 %v7035_v30  ;;  %v3860_v30 = vadd.f32 %v3850_v42, %v9561_v55  ;;  %v3554_v42 = vpop.f32.mrf.mxu2  ;;  %v7515_v26 = vor.u32 %v8436_v46, %v7514_v23  ;;  %v8457_v45 = vld [vmem:[%s10569_s3 + $0x260] sm:$0xf0]  ;;  %v8450_v33 = vld [vmem:[%s10569_s3 + $0x22c] sm:$0xf]  ;;  %v8447_v23 = vld [vmem:[%s10569_s3 + $0x214] sm:$0xf] }
 0x1e2   : > { %3814 = vmatpush.bf16.msra.mxu1 %v7195_v4  ;;  %v8472_v4 = vld [vmem:[%s10569_s3 + $0x2d8] sm:$0xf0] }
 0x1e3   : > { %4731 = vmatpush.bf16.msra.mxu2 %v7323_v44  ;;  %v9636_v44 = vpack.c.bf16 %v3909_v18, %v3904_v12  ;;  %v7659_v21 = vor.u32 %v8472_v4, %v7658_v8  ;;  %v3870_v27 = vmul.f32 0.7978846, %v3860_v30  ;;  %v7610_v18 = vld [vmem:[%s10569_s3 + $0x270] sm:$0xf]  ;;  %v8384_v12 = vld [vmem:[%s10569_s3 + $0x1c] sm:$0xf]  ;;  %v7503_v4 = vor.u32 %v8433_v35, %v7502_v50 }
 0x1e4   : > { %4745 = vmatpush.bf16.msra.mxu3 %v7419_v19  ;;  %v8396_v19 = vld [vmem:[%s10569_s3 + $0x7c] sm:$0xf] }
 0x1e5   : > { %3801 = vmatpush.bf16.msra.mxu0 %v7015_v34  ;;  %v8393_v34 = vld [vmem:[%s10569_s3 + $0x64] sm:$0xf]  ;;  %8680 = vtanh.f32 %v3870_v27 }
 0x1e6   : > { %3815 = vmatpush.bf16.msra.mxu1 %v7175_v39  ;;  %v7351_v14 = vor.u32 %v8393_v34, %v7348_v38  ;;  %8682 = vtanh.f32 %v3865_v29  ;;  %v8454_v29 = vld [vmem:[%s10569_s3 + $0x248] sm:$0xf0]  ;;  %v3555_v38 = vadd.f32 %v3554_v42, %v1036_v2 }
 0x1e7   : > { %4732 = vmatpush.bf16.msra.mxu2 %v7311_v59  ;;  %v7539_v59 = vor.u32 %v8442_v54, %v7538_v0 }
 0x1e8   : > { %4746 = vmatpush.bf16.msra.mxu3 %v7407_v24  ;;  %v8439_v24 = vld [vmem:[%s10569_s3 + $0x1d0] sm:$0xf0] }
 0x1e9   : > { %3802 = vmatpush.bf16.msra.mxu0 %v6995_v6  ;;  %v7527_v53 = vor.u32 %v8439_v24, %v7526_v58  ;;  %v7339_v6 = vor.u32 %v8390_v5, %v7336_v61  ;;  %v3580_v49 = vpop.f32.mrf.mxu0  ;;  %v8423_v24 = vld [vmem:[%s10569_s3 + $0x154] sm:$0xf] }
 0x1ea   : > { %3816 = vmatpush.bf16.msra.mxu1 %v7155_v56  ;;  %v3553_v56 = vadd.f32 %v3552_v48, %v1036_v2  ;;  %v3594_v30 = vpop.f32.mrf.mxu1  ;;  %v8426_v48 = vld [vmem:[%s10569_s3 + $0x16c] sm:$0xf] }
 0x1eb   : > { %4733 = vmatpush.bf16.msra.mxu2 %v7299_v1  ;;  %v8681_v36 = vpop.eup %8680  ;;  %v8387_v1 = vld [vmem:[%s10569_s3 + $0x34] sm:$0xf] }
 0x1ec   : > { %4747 = vmatpush.bf16.msra.mxu3 %v7395_v25  ;;  %3803 = vmatmul.bf16.vlgmr.msra.gmra.mxu0 %v9275_v28  ;;  %v7360_v28 = vld [vmem:[%s10569_s3 + $0x84] sm:$0xf0]  ;;  %v3568_v25 = vpop.f32.mrf.mxu3  ;;  %v8683_v63 = vpop.eup %8682  ;;  %v3890_v41 = vadd.f32 1.0, %v8681_v36  ;;  %v7327_v43 = vor.u32 %v8387_v1, %v7324_v57  ;;  %v3567_v16 = vadd.f32 %v3566_v31, %v3553_v56  ;;  %v7586_v31 = vld [vmem:[%s10569_s3 + $0x240] sm:$0xf] }
 0x1ed   : > { %4754 = vmatpush.bf16.msrb.mxu0 %v7575_v13  ;;  %3817 = vmatmul.bf16.vlgmr.msra.gmra.mxu1 %v9277_v32  ;;  %v7646_v32 = vld [vmem:[%s10569_s3 + $0x2b8] sm:$0xf]  ;;  %v7363_v9 = vor.u32 %v8396_v19, %v7360_v28  ;;  %v7623_v13 = vor.u32 %v8463_v47, %v7622_v3  ;;  %v8430_v28 = vld [vmem:[%s10569_s3 + $0x188] sm:$0xf0]  ;;  %v7587_v61 = vor.u32 %v8454_v29, %v7586_v31  ;;  %v8420_v36 = vld [vmem:[%s10569_s3 + $0x13c] sm:$0xf] }
 0x1ee   : > { %4734 = vmatmul.bf16.vlgmr.msra.gmra.mxu2 %v9627_v40  ;;  %4768 = vmatpush.bf16.msrb.mxu1 %v7671_v60  ;;  %v7647_v39 = vor.u32 %v8469_v52, %v7646_v32  ;;  %v7312_v60 = vld [vmem:[%s10569_s3 + $0x24] sm:$0xf0]  ;;  %v3900_v10 = vmul.f32 0.5, %v3890_v41  ;;  %v3581_v27 = vadd.f32 %v3580_v49, %v3567_v16  ;;  %v7480_v32 = vld [vmem:[%s10569_s3 + $0x174] sm:$0xf0]  ;;  %v3569_v47 = vadd.f32 %v3568_v25, %v3555_v38 }
 0x1ef   : > { %4748 = vmatmul.bf16.vlgmr.msra.gmra.mxu3 %v9636_v44  ;;  %v7315_v19 = vor.u32 %v8384_v12, %v7312_v60  ;;  %v7456_v56 = vld [vmem:[%s10569_s3 + $0x144] sm:$0xf0]  ;;  %v8444_v25 = vld [vmem:[%s10569_s3 + $0x1fc] sm:$0xf]  ;;  %v8441_v16 = vld [vmem:[%s10569_s3 + $0x1e4] sm:$0xf] }
 0x1f0   : > { %4796 = vmatpush.bf16.msrb.mxu3 %v7387_v17  ;;  %v8460_v17 = vld [vmem:[%s10569_s3 + $0x278] sm:$0xf0]  ;;  %v3910_v34 = vmul.f32 %v3900_v10, %v9561_v55  ;;  %v3595_v58 = vadd.f32 %v3594_v30, %v3581_v27  ;;  %v7468_v55 = vld [vmem:[%s10569_s3 + $0x15c] sm:$0xf0]  ;;  %v7459_v42 = vor.u32 %v8420_v36, %v7456_v56  ;;  %v7540_v12 = vld [vmem:[%s10569_s3 + $0x1ec] sm:$0xf0] }
 0x1f1   : > { %4755 = vmatpush.bf16.msrb.mxu0 %v7563_v15  ;;  %v3885_v15 = vadd.f32 1.0, %v8683_v63  ;;  %v7611_v8 = vor.u32 %v8460_v17, %v7610_v18  ;;  %v3608_v54 = vpop.f32.mrf.mxu2  ;;  %v3582_v5 = vpop.f32.mrf.mxu0  ;;  %v8417_v18 = vld [vmem:[%s10569_s3 + $0x124] sm:$0xf]  ;;  %v7444_v17 = vld [vmem:[%s10569_s3 + $0x12c] sm:$0xf0] }
 0x1f2   : > { %4769 = vmatpush.bf16.msrb.mxu1 %v7659_v21  ;;  %v8381_v21 = vld [vmem:[%s10569_s3 + $0x4] sm:$0xf]  ;;  %v3609_v46 = vadd.f32 %v3608_v54, %v3595_v58  ;;  %v3583_v57 = vadd.f32 %v3582_v5, %v3569_v47  ;;  %v7447_v35 = vor.u32 %v8417_v18, %v7444_v17  ;;  %v8438_v10 = vld [vmem:[%s10569_s3 + $0x1cc] sm:$0xf]  ;;  %v8435_v54 = vld [vmem:[%s10569_s3 + $0x1b4] sm:$0xf] }
 0x1f3   : > { %v3895_v52 = vmul.f32 0.5, %v3885_v15  ;;  %v8414_v15 = vld [vmem:[%s10569_s3 + $0x10c] sm:$0xf]  ;;  %v7516_v31 = vld [vmem:[%s10569_s3 + $0x1bc] sm:$0xf0] }
 0x1f4   : > { %4797 = vmatpush.bf16.msrb.mxu3 %v7375_v20  ;;  %v7490_v20 = vld [vmem:[%s10569_s3 + $0x180] sm:$0xf]  ;;  %v3622_v37 = vpop.f32.mrf.mxu3  ;;  %v8408_v29 = vld [vmem:[%s10569_s3 + $0xdc] sm:$0xf]  ;;  %v8429_v56 = vld [vmem:[%s10569_s3 + $0x184] sm:$0xf] }
 0x1f5   : > { %4756 = vmatpush.bf16.msrb.mxu0 %v7551_v51  ;;  %v7300_v51 = vld [vmem:[%s10569_s3 + $0xc] sm:$0xf0]  ;;  %v7491_v0 = vor.u32 %v8430_v28, %v7490_v20  ;;  %v3905_v2 = vmul.f32 %v3895_v52, %v9559_v62  ;;  %v7564_v62 = vld [vmem:[%s10569_s3 + $0x21c] sm:$0xf0]  ;;  %v3623_v63 = vadd.f32 %v3622_v37, %v3609_v46  ;;  %v8411_v28 = vld [vmem:[%s10569_s3 + $0xf4] sm:$0xf]  ;;  %v7519_v37 = vor.u32 %v8435_v54, %v7516_v31 }
 0x1f6   : > { %4770 = vmatpush.bf16.msrb.mxu1 %v7647_v39  ;;  %v7303_v39 = vor.u32 %v8381_v21, %v7300_v51  ;;  %v7567_v1 = vor.u32 %v8447_v23, %v7564_v62  ;;  %v7420_v21 = vld [vmem:[%s10569_s3 + $0xfc] sm:$0xf0]  ;;  %v8432_v58 = vld [vmem:[%s10569_s3 + $0x19c] sm:$0xf] }
 0x1f7   : > { %v9774_v3 = vpack.c.bf16 %v3910_v34, %v3905_v2  ;;  %v7408_v34 = vld [vmem:[%s10569_s3 + $0xe4] sm:$0xf0]  ;;  %v7396_v2 = vld [vmem:[%s10569_s3 + $0xcc] sm:$0xf0] }
 0x1f8   : > { %4798 = vmatpush.bf16.msrb.mxu3 %v7363_v9  ;;  %v7599_v9 = vor.u32 %v8457_v45, %v7598_v7 }
 0x1f9   : > { %4757 = vmatpush.bf16.msrb.mxu0 %v7539_v59  ;;  %v7483_v59 = vor.u32 %v8426_v48, %v7480_v32 }
 0x1fa   : > { %4771 = vmatpush.bf16.msrb.mxu1 %v7635_v11  ;;  %v3596_v11 = vpop.f32.mrf.mxu1 }
 0x1fb   : > { %v3597_v49 = vadd.f32 %v3596_v11, %v3583_v57  ;;  %v7390_v11 = vld [vmem:[%s10569_s3 + $0xb0] sm:$0xf] }
 0x1fc   : > { %4799 = vmatpush.bf16.msrb.mxu3 %v7351_v14  ;;  %v7576_v14 = vld [vmem:[%s10569_s3 + $0x234] sm:$0xf0]  ;;  %v3624_v41 = vpop.f32.mrf.mxu3 }
 0x1fd   : > { %4758 = vmatpush.bf16.msrb.mxu0 %v7527_v53  ;;  %v7579_v53 = vor.u32 %v8450_v33, %v7576_v14  ;;  %v7411_v14 = vor.u32 %v8408_v29, %v7408_v34  ;;  %v7486_v29 = vld [vmem:[%s10569_s3 + $0x170] sm:$0xf]  ;;  %v8428_v34 = vld [vmem:[%s10569_s3 + $0x178] sm:$0xf0] }
 0x1fe   : > { %4772 = vmatpush.bf16.msrb.mxu1 %v7623_v13  ;;  %v7552_v13 = vld [vmem:[%s10569_s3 + $0x204] sm:$0xf0] }
 0x200   : > { %4800 = vmatpush.bf16.msrb.mxu3 %v7339_v6  ;;  %v7471_v6 = vor.u32 %v8423_v24, %v7468_v55  ;;  %v7504_v24 = vld [vmem:[%s10569_s3 + $0x1a4] sm:$0xf0]  ;;  %v8405_v55 = vld [vmem:[%s10569_s3 + $0xc4] sm:$0xf] }
 0x201   : > { %4759 = vmatpush.bf16.msrb.mxu0 %v7515_v26  ;;  %v3610_v26 = vpop.f32.mrf.mxu2  ;;  %v7399_v36 = vor.u32 %v8405_v55, %v7396_v2 }
 0x202   : > { %4773 = vmatpush.bf16.msrb.mxu1 %v7611_v8  ;;  %v7432_v8 = vld [vmem:[%s10569_s3 + $0x114] sm:$0xf0]  ;;  %v3611_v20 = vadd.f32 %v3610_v26, %v3597_v49  ;;  %v7366_v49 = vld [vmem:[%s10569_s3 + $0x80] sm:$0xf] }
 0x203   : > { %v7435_v45 = vor.u32 %v8414_v15, %v7432_v8 }
 0x204   : > { %4801 = vmatpush.bf16.msrb.mxu3 %v7327_v43  ;;  %v7555_v43 = vor.u32 %v8444_v25, %v7552_v13  ;;  %v3625_v48 = vadd.f32 %v3624_v41, %v3611_v20  ;;  %v7378_v13 = vld [vmem:[%s10569_s3 + $0x98] sm:$0xf]  ;;  %v7342_v20 = vld [vmem:[%s10569_s3 + $0x50] sm:$0xf] }
 0x205   : > { %4760 = vmatpush.bf16.msrb.mxu0 %v7503_v4  ;;  %v7543_v4 = vor.u32 %v8441_v16, %v7540_v12 }
 0x206   : > { %4774 = vmatpush.bf16.msrb.mxu1 %v7599_v9 }
 0x208   : > { %4802 = vmatpush.bf16.msrb.mxu3 %v7315_v19  ;;  %v7528_v19 = vld [vmem:[%s10569_s3 + $0x1d4] sm:$0xf0] }
 0x209   : > { %4761 = vmatpush.bf16.msrb.mxu0 %v7491_v0  ;;  %v3636_v50 = vpop.f32.mrf.mxu0  ;;  %v7531_v51 = vor.u32 %v8438_v10, %v7528_v19  ;;  %v7423_v0 = vor.u32 %v8411_v28, %v7420_v21  ;;  %v7330_v19 = vld [vmem:[%s10569_s3 + $0x38] sm:$0xf]  ;;  %v8389_v28 = vld [vmem:[%s10569_s3 + $0x40] sm:$0xf0] }
 0x20a   : > { %4775 = vmatpush.bf16.msrb.mxu1 %v7587_v61  ;;  %v3637_v60 = vadd.f32 %v3636_v50, %v3623_v63  ;;  %v3650_v30 = vpop.f32.mrf.mxu1  ;;  %v8401_v63 = vld [vmem:[%s10569_s3 + $0xa0] sm:$0xf0]  ;;  %v8398_v50 = vld [vmem:[%s10569_s3 + $0x88] sm:$0xf0] }
 0x20b   : > { %v7379_v41 = vor.u32 %v8401_v63, %v7378_v13  ;;  %v7367_v16 = vor.u32 %v8398_v50, %v7366_v49  ;;  %v8495_v13 = vld [vmem:[%s10569_s3 + $0x394] sm:$0xf]  ;;  %v7756_v63 = vld [vmem:[%s10569_s3 + $0x39c] sm:$0xf0]  ;;  %v7450_v49 = vld [vmem:[%s10569_s3 + $0x128] sm:$0xf] }
 0x20c   : > { %4803 = vmatpush.bf16.msrb.mxu3 %v7303_v39  ;;  %4762 = vmatmul.bf16.vlgmr.msrb.gmra.mxu0 %v9774_v3  ;;  %v3651_v7 = vadd.f32 %v3650_v30, %v3637_v60  ;;  %v7354_v60 = vld [vmem:[%s10569_s3 + $0x68] sm:$0xf]  ;;  %v8395_v30 = vld [vmem:[%s10569_s3 + $0x70] sm:$0xf0] }
 0x20d   : > { %4810 = vmatpush.bf16.msra.mxu0 %v7483_v59  ;;  %v7355_v8 = vor.u32 %v8395_v30, %v7354_v60  ;;  %v8419_v50 = vld [vmem:[%s10569_s3 + $0x130] sm:$0xf0]  ;;  %v7438_v60 = vld [vmem:[%s10569_s3 + $0x110] sm:$0xf]  ;;  %v8416_v30 = vld [vmem:[%s10569_s3 + $0x118] sm:$0xf0] }
 0x20e   : > { %4824 = vmatpush.bf16.msra.mxu1 %v7579_v53  ;;  %v8404_v53 = vld [vmem:[%s10569_s3 + $0xb8] sm:$0xf0] }
 0x20f   : > { %4804 = vmatmul.bf16.vlgmr.msrb.gmra.mxu3 %v9627_v40  ;;  %v7391_v57 = vor.u32 %v8404_v53, %v7390_v11  ;;  %v7742_v53 = vld [vmem:[%s10569_s3 + $0x378] sm:$0xf] }
 0x211   : > { %4811 = vmatpush.bf16.msra.mxu0 %v7471_v6  ;;  %v3664_v27 = vpop.f32.mrf.mxu2  ;;  %v3638_v52 = vpop.f32.mrf.mxu0  ;;  %v7507_v6 = vor.u32 %v8432_v58, %v7504_v24  ;;  %v7487_v58 = vor.u32 %v8428_v34, %v7486_v29  ;;  %v7306_v24 = vld [vmem:[%s10569_s3 + $0x8] sm:$0xf]  ;;  %v7732_v29 = vld [vmem:[%s10569_s3 + $0x36c] sm:$0xf0] }
 0x212   : > { %4825 = vmatpush.bf16.msra.mxu1 %v7567_v1  ;;  %v3665_v32 = vadd.f32 %v3664_v27, %v3651_v7  ;;  %v3678_v9 = vpop.f32.mrf.mxu3  ;;  %v3639_v38 = vadd.f32 %v3638_v52, %v3625_v48  ;;  %v3652_v59 = vpop.f32.mrf.mxu1  ;;  %v7492_v1 = vld [vmem:[%s10569_s3 + $0x18c] sm:$0xf0]  ;;  %v8392_v7 = vld [vmem:[%s10569_s3 + $0x58] sm:$0xf0]  ;;  %v7331_v48 = vor.u32 %v8389_v28, %v7330_v19  ;;  %v8499_v52 = vld [vmem:[%s10569_s3 + $0x3b0] sm:$0xf0] }
 0x213   : > { %v7495_v26 = vor.u32 %v8429_v56, %v7492_v1  ;;  %v7343_v10 = vor.u32 %v8392_v7, %v7342_v20  ;;  %v7462_v56 = vld [vmem:[%s10569_s3 + $0x140] sm:$0xf]  ;;  %v8422_v1 = vld [vmem:[%s10569_s3 + $0x148] sm:$0xf0]  ;;  %v8492_v7 = vld [vmem:[%s10569_s3 + $0x37c] sm:$0xf] }
 0x214   : > { %v9838_v39 = vadd.f32 %v3678_v9, %v3665_v32  ;;  %v3653_v61 = vadd.f32 %v3652_v59, %v3639_v38  ;;  %v7766_v32 = vld [vmem:[%s10569_s3 + $0x3a8] sm:$0xf]  ;;  %v7318_v9 = vld [vmem:[%s10569_s3 + $0x20] sm:$0xf]  ;;  %v7426_v19 = vld [vmem:[%s10569_s3 + $0xf8] sm:$0xf] }
 0x215   : > { %4812 = vmatpush.bf16.msra.mxu0 %v7459_v42  ;;  %v7767_v54 = vor.u32 %v8499_v52, %v7766_v32  ;;  %v8413_v28 = vld [vmem:[%s10569_s3 + $0x100] sm:$0xf0] }
 0x216   : > { %4826 = vmatpush.bf16.msra.mxu1 %v7555_v43  ;;  %v3826_v33 = vmul.f32 %v9838_v39, %v9838_v39  ;;  %v8481_v32 = vld [vmem:[%s10569_s3 + $0x320] sm:$0xf0] }
 0x217   : > { %4782 = vmatpush.bf16.msrb.mxu2 %v7767_v54 }
 0x218   : > { %v3836_v5 = vmul.f32 %v3826_v33, %v9838_v39  ;;  %v7754_v33 = vld [vmem:[%s10569_s3 + $0x390] sm:$0xf] }
 0x219   : > { %4813 = vmatpush.bf16.msra.mxu0 %v7447_v35  ;;  %v3666_v47 = vpop.f32.mrf.mxu2 }
 0x21a   : > { %4827 = vmatpush.bf16.msra.mxu1 %v7543_v4  ;;  %v3846_v23 = vmul.f32 0.044715, %v3836_v5  ;;  %v3667_v62 = vadd.f32 %v3666_v47, %v3653_v61  ;;  %v3680_v46 = vpop.f32.mrf.mxu3  ;;  %v7474_v5 = vld [vmem:[%s10569_s3 + $0x158] sm:$0xf]  ;;  %v8425_v61 = vld [vmem:[%s10569_s3 + $0x160] sm:$0xf0] }
 0x21b   : > { %v8493_v47 = vld [vmem:[%s10569_s3 + $0x380] sm:$0xf0] }
 0x21c   : > { %v3856_v42 = vadd.f32 %v3846_v23, %v9838_v39  ;;  %v3681_v25 = vadd.f32 %v3680_v46, %v3667_v62  ;;  %v7743_v23 = vor.u32 %v8493_v47, %v7742_v53  ;;  %v7730_v62 = vld [vmem:[%s10569_s3 + $0x360] sm:$0xf]  ;;  %v8490_v46 = vld [vmem:[%s10569_s3 + $0x368] sm:$0xf0]  ;;  %v7672_v47 = vld [vmem:[%s10569_s3 + $0x2f4] sm:$0xf0] }
 0x21d   : > { %4814 = vmatpush.bf16.msra.mxu0 %v7435_v45  ;;  %v8474_v53 = vld [vmem:[%s10569_s3 + $0x2ec] sm:$0xf] }
 0x21e   : > { %4828 = vmatpush.bf16.msra.mxu1 %v7531_v51  ;;  %v3866_v18 = vmul.f32 0.7978846, %v3856_v42  ;;  %v3831_v17 = vmul.f32 %v3681_v25, %v3681_v25  ;;  %v7731_v42 = vor.u32 %v8490_v46, %v7730_v62  ;;  %v7720_v62 = vld [vmem:[%s10569_s3 + $0x354] sm:$0xf0] }
 0x21f   : > { %v7762_v46 = vld [vmem:[%s10569_s3 + $0x398] sm:$0xf] }
 0x220   : > { %v3841_v43 = vmul.f32 %v3831_v17, %v3681_v25  ;;  %8684 = vtanh.f32 %v3866_v18  ;;  %v8487_v18 = vld [vmem:[%s10569_s3 + $0x350] sm:$0xf0]  ;;  %v7463_v17 = vor.u32 %v8422_v1, %v7462_v56 }
 0x221   : > { %4815 = vmatpush.bf16.msra.mxu0 %v7423_v0  ;;  %v8386_v0 = vld [vmem:[%s10569_s3 + $0x28] sm:$0xf0] }
 0x222   : > { %4829 = vmatpush.bf16.msra.mxu1 %v7519_v37  ;;  %v3851_v35 = vmul.f32 0.044715, %v3841_v43  ;;  %v7319_v37 = vor.u32 %v8386_v0, %v7318_v9  ;;  %v7427_v9 = vor.u32 %v8413_v28, %v7426_v19  ;;  %v7414_v0 = vld [vmem:[%s10569_s3 + $0xe0] sm:$0xf] }
 0x224   : > { %v3861_v12 = vadd.f32 %v3851_v35, %v3681_v25 }
 0x225   : > { %4816 = vmatpush.bf16.msra.mxu0 %v7411_v14  ;;  %v8496_v14 = vld [vmem:[%s10569_s3 + $0x398] sm:$0xf0] }
 0x226   : > { %4830 = vmatpush.bf16.msra.mxu1 %v7507_v6  ;;  %v3871_v15 = vmul.f32 0.7978846, %v3861_v12  ;;  %v8685_v4 = vpop.eup %8684  ;;  %v7755_v55 = vor.u32 %v8496_v14, %v7754_v33  ;;  %v7475_v6 = vor.u32 %v8425_v61, %v7474_v5  ;;  %v7451_v12 = vor.u32 %v8419_v50, %v7450_v49  ;;  %v8500_v33 = vld [vmem:[%s10569_s3 + $0x3b8] sm:$0xf0]  ;;  %v8478_v5 = vld [vmem:[%s10569_s3 + $0x308] sm:$0xf0] }
 0x227   : > { %v3886_v45 = vadd.f32 1.0, %v8685_v4  ;;  %v7439_v4 = vor.u32 %v8416_v30, %v7438_v60  ;;  %v8494_v49 = vld [vmem:[%s10569_s3 + $0x388] sm:$0xf0] }
 0x228   : > { %8686 = vtanh.f32 %v3871_v15  ;;  %4783 = vmatpush.bf16.msrb.mxu2 %v7755_v55  ;;  %v1037_v15 = vperm.slane %v9685_v22, 4  ;;  %v7682_v55 = vld [vmem:[%s10569_s3 + $0x300] sm:$0xf]  ;;  %v8480_v22 = vld [vmem:[%s10569_s3 + $0x31c] sm:$0xf] }
 0x229   : > { %4817 = vmatpush.bf16.msra.mxu0 %v7399_v36  ;;  %v3896_v27 = vmul.f32 0.5, %v3886_v45  ;;  %v8498_v36 = vld [vmem:[%s10569_s3 + $0x3ac] sm:$0xf]  ;;  %v3692_v43 = vpop.f32.mrf.mxu0  ;;  %v7744_v45 = vld [vmem:[%s10569_s3 + $0x384] sm:$0xf0] }
 0x22a   : > { %4831 = vmatpush.bf16.msra.mxu1 %v7495_v26  ;;  %v7718_v26 = vld [vmem:[%s10569_s3 + $0x348] sm:$0xf]  ;;  %v3706_v35 = vpop.f32.mrf.mxu1 }
 0x22b   : > { %v3906_v38 = vmul.f32 %v3896_v27, %v9838_v39  ;;  %v8383_v39 = vld [vmem:[%s10569_s3 + $0x10] sm:$0xf0]  ;;  %v3693_v27 = vadd.f32 %v3692_v43, %v1037_v15  ;;  %v7750_v43 = vld [vmem:[%s10569_s3 + $0x380] sm:$0xf] }
 0x22c   : > { %4818 = vmatmul.bf16.vlgmr.msra.gmra.mxu0 %v9636_v44  ;;  %v7307_v11 = vor.u32 %v8383_v39, %v7306_v24  ;;  %4784 = vmatpush.bf16.msrb.mxu2 %v7743_v23  ;;  %v7402_v24 = vld [vmem:[%s10569_s3 + $0xc8] sm:$0xf]  ;;  %v8407_v39 = vld [vmem:[%s10569_s3 + $0xd0] sm:$0xf0]  ;;  %v7675_v23 = vor.u32 %v8474_v53, %v7672_v47  ;;  %v7751_v60 = vor.u32 %v8494_v49, %v7750_v43 }
 0x22d   : > { %4866 = vmatpush.bf16.msrb.mxu0 %v7391_v57  ;;  %v7768_v57 = vld [vmem:[%s10569_s3 + $0x3b4] sm:$0xf0]  ;;  %v3707_v14 = vadd.f32 %v3706_v35, %v3693_v27  ;;  %v7636_v27 = vld [vmem:[%s10569_s3 + $0x2ac] sm:$0xf0] }
 0x22e   : > { %v8687_v21 = vpop.eup %8686 }
 0x22f   : > { %v3891_v51 = vadd.f32 1.0, %v8687_v21  ;;  %v7747_v21 = vor.u32 %v8492_v7, %v7744_v45  ;;  %v8491_v7 = vld [vmem:[%s10569_s3 + $0x370] sm:$0xf0] }
 0x230   : > { %4785 = vmatpush.bf16.msrb.mxu2 %v7731_v42 }
 0x231   : > { %4867 = vmatpush.bf16.msrb.mxu0 %v7379_v41  ;;  %v3901_v31 = vmul.f32 0.5, %v3891_v51  ;;  %v7759_v41 = vor.u32 %v8495_v13, %v7756_v63  ;;  %v3694_v51 = vpop.f32.mrf.mxu0  ;;  %v8471_v13 = vld [vmem:[%s10569_s3 + $0x2d4] sm:$0xf]  ;;  %v7660_v63 = vld [vmem:[%s10569_s3 + $0x2dc] sm:$0xf0] }
 0x232   : > { %v10016_v52 = vpop.f32.mrf.mxu1  ;;  %v3734_v34 = vpop.f32.mrf.mxu3  ;;  %v3695_v50 = vadd.f32 %v3694_v51, %v1037_v15  ;;  %v8477_v51 = vld [vmem:[%s10569_s3 + $0x304] sm:$0xf] }
 0x233   : > { %v3911_v59 = vmul.f32 %v3901_v31, %v3681_v25  ;;  %v7771_v25 = vor.u32 %v8498_v36, %v7768_v57  ;;  %v8489_v31 = vld [vmem:[%s10569_s3 + $0x364] sm:$0xf] }
 0x234   : > { %v8497_v36 = vld [vmem:[%s10569_s3 + $0x3a0] sm:$0xf0]  ;;  %v3709_v45 = vadd.f32 %v10016_v52, %v3695_v50  ;;  %v7678_v52 = vld [vmem:[%s10569_s3 + $0x2f0] sm:$0xf]  ;;  %v8456_v50 = vld [vmem:[%s10569_s3 + $0x25c] sm:$0xf] }
 0x235   : > { %4868 = vmatpush.bf16.msrb.mxu0 %v7367_v16  ;;  %v9930_v2 = vpack.c.bf16 %v3911_v59, %v3906_v38  ;;  %4852 = vmatpush.bf16.msra.mxu3 %v7771_v25  ;;  %v7719_v16 = vor.u32 %v8487_v18, %v7718_v26  ;;  %v8410_v38 = vld [vmem:[%s10569_s3 + $0xe8] sm:$0xf0]  ;;  %v7735_v59 = vor.u32 %v8489_v31, %v7732_v29  ;;  %v8483_v26 = vld [vmem:[%s10569_s3 + $0x334] sm:$0xf] }
 0x236   : > { %v7415_v61 = vor.u32 %v8410_v38, %v7414_v0  ;;  %v7763_v57 = vor.u32 %v8497_v36, %v7762_v46  ;;  %v7403_v25 = vor.u32 %v8407_v39, %v7402_v24  ;;  %v8488_v38 = vld [vmem:[%s10569_s3 + $0x358] sm:$0xf0]  ;;  %v8459_v46 = vld [vmem:[%s10569_s3 + $0x274] sm:$0xf]  ;;  %v7612_v36 = vld [vmem:[%s10569_s3 + $0x27c] sm:$0xf0] }
 0x237   : > { %4776 = vmatmul.bf16.vlgmr.msrb.gmra.mxu1 %v9930_v2  ;;  %4786 = vmatpush.bf16.msrb.mxu2 %v7719_v16 }
 0x238   : > { %4880 = vmatpush.bf16.msrb.mxu1 %v7487_v58 }
 0x239   : > { %4869 = vmatpush.bf16.msrb.mxu0 %v7355_v8  ;;  %4853 = vmatpush.bf16.msra.mxu3 %v7759_v41  ;;  %v8484_v8 = vld [vmem:[%s10569_s3 + $0x338] sm:$0xf0]  ;;  %v7708_v41 = vld [vmem:[%s10569_s3 + $0x33c] sm:$0xf0] }
 0x23a   : > { %v3736_v30 = vpop.f32.mrf.mxu3 }
 0x23c   : > { %4881 = vmatpush.bf16.msrb.mxu1 %v7475_v6  ;;  %v8486_v6 = vld [vmem:[%s10569_s3 + $0x34c] sm:$0xf] }
 0x23d   : > { %4870 = vmatpush.bf16.msrb.mxu0 %v7343_v10  ;;  %v3720_v10 = vpop.f32.mrf.mxu2  ;;  %4854 = vmatpush.bf16.msra.mxu3 %v7747_v21  ;;  %v7723_v1 = vor.u32 %v8486_v6, %v7720_v62  ;;  %v8465_v21 = vld [vmem:[%s10569_s3 + $0x2a4] sm:$0xf] }
 0x23e   : > { %v3721_v56 = vadd.f32 %v3720_v10, %v3707_v14  ;;  %v8462_v14 = vld [vmem:[%s10569_s3 + $0x28c] sm:$0xf]  ;;  %v8485_v6 = vld [vmem:[%s10569_s3 + $0x340] sm:$0xf0] }
 0x240   : > { %4882 = vmatpush.bf16.msrb.mxu1 %v7463_v17  ;;  %v7663_v17 = vor.u32 %v8471_v13, %v7660_v63  ;;  %v3735_v35 = vadd.f32 %v3734_v34, %v3721_v56  ;;  %v7726_v34 = vld [vmem:[%s10569_s3 + $0x350] sm:$0xf]  ;;  %v7615_v56 = vor.u32 %v8459_v46, %v7612_v36  ;;  %v8482_v63 = vld [vmem:[%s10569_s3 + $0x328] sm:$0xf0] }
 0x241   : > { %4871 = vmatpush.bf16.msrb.mxu0 %v7331_v48  ;;  %v7694_v48 = vld [vmem:[%s10569_s3 + $0x318] sm:$0xf]  ;;  %4855 = vmatpush.bf16.msra.mxu3 %v7735_v59  ;;  %v7582_v36 = vld [vmem:[%s10569_s3 + $0x230] sm:$0xf] }
 0x242   : > { %v7695_v54 = vor.u32 %v8481_v32, %v7694_v48  ;;  %v7639_v32 = vor.u32 %v8465_v21, %v7636_v27 }
 0x244   : > { %4883 = vmatpush.bf16.msrb.mxu1 %v7451_v12  ;;  %v7711_v12 = vor.u32 %v8483_v26, %v7708_v41 }
 0x245   : > { %4872 = vmatpush.bf16.msrb.mxu0 %v7319_v37  ;;  %v7774_v37 = vld [vmem:[%s10569_s3 + $0x3b0] sm:$0xf]  ;;  %v3722_v42 = vpop.f32.mrf.mxu2  ;;  %4856 = vmatpush.bf16.msra.mxu3 %v7723_v1  ;;  %v7654_v1 = vld [vmem:[%s10569_s3 + $0x2c0] sm:$0xf] }
 0x246   : > { %v7775_v58 = vor.u32 %v8500_v33, %v7774_v37  ;;  %v3723_v0 = vadd.f32 %v3722_v42, %v3709_v45  ;;  %v7727_v37 = vor.u32 %v8488_v38, %v7726_v34  ;;  %v7702_v42 = vld [vmem:[%s10569_s3 + $0x320] sm:$0xf]  ;;  %v8453_v45 = vld [vmem:[%s10569_s3 + $0x244] sm:$0xf] }
 0x247   : > { %4832 = vmatmul.bf16.vlgmr.msra.gmra.mxu1 %v9774_v3 }
 0x248   : > { %4884 = vmatpush.bf16.msrb.mxu1 %v7439_v4  ;;  %v7696_v4 = vld [vmem:[%s10569_s3 + $0x324] sm:$0xf0] }
 0x249   : > { %4873 = vmatpush.bf16.msrb.mxu0 %v7307_v11  ;;  %v7683_v11 = vor.u32 %v8478_v5, %v7682_v55  ;;  %v3748_v18 = vpop.f32.mrf.mxu0  ;;  %4857 = vmatpush.bf16.msra.mxu3 %v7711_v12  ;;  %v7699_v19 = vor.u32 %v8480_v22, %v7696_v4  ;;  %v7666_v55 = vld [vmem:[%s10569_s3 + $0x2d8] sm:$0xf]  ;;  %v8473_v5 = vld [vmem:[%s10569_s3 + $0x2e0] sm:$0xf0]  ;;  %v7642_v12 = vld [vmem:[%s10569_s3 + $0x2a8] sm:$0xf] }
 0x24a   : > { %v3762_v16 = vpop.f32.mrf.mxu1  ;;  %v3749_v10 = vadd.f32 %v3748_v18, %v3735_v35  ;;  %v7667_v47 = vor.u32 %v8473_v5, %v7666_v55  ;;  %v7600_v35 = vld [vmem:[%s10569_s3 + $0x264] sm:$0xf0]  ;;  %v8455_v55 = vld [vmem:[%s10569_s3 + $0x250] sm:$0xf0] }
 0x24c   : > { %4874 = vmatmul.bf16.vlgmr.msrb.gmra.mxu0 %v9627_v40  ;;  %v7706_v40 = vld [vmem:[%s10569_s3 + $0x330] sm:$0xf]  ;;  %4885 = vmatpush.bf16.msrb.mxu1 %v7427_v9  ;;  %v8476_v9 = vld [vmem:[%s10569_s3 + $0x2f8] sm:$0xf0] }
 0x24d   : > { %v7707_v20 = vor.u32 %v8484_v8, %v7706_v40  ;;  %4922 = vmatpush.bf16.msra.mxu0 %v7775_v58  ;;  %v8468_v40 = vld [vmem:[%s10569_s3 + $0x2bc] sm:$0xf]  ;;  %v7648_v8 = vld [vmem:[%s10569_s3 + $0x2c4] sm:$0xf0]  ;;  %4858 = vmatpush.bf16.msra.mxu3 %v7699_v19  ;;  %v7679_v29 = vor.u32 %v8476_v9, %v7678_v52  ;;  %v7624_v58 = vld [vmem:[%s10569_s3 + $0x294] sm:$0xf0] }
 0x24e   : > { %v7651_v15 = vor.u32 %v8468_v40, %v7648_v8  ;;  %v7627_v39 = vor.u32 %v8462_v14, %v7624_v58  ;;  %v8458_v14 = vld [vmem:[%s10569_s3 + $0x268] sm:$0xf0] }
 0x24f   : > { %4787 = vmatpush.bf16.msrb.mxu2 %v7707_v20  ;;  %v7738_v20 = vld [vmem:[%s10569_s3 + $0x368] sm:$0xf] }
 0x250   : > { %4886 = vmatpush.bf16.msrb.mxu1 %v7415_v61  ;;  %v7739_v28 = vor.u32 %v8491_v7, %v7738_v20  ;;  %v7714_v61 = vld [vmem:[%s10569_s3 + $0x338] sm:$0xf] }
 0x251   : > { %4923 = vmatpush.bf16.msra.mxu0 %v7763_v57  ;;  %v3776_v48 = vpop.f32.mrf.mxu2  ;;  %v3750_v59 = vpop.f32.mrf.mxu0  ;;  %v8470_v57 = vld [vmem:[%s10569_s3 + $0x2c8] sm:$0xf0] }
 0x252   : > { %v3764_v33 = vpop.f32.mrf.mxu1  ;;  %v3790_v24 = vpop.f32.mrf.mxu3  ;;  %v7655_v13 = vor.u32 %v8470_v57, %v7654_v1 }
 0x253   : > { %4788 = vmatpush.bf16.msrb.mxu2 %v7695_v54  ;;  %v3763_v54 = vadd.f32 %v3762_v16, %v3749_v10  ;;  %v7603_v16 = vor.u32 %v8456_v50, %v7600_v35  ;;  %v7588_v10 = vld [vmem:[%s10569_s3 + $0x24c] sm:$0xf0] }
 0x254   : > { %4887 = vmatpush.bf16.msrb.mxu1 %v7403_v25  ;;  %v7591_v19 = vor.u32 %v8453_v45, %v7588_v10  ;;  %v7534_v35 = vld [vmem:[%s10569_s3 + $0x1d0] sm:$0xf]  ;;  %v8516_v45 = vld [vmem:[%s10571_s5 + $0x74] sm:$0xf0] }
 0x255   : > { %4924 = vmatpush.bf16.msra.mxu0 %v7751_v60  ;;  %v3777_v53 = vadd.f32 %v3776_v48, %v3763_v54  ;;  %v8467_v60 = vld [vmem:[%s10569_s3 + $0x2b0] sm:$0xf0] }
 0x256   : > { %v7643_v22 = vor.u32 %v8467_v60, %v7642_v12  ;;  %v7522_v60 = vld [vmem:[%s10569_s3 + $0x1b8] sm:$0xf] }
 0x257   : > { %4789 = vmatpush.bf16.msrb.mxu2 %v7683_v11  ;;  %4888 = vmatmul.bf16.vlgmr.msrb.gmra.mxu1 %v9636_v44  ;;  %v7684_v44 = vld [vmem:[%s10569_s3 + $0x30c] sm:$0xf0]  ;;  %v3737_v11 = vadd.f32 %v3736_v30, %v3723_v0  ;;  %v3791_v25 = vadd.f32 %v3790_v24, %v3777_v53  ;;  %v7690_v30 = vld [vmem:[%s10569_s3 + $0x308] sm:$0xf]  ;;  %v7618_v0 = vld [vmem:[%s10569_s3 + $0x278] sm:$0xf] }
 0x258   : > { %v7687_v31 = vor.u32 %v8477_v51, %v7684_v44  ;;  %v8464_v51 = vld [vmem:[%s10569_s3 + $0x298] sm:$0xf0] }
 0x259   : > { %4925 = vmatpush.bf16.msra.mxu0 %v7739_v28  ;;  %v3751_v62 = vadd.f32 %v3750_v59, %v3737_v11  ;;  %v3778_v26 = vpop.f32.mrf.mxu2  ;;  %v7630_v28 = vld [vmem:[%s10569_s3 + $0x290] sm:$0xf] }
 0x25a   : > { %4859 = vmatpush.bf16.msra.mxu3 %v7687_v31  ;;  %v3792_v4 = vpop.f32.mrf.mxu3 }
 0x25b   : > { %4838 = vmatpush.bf16.msra.mxu2 %v7675_v23  ;;  %v7715_v23 = vor.u32 %v8485_v6, %v7714_v61  ;;  %v3765_v41 = vadd.f32 %v3764_v33, %v3751_v62 }
 0x25d   : > { %4926 = vmatpush.bf16.msra.mxu0 %v7727_v37  ;;  %v3779_v40 = vadd.f32 %v3778_v26, %v3765_v41  ;;  %v7606_v37 = vld [vmem:[%s10569_s3 + $0x260] sm:$0xf] }
 0x25e   : > { %4908 = vmatpush.bf16.msrb.mxu3 %v7679_v29  ;;  %v8461_v29 = vld [vmem:[%s10569_s3 + $0x280] sm:$0xf0]  ;;  %v7607_v58 = vor.u32 %v8458_v14, %v7606_v37  ;;  %v7898_v14 = vld [vmem:[%s10571_s5 + $0xf0] sm:$0xf] }
 0x25f   : > { %4839 = vmatpush.bf16.msra.mxu2 %v7663_v17  ;;  %v7703_v17 = vor.u32 %v8482_v63, %v7702_v42  ;;  %v3793_v21 = vadd.f32 %v3792_v4, %v3779_v40  ;;  %v7619_v34 = vor.u32 %v8461_v29, %v7618_v0  ;;  %v8449_v63 = vld [vmem:[%s10569_s3 + $0x220] sm:$0xf0]  ;;  %v7498_v4 = vld [vmem:[%s10569_s3 + $0x188] sm:$0xf] }
 0x260   : > { %v8510_v0 = vld [vmem:[%s10571_s5 + $0x44] sm:$0xf0] }
 0x261   : > { %4927 = vmatpush.bf16.msra.mxu0 %v7715_v23 }
 0x262   : > { %4909 = vmatpush.bf16.msrb.mxu3 %v7667_v47 }
 0x263   : > { %4840 = vmatpush.bf16.msra.mxu2 %v7651_v15  ;;  %v8479_v15 = vld [vmem:[%s10569_s3 + $0x310] sm:$0xf0] }
 0x264   : > { %v7691_v20 = vor.u32 %v8479_v15, %v7690_v30  ;;  %v8437_v30 = vld [vmem:[%s10569_s3 + $0x1c0] sm:$0xf0] }
 0x265   : > { %4928 = vmatpush.bf16.msra.mxu0 %v7703_v17  ;;  %v8446_v17 = vld [vmem:[%s10569_s3 + $0x208] sm:$0xf0]  ;;  %v7523_v40 = vor.u32 %v8437_v30, %v7522_v60 }
 0x266   : > { %4910 = vmatpush.bf16.msrb.mxu3 %v7655_v13  ;;  %v7570_v13 = vld [vmem:[%s10569_s3 + $0x218] sm:$0xf] }
 0x267   : > { %4841 = vmatpush.bf16.msra.mxu2 %v7639_v32  ;;  %v7631_v32 = vor.u32 %v8464_v51, %v7630_v28  ;;  %v7571_v26 = vor.u32 %v8449_v63, %v7570_v13  ;;  %v7826_v28 = vld [vmem:[%s10571_s5 + $0x60] sm:$0xf]  ;;  %v7818_v51 = vld [vmem:[%s10571_s5 + $0x50] sm:$0xf]  ;;  %v8504_v63 = vld [vmem:[%s10571_s5 + $0x14] sm:$0xf0] }
 0x268   : > { %v7786_v13 = vld [vmem:[%s10571_s5 + $0x10] sm:$0xf] }
 0x269   : > { %v3804_v18 = vpop.f32.mrf.mxu0  ;;  %4929 = vmatpush.bf16.msra.mxu0 %v7691_v20 }
 0x26a   : > { %v3805_v43 = vadd.f32 %v3804_v18, %v3791_v25  ;;  %v3818_v49 = vpop.f32.mrf.mxu1  ;;  %4911 = vmatpush.bf16.msrb.mxu3 %v7643_v22  ;;  %v7558_v18 = vld [vmem:[%s10569_s3 + $0x200] sm:$0xf]  ;;  %v8434_v22 = vld [vmem:[%s10569_s3 + $0x1a8] sm:$0xf0] }
 0x26b   : > { %4842 = vmatpush.bf16.msra.mxu2 %v7627_v39  ;;  %v7594_v39 = vld [vmem:[%s10569_s3 + $0x248] sm:$0xf]  ;;  %v7559_v41 = vor.u32 %v8446_v17, %v7558_v18  ;;  %v7787_v17 = vor.u32 %v8504_v63, %v7786_v13 }
 0x26c   : > { %v3819_v8 = vadd.f32 %v3818_v49, %v3805_v43  ;;  %v7595_v61 = vor.u32 %v8455_v55, %v7594_v39  ;;  %v7546_v43 = vld [vmem:[%s10569_s3 + $0x1e8] sm:$0xf]  ;;  %v8443_v49 = vld [vmem:[%s10569_s3 + $0x1f0] sm:$0xf0] }
 0x26d   : > { %v7547_v50 = vor.u32 %v8443_v49, %v7546_v43  ;;  %v8528_v43 = vld [vmem:[%s10571_s5 + $0xd4] sm:$0xf0]  ;;  %v8527_v49 = vld [vmem:[%s10571_s5 + $0xd4] sm:$0xf] }
 0x26e   : > { %v3827_v7 = vmul.f32 %v3819_v8, %v3819_v8  ;;  %4912 = vmatpush.bf16.msrb.mxu3 %v7631_v32 }
 0x26f   : > { %4843 = vmatpush.bf16.msra.mxu2 %v7615_v56  ;;  %v8452_v56 = vld [vmem:[%s10569_s3 + $0x238] sm:$0xf0] }
 0x270   : > { %v3837_v27 = vmul.f32 %v3827_v7, %v3819_v8  ;;  %v7583_v42 = vor.u32 %v8452_v56, %v7582_v36  ;;  %v7834_v7 = vld [vmem:[%s10571_s5 + $0x70] sm:$0xf]  ;;  %v8529_v36 = vld [vmem:[%s10571_s5 + $0xe4] sm:$0xf] }
 0x271   : > { %v3806_v48 = vpop.f32.mrf.mxu0  ;;  %v7835_v10 = vor.u32 %v8516_v45, %v7834_v7 }
 0x272   : > { %v3847_v44 = vmul.f32 0.044715, %v3837_v27  ;;  %v3807_v52 = vadd.f32 %v3806_v48, %v3793_v21  ;;  %v3820_v9 = vpop.f32.mrf.mxu1  ;;  %4913 = vmatpush.bf16.msrb.mxu3 %v7619_v34  ;;  %v8514_v21 = vld [vmem:[%s10571_s5 + $0x64] sm:$0xf0]  ;;  %v8512_v48 = vld [vmem:[%s10571_s5 + $0x54] sm:$0xf0] }
 0x273   : > { %4844 = vmatpush.bf16.msra.mxu2 %v7603_v16  ;;  %v8440_v16 = vld [vmem:[%s10569_s3 + $0x1d8] sm:$0xf0]  ;;  %5243 = vmatpush.bf16.msra.mxu1 %v7835_v10  ;;  %v7819_v32 = vor.u32 %v8512_v48, %v7818_v51  ;;  %v7866_v48 = vld [vmem:[%s10571_s5 + $0xb0] sm:$0xf] }
 0x274   : > { %v3857_v54 = vadd.f32 %v3847_v44, %v3819_v8  ;;  %v3821_v31 = vadd.f32 %v3820_v9, %v3807_v52  ;;  %v7535_v12 = vor.u32 %v8440_v16, %v7534_v35  ;;  %v4735_v44 = vpop.f32.mrf.mxu2  ;;  %v10283_v52 = vld [vmem:[#allocation8] sm:$0x7]  ;;  %v7810_v9 = vld [vmem:[%s10571_s5 + $0x40] sm:$0xf] }
 0x275   : > { %v4080_v34 = vperm.slane %v10283_v52, 0 }
 0x276   : > { %v3867_v38 = vmul.f32 0.7978846, %v3857_v54  ;;  %v3832_v59 = vmul.f32 %v3821_v31, %v3821_v31  ;;  %4914 = vmatpush.bf16.msrb.mxu3 %v7607_v58  ;;  %v7811_v54 = vor.u32 %v8510_v0, %v7810_v9  ;;  %v8532_v58 = vld [vmem:[%s10571_s5 + $0xf4] sm:$0xf0]  ;;  %v4081_v9 = vperm.slane %v10283_v52, 1 }
 0x277   : > { %4845 = vmatpush.bf16.msra.mxu2 %v7591_v19  ;;  %v4749_v19 = vpop.f32.mrf.mxu3  ;;  %v4736_v39 = vadd.f32 %v4735_v44, %v4080_v34  ;;  %v7899_v55 = vor.u32 %v8532_v58, %v7898_v14  ;;  %v8523_v44 = vld [vmem:[%s10571_s5 + $0xb4] sm:$0xf]  ;;  %v7858_v14 = vld [vmem:[%s10571_s5 + $0xa0] sm:$0xf]  ;;  %v8522_v58 = vld [vmem:[%s10571_s5 + $0xa4] sm:$0xf0] }
 0x278   : > { %v3842_v33 = vmul.f32 %v3832_v59, %v3821_v31  ;;  %8688 = vtanh.f32 %v3867_v38  ;;  %v7802_v38 = vld [vmem:[%s10571_s5 + $0x30] sm:$0xf]  ;;  %v8508_v59 = vld [vmem:[%s10571_s5 + $0x34] sm:$0xf0] }
 0x279   : > { %v4750_v56 = vadd.f32 %v4749_v19, %v4736_v39  ;;  %v7876_v19 = vld [vmem:[%s10571_s5 + $0xc8] sm:$0xf0] }
 0x27a   : > { %v3852_v24 = vmul.f32 0.044715, %v3842_v33  ;;  %4915 = vmatpush.bf16.msrb.mxu3 %v7595_v61  ;;  %v7803_v33 = vor.u32 %v8508_v59, %v7802_v38 }
 0x27c   : > { %v3862_v5 = vadd.f32 %v3852_v24, %v3821_v31  ;;  %v8531_v24 = vld [vmem:[%s10571_s5 + $0xf4] sm:$0xf]  ;;  %v4737_v61 = vpop.f32.mrf.mxu2 }
 0x27e   : > { %v3872_v11 = vmul.f32 0.7978846, %v3862_v5  ;;  %v8689_v53 = vpop.eup %8688  ;;  %v7900_v5 = vld [vmem:[%s10571_s5 + $0xf8] sm:$0xf0] }
 0x27f   : > { %v3887_v47 = vadd.f32 1.0, %v8689_v53  ;;  %v7794_v53 = vld [vmem:[%s10571_s5 + $0x20] sm:$0xf] }
 0x280   : > { %8690 = vtanh.f32 %v3872_v11  ;;  %v7903_v11 = vor.u32 %v8531_v24, %v7900_v5  ;;  %v8521_v24 = vld [vmem:[%s10571_s5 + $0xa4] sm:$0xf] }
 0x281   : > { %v3897_v23 = vmul.f32 0.5, %v3887_v47  ;;  %v8506_v47 = vld [vmem:[%s10571_s5 + $0x24] sm:$0xf0] }
 0x282   : > { %5299 = vmatpush.bf16.msrb.mxu0 %v7903_v11  ;;  %v7860_v11 = vld [vmem:[%s10571_s5 + $0xa8] sm:$0xf0] }
 0x283   : > { %v3907_v1 = vmul.f32 %v3897_v23, %v3819_v8  ;;  %v7510_v8 = vld [vmem:[%s10569_s3 + $0x1a0] sm:$0xf] }
 0x284   : > { %v7511_v15 = vor.u32 %v8434_v22, %v7510_v8  ;;  %v8502_v8 = vld [vmem:[%s10571_s5 + $0x4] sm:$0xf0] }
 0x286   : > { %v8691_v6 = vpop.eup %8690 }
 0x287   : > { %v3892_v62 = vadd.f32 1.0, %v8691_v6  ;;  %v7795_v6 = vor.u32 %v8506_v47, %v7794_v53  ;;  %v7930_v53 = vld [vmem:[%s10571_s5 + $0x130] sm:$0xf] }
 0x289   : > { %v3902_v46 = vmul.f32 0.5, %v3892_v62  ;;  %v4763_v27 = vpop.f32.mrf.mxu0  ;;  %v7890_v62 = vld [vmem:[%s10571_s5 + $0xe0] sm:$0xf] }
 0x28b   : > { %v3912_v57 = vmul.f32 %v3902_v46, %v3821_v31  ;;  %v4751_v31 = vpop.f32.mrf.mxu3  ;;  %v8530_v46 = vld [vmem:[%s10571_s5 + $0xe4] sm:$0xf0] }
 0x28d   : > { %v3917_v25 = vpack.c.bf16 %v3912_v57, %v3907_v1  ;;  %v7891_v1 = vor.u32 %v8530_v46, %v7890_v62  ;;  %v7892_v57 = vld [vmem:[%s10571_s5 + $0xe8] sm:$0xf0]  ;;  %v8540_v62 = vld [vmem:[%s10571_s5 + $0x134] sm:$0xf0] }
 0x28f   : > { %4790 = vmatmul.bf16.vlgmr.msrb.gmra.mxu2 %v3917_v25  ;;  %4860 = vmatmul.bf16.vlgmr.msra.gmra.mxu3 %v3917_v25 }
 0x290   : > { %4930 = vmatmul.bf16.vlgmr.msra.gmra.mxu0 %v3917_v25  ;;  %4894 = vmatpush.bf16.msrb.mxu2 %v7583_v42  ;;  %v7895_v25 = vor.u32 %v8529_v36, %v7892_v57  ;;  %v7931_v36 = vor.u32 %v8540_v62, %v7930_v53  ;;  %v8519_v57 = vld [vmem:[%s10571_s5 + $0x94] sm:$0xf] }
 0x291   : > { %v4765_v37 = vpop.f32.mrf.mxu0 }
 0x292   : > { %5300 = vmatpush.bf16.msrb.mxu0 %v7895_v25  ;;  %5275 = vmatpush.bf16.msra.mxu3 %v7931_v36  ;;  %v8537_v36 = vld [vmem:[%s10571_s5 + $0x124] sm:$0xf] }
 0x293   : > { %v10316_v23 = vpop.f32.mrf.mxu3 }
 0x294   : > { %4895 = vmatpush.bf16.msrb.mxu2 %v7571_v26  ;;  %v4764_v26 = vadd.f32 %v4763_v27, %v4750_v56  ;;  %v4806_v39 = vadd.f32 %v10316_v23, %v4081_v9  ;;  %v7850_v56 = vld [vmem:[%s10571_s5 + $0x90] sm:$0xf] }
 0x298   : > { %4896 = vmatpush.bf16.msrb.mxu2 %v7559_v41  ;;  %v7882_v41 = vld [vmem:[%s10571_s5 + $0xd0] sm:$0xf] }
 0x299   : > { %v7883_v16 = vor.u32 %v8528_v43, %v7882_v41 }
 0x29c   : > { %4897 = vmatpush.bf16.msrb.mxu2 %v7547_v50  ;;  %v4738_v50 = vadd.f32 %v4737_v61, %v4080_v34  ;;  %v7868_v34 = vld [vmem:[%s10571_s5 + $0xb8] sm:$0xf0]  ;;  %v7859_v61 = vor.u32 %v8522_v58, %v7858_v14 }
 0x29d   : > { %v7871_v59 = vor.u32 %v8523_v44, %v7868_v34  ;;  %v8534_v44 = vld [vmem:[%s10571_s5 + $0x104] sm:$0xf0]  ;;  %v4082_v34 = vperm.slane %v10283_v52, 2  ;;  %v7932_v14 = vld [vmem:[%s10571_s5 + $0x138] sm:$0xf0] }
 0x29e   : > { %v4752_v7 = vadd.f32 %v4751_v31, %v4738_v50  ;;  %v8513_v52 = vld [vmem:[%s10571_s5 + $0x64] sm:$0xf] }
 0x29f   : > { %4846 = vmatmul.bf16.vlgmr.msra.gmra.mxu2 %v9930_v2  ;;  %4916 = vmatmul.bf16.vlgmr.msrb.gmra.mxu3 %v9930_v2  ;;  %v8431_v2 = vld [vmem:[%s10569_s3 + $0x190] sm:$0xf0] }
 0x2a0   : > { %4898 = vmatpush.bf16.msrb.mxu2 %v7535_v12  ;;  %v7499_v20 = vor.u32 %v8431_v2, %v7498_v4  ;;  %v7884_v12 = vld [vmem:[%s10571_s5 + $0xd8] sm:$0xf0]  ;;  %v7874_v4 = vld [vmem:[%s10571_s5 + $0xc0] sm:$0xf]  ;;  %v8526_v2 = vld [vmem:[%s10571_s5 + $0xc4] sm:$0xf0] }
 0x2a1   : > { %v7887_v30 = vor.u32 %v8527_v49, %v7884_v12  ;;  %v7875_v10 = vor.u32 %v8526_v2, %v7874_v4  ;;  %v8538_v49 = vld [vmem:[%s10571_s5 + $0x124] sm:$0xf0]  ;;  %v7842_v12 = vld [vmem:[%s10571_s5 + $0x80] sm:$0xf]  ;;  %v7844_v2 = vld [vmem:[%s10571_s5 + $0x88] sm:$0xf0] }
 0x2a3   : > { %5301 = vmatpush.bf16.msrb.mxu0 %v7887_v30  ;;  %v8517_v30 = vld [vmem:[%s10571_s5 + $0x84] sm:$0xf] }
 0x2a4   : > { %4899 = vmatpush.bf16.msrb.mxu2 %v7523_v40  ;;  %v7778_v40 = vld [vmem:[%s10571_s5] sm:$0xf] }
 0x2a8   : > { %4900 = vmatpush.bf16.msrb.mxu2 %v7511_v15  ;;  %v7779_v15 = vor.u32 %v8502_v8, %v7778_v40 }
 0x2a9   : > { %v4819_v18 = vpop.f32.mrf.mxu0 }
 0x2aa   : > { %v4820_v23 = vadd.f32 %v4819_v18, %v4806_v39  ;;  %v7922_v18 = vld [vmem:[%s10571_s5 + $0x120] sm:$0xf] }
 0x2ac   : > { %4901 = vmatpush.bf16.msrb.mxu2 %v7499_v20  ;;  %v8525_v20 = vld [vmem:[%s10571_s5 + $0xc4] sm:$0xf] }
 0x2af   : > { %4902 = vmatmul.bf16.vlgmr.msrb.gmra.mxu2 %v9774_v3  ;;  %v7827_v3 = vor.u32 %v8514_v21, %v7826_v28  ;;  %v4807_v28 = vpop.f32.mrf.mxu3  ;;  %v7879_v21 = vor.u32 %v8525_v20, %v7876_v19  ;;  %v7914_v20 = vld [vmem:[%s10571_s5 + $0x110] sm:$0xf] }
 0x2b0   : > { %5257 = vmatpush.bf16.msra.mxu2 %v7899_v55  ;;  %v4808_v40 = vadd.f32 %v4807_v28, %v4081_v9 }
 0x2b1   : > { %5244 = vmatpush.bf16.msra.mxu1 %v7827_v3  ;;  %v4766_v3 = vadd.f32 %v4765_v37, %v4752_v7  ;;  %5302 = vmatpush.bf16.msrb.mxu0 %v7879_v21  ;;  %v4821_v0 = vpop.f32.mrf.mxu0 }
 0x2b2   : > { %v4822_v19 = vadd.f32 %v4821_v0, %v4808_v40 }
 0x2b4   : > { %v4777_v29 = vpop.f32.mrf.mxu1  ;;  %5258 = vmatpush.bf16.msra.mxu2 %v7891_v1  ;;  %v8520_v1 = vld [vmem:[%s10571_s5 + $0x94] sm:$0xf0] }
 0x2b5   : > { %5245 = vmatpush.bf16.msra.mxu1 %v7819_v32  ;;  %v4778_v35 = vadd.f32 %v4777_v29, %v4764_v26  ;;  %v8524_v32 = vld [vmem:[%s10571_s5 + $0xb4] sm:$0xf0]  ;;  %5303 = vmatpush.bf16.msrb.mxu0 %v7871_v59  ;;  %v7851_v63 = vor.u32 %v8520_v1, %v7850_v56  ;;  %v7852_v26 = vld [vmem:[%s10571_s5 + $0x98] sm:$0xf0]  ;;  %v7924_v56 = vld [vmem:[%s10571_s5 + $0x128] sm:$0xf0] }
 0x2b6   : > { %v7867_v29 = vor.u32 %v8524_v32, %v7866_v48  ;;  %v7855_v43 = vor.u32 %v8519_v57, %v7852_v26  ;;  %v7906_v32 = vld [vmem:[%s10571_s5 + $0x100] sm:$0xf]  ;;  %v7927_v57 = vor.u32 %v8537_v36, %v7924_v56  ;;  %v7780_v36 = vld [vmem:[%s10571_s5 + $0x8] sm:$0xf0] }
 0x2b7   : > { %v7907_v0 = vor.u32 %v8534_v44, %v7906_v32  ;;  %v7804_v32 = vld [vmem:[%s10571_s5 + $0x38] sm:$0xf0] }
 0x2b8   : > { %5259 = vmatpush.bf16.msra.mxu2 %v7883_v16  ;;  %v7923_v16 = vor.u32 %v8538_v49, %v7922_v18 }
 0x2b9   : > { %5246 = vmatpush.bf16.msra.mxu1 %v7811_v54 }
 0x2ba   : > { %5276 = vmatpush.bf16.msra.mxu3 %v7923_v16 }
 0x2bc   : > { %v4779_v42 = vpop.f32.mrf.mxu1  ;;  %5260 = vmatpush.bf16.msra.mxu2 %v7875_v10  ;;  %v8536_v10 = vld [vmem:[%s10571_s5 + $0x114] sm:$0xf0] }
 0x2bd   : > { %5247 = vmatpush.bf16.msra.mxu1 %v7803_v33  ;;  %v4780_v54 = vadd.f32 %v4779_v42, %v4766_v3  ;;  %v7915_v21 = vor.u32 %v8536_v10, %v7914_v20 }
 0x2bf   : > { %5277 = vmatpush.bf16.msra.mxu3 %v7915_v21 }
 0x2c0   : > { %5261 = vmatpush.bf16.msra.mxu2 %v7867_v29  ;;  %v8539_v29 = vld [vmem:[%s10571_s5 + $0x134] sm:$0xf] }
 0x2c1   : > { %5248 = vmatpush.bf16.msra.mxu1 %v7795_v6  ;;  %v7863_v6 = vor.u32 %v8521_v24, %v7860_v11  ;;  %v7935_v39 = vor.u32 %v8539_v29, %v7932_v14 }
 0x2c3   : > { %5304 = vmatpush.bf16.msrb.mxu0 %v7863_v6  ;;  %5278 = vmatpush.bf16.msra.mxu3 %v7907_v0 }
 0x2c4   : > { %v4833_v51 = vpop.f32.mrf.mxu1  ;;  %5262 = vmatpush.bf16.msra.mxu2 %v7859_v61 }
 0x2c5   : > { %5249 = vmatpush.bf16.msra.mxu1 %v7787_v17  ;;  %v4834_v25 = vadd.f32 %v4833_v51, %v4820_v23 }
 0x2c7   : > { %5305 = vmatpush.bf16.msrb.mxu0 %v7855_v43  ;;  %v8535_v43 = vld [vmem:[%s10571_s5 + $0x114] sm:$0xf] }
 0x2c8   : > { %5263 = vmatpush.bf16.msra.mxu2 %v7851_v63 }
 0x2c9   : > { %5250 = vmatpush.bf16.msra.mxu1 %v7779_v15  ;;  %v10418_v42 = vpop.f32.mrf.mxu0 }
 0x2ca   : > { %v4876_v6 = vadd.f32 %v10418_v42, %v4082_v34 }
 0x2cc   : > { %v4835_v17 = vpop.f32.mrf.mxu1 }
 0x2cd   : > { %5317 = vmatpush.bf16.msrb.mxu1 %v7935_v39 }
 0x2d1   : > { %v4877_v58 = vpop.f32.mrf.mxu0  ;;  %5318 = vmatpush.bf16.msrb.mxu1 %v7927_v57 }
 0x2d2   : > { %v4878_v20 = vadd.f32 %v4877_v58, %v4082_v34 }
 0x2d4   : > { %v4889_v24 = vpop.f32.mrf.mxu1 }
 0x2dc   : > { %v4891_v40 = vpop.f32.mrf.mxu1 }
 0x312   : > { %v4791_v60 = vpop.f32.mrf.mxu2  ;;  %v4861_v47 = vpop.f32.mrf.mxu3 }
 0x313   : > { %v10354_v22 = vadd.f32 %v4791_v60, %v4778_v35  ;;  %v8518_v60 = vld [vmem:[%s10571_s5 + $0x84] sm:$0xf0] }
 0x314   : > { %v7843_v4 = vor.u32 %v8518_v60, %v7842_v12 }
 0x315   : > { %v4936_v45 = vmul.f32 %v10354_v22, %v10354_v22 }
 0x316   : > { %5264 = vmatpush.bf16.msra.mxu2 %v7843_v4  ;;  %v7812_v4 = vld [vmem:[%s10571_s5 + $0x48] sm:$0xf0] }
 0x317   : > { %v4942_v27 = vmul.f32 %v4936_v45, %v10354_v22  ;;  %v7847_v45 = vor.u32 %v8517_v30, %v7844_v2  ;;  %v8533_v2 = vld [vmem:[%s10571_s5 + $0x104] sm:$0xf] }
 0x319   : > { %v4948_v31 = vmul.f32 0.044715, %v4942_v27  ;;  %5306 = vmatpush.bf16.msrb.mxu0 %v7847_v45  ;;  %v4836_v27 = vadd.f32 %v4835_v17, %v4822_v19  ;;  %v8511_v17 = vld [vmem:[%s10571_s5 + $0x54] sm:$0xf]  ;;  %v7908_v19 = vld [vmem:[%s10571_s5 + $0x108] sm:$0xf0] }
 0x31a   : > { %v4793_v38 = vpop.f32.mrf.mxu2  ;;  %v4863_v3 = vpop.f32.mrf.mxu3 }
 0x31b   : > { %v4954_v37 = vadd.f32 %v4948_v31, %v10354_v22  ;;  %v10385_v33 = vadd.f32 %v4793_v38, %v4780_v54  ;;  %v8515_v54 = vld [vmem:[%s10571_s5 + $0x74] sm:$0xf]  ;;  %v7836_v31 = vld [vmem:[%s10571_s5 + $0x78] sm:$0xf0] }
 0x31d   : > { %v4960_v55 = vmul.f32 0.7978846, %v4954_v37  ;;  %v4939_v5 = vmul.f32 %v10385_v33, %v10385_v33  ;;  %v7839_v37 = vor.u32 %v8515_v54, %v7836_v31  ;;  %v8505_v54 = vld [vmem:[%s10571_s5 + $0x24] sm:$0xf]  ;;  %v7796_v31 = vld [vmem:[%s10571_s5 + $0x28] sm:$0xf0] }
 0x31e   : > { %v7799_v14 = vor.u32 %v8505_v54, %v7796_v31 }
 0x31f   : > { %v4945_v46 = vmul.f32 %v4939_v5, %v10385_v33  ;;  %8692 = vtanh.f32 %v4960_v55  ;;  %5285 = vmatpush.bf16.msrb.mxu3 %v7839_v37 }
 0x321   : > { %v4951_v13 = vmul.f32 0.044715, %v4945_v46 }
 0x322   : > { %v4847_v41 = vpop.f32.mrf.mxu2  ;;  %v4917_v26 = vpop.f32.mrf.mxu3 }
 0x323   : > { %v4957_v50 = vadd.f32 %v4951_v13, %v10385_v33  ;;  %v4848_v35 = vadd.f32 %v4847_v41, %v4834_v25  ;;  %v4890_v25 = vadd.f32 %v4889_v24, %v4876_v6  ;;  %v7820_v41 = vld [vmem:[%s10571_s5 + $0x58] sm:$0xf0] }
 0x325   : > { %v4963_v8 = vmul.f32 0.7978846, %v4957_v50  ;;  %v10439_v15 = vadd.f32 %v4861_v47, %v4848_v35  ;;  %v8693_v7 = vpop.eup %8692  ;;  %v7828_v47 = vld [vmem:[%s10571_s5 + $0x68] sm:$0xf0]  ;;  %v7916_v50 = vld [vmem:[%s10571_s5 + $0x118] sm:$0xf0]  ;;  %v4931_v35 = vpop.f32.mrf.mxu0 }
 0x326   : > { %v4972_v51 = vadd.f32 1.0, %v8693_v7  ;;  %v7831_v46 = vor.u32 %v8513_v52, %v7828_v47  ;;  %v7919_v12 = vor.u32 %v8535_v43, %v7916_v50  ;;  %v8547_v50 = vld [vmem:[#allocation11 + $0x30] sm:$0xff] }
 0x327   : > { %8694 = vtanh.f32 %v4963_v8  ;;  %v4937_v28 = vmul.f32 %v10439_v15, %v10439_v15  ;;  %v8509_v8 = vld [vmem:[%s10571_s5 + $0x44] sm:$0xf] }
 0x328   : > { %v4978_v11 = vmul.f32 0.5, %v4972_v51  ;;  %5286 = vmatpush.bf16.msrb.mxu3 %v7831_v46  ;;  %5319 = vmatpush.bf16.msrb.mxu1 %v7919_v12  ;;  %v7815_v10 = vor.u32 %v8509_v8, %v7812_v4  ;;  %v8501_v46 = vld [vmem:[%s10571_s5 + $0x4] sm:$0xf]  ;;  %v8545_v12 = vld [vmem:[#allocation11 + $0x20] sm:$0xff] }
 0x329   : > { %v4943_v48 = vmul.f32 %v4937_v28, %v10439_v15  ;;  %v7911_v28 = vor.u32 %v8533_v2, %v7908_v19  ;;  %v8543_v4 = vld [vmem:[#allocation11 + $0x10] sm:$0xff]  ;;  %v8541_v19 = vld [vmem:[#allocation11] sm:$0xff] }
 0x32a   : > { %v4849_v9 = vpop.f32.mrf.mxu2  ;;  %v4984_v42 = vmul.f32 %v4978_v11, %v10354_v22  ;;  %v4919_v34 = vpop.f32.mrf.mxu3 }
 0x32b   : > { %v4949_v38 = vmul.f32 0.044715, %v4943_v48  ;;  %v4850_v59 = vadd.f32 %v4849_v9, %v4836_v27  ;;  %v8507_v48 = vld [vmem:[%s10571_s5 + $0x34] sm:$0xf] }
 0x32c   : > { %5320 = vmatpush.bf16.msrb.mxu1 %v7911_v28  ;;  %v7807_v0 = vor.u32 %v8507_v48, %v7804_v32 }
 0x32d   : > { %v8695_v55 = vpop.eup %8694  ;;  %v4955_v5 = vadd.f32 %v4949_v38, %v10439_v15  ;;  %v10473_v61 = vadd.f32 %v4863_v3, %v4850_v59  ;;  %v4892_v3 = vadd.f32 %v4891_v40, %v4878_v20  ;;  %v4933_v37 = vpop.f32.mrf.mxu0 }
 0x32e   : > { %v4975_v53 = vadd.f32 1.0, %v8695_v55  ;;  %v8503_v55 = vld [vmem:[%s10571_s5 + $0x14] sm:$0xf] }
 0x32f   : > { %v4961_v62 = vmul.f32 0.7978846, %v4955_v5  ;;  %v4940_v23 = vmul.f32 %v10473_v61, %v10473_v61  ;;  %v7788_v5 = vld [vmem:[%s10571_s5 + $0x18] sm:$0xf0] }
 0x330   : > { %v4981_v1 = vmul.f32 0.5, %v4975_v53 }
 0x331   : > { %v4946_v13 = vmul.f32 %v4940_v23, %v10473_v61  ;;  %8696 = vtanh.f32 %v4961_v62  ;;  %v7791_v62 = vor.u32 %v8503_v55, %v7788_v5 }
 0x332   : > { %v4987_v63 = vmul.f32 %v4981_v1, %v10385_v33  ;;  %v4903_v18 = vpop.f32.mrf.mxu2  ;;  %v7823_v33 = vor.u32 %v8511_v17, %v7820_v41 }
 0x333   : > { %v4952_v22 = vmul.f32 0.044715, %v4946_v13  ;;  %v4904_v49 = vadd.f32 %v4903_v18, %v4890_v25  ;;  %v7783_v13 = vor.u32 %v8501_v46, %v7780_v36 }
 0x334   : > { %v10505_v16 = vpack.c.bf16 %v4987_v63, %v4984_v42  ;;  %5287 = vmatpush.bf16.msrb.mxu3 %v7823_v33  ;;  %v8548_v33 = vld [vmem:[#allocation11 + $0x38] sm:$0xff] }
 0x335   : > { %v4958_v60 = vadd.f32 %v4952_v22, %v10473_v61  ;;  %v4918_v30 = vadd.f32 %v4917_v26, %v4904_v49  ;;  %5453 = vmatpush.bf16.msrb.mxu2 %v8548_v33 }
 0x336   : > { %5251 = vmatmul.bf16.vlgmr.msra.gmra.mxu1 %v10505_v16 }
 0x337   : > { %v4964_v7 = vmul.f32 0.7978846, %v4958_v60  ;;  %v4932_v45 = vadd.f32 %v4931_v35, %v4918_v30  ;;  %v8697_v21 = vpop.eup %8696  ;;  %v8546_v35 = vld [vmem:[#allocation11 + $0x28] sm:$0xff]  ;;  %v8544_v60 = vld [vmem:[#allocation11 + $0x18] sm:$0xff] }
 0x338   : > { %5288 = vmatpush.bf16.msrb.mxu3 %v7815_v10  ;;  %v4973_v29 = vadd.f32 1.0, %v8697_v21  ;;  %v5033_v30 = vld [vmem:[#allocation10] sm:$0x3] }
 0x339   : > { %8698 = vtanh.f32 %v4964_v7  ;;  %v4938_v27 = vmul.f32 %v4932_v45, %v4932_v45  ;;  %5454 = vmatpush.bf16.msrb.mxu2 %v8547_v50  ;;  %v5035_v8 = vperm.slane %v5033_v30, 0  ;;  %v8542_v7 = vld [vmem:[#allocation11 + $0x8] sm:$0xff] }
 0x33a   : > { %v4905_v51 = vpop.f32.mrf.mxu2  ;;  %v4979_v11 = vmul.f32 0.5, %v4973_v29 }
 0x33b   : > { %v4944_v44 = vmul.f32 %v4938_v27, %v4932_v45  ;;  %v4906_v9 = vadd.f32 %v4905_v51, %v4892_v3 }
 0x33c   : > { %5289 = vmatpush.bf16.msrb.mxu3 %v7807_v0  ;;  %v4985_v56 = vmul.f32 %v4979_v11, %v10439_v15 }
 0x33d   : > { %v4950_v38 = vmul.f32 0.044715, %v4944_v44  ;;  %v4920_v59 = vadd.f32 %v4919_v34, %v4906_v9  ;;  %5455 = vmatpush.bf16.msrb.mxu2 %v8546_v35  ;;  %v5036_v34 = vperm.slane %v5033_v30, 1 }
 0x33f   : > { %v8699_v58 = vpop.eup %8698  ;;  %v4956_v24 = vadd.f32 %v4950_v38, %v4932_v45  ;;  %v4934_v39 = vadd.f32 %v4933_v37, %v4920_v59 }
 0x340   : > { %v4976_v53 = vadd.f32 1.0, %v8699_v58  ;;  %5290 = vmatpush.bf16.msrb.mxu3 %v7799_v14 }
 0x341   : > { %v4962_v52 = vmul.f32 0.7978846, %v4956_v24  ;;  %v4941_v47 = vmul.f32 %v4934_v39, %v4934_v39  ;;  %5456 = vmatpush.bf16.msrb.mxu2 %v8545_v12  ;;  %v8550_v24 = vld [vmem:[#allocation11 + $0x48] sm:$0xff] }
 0x342   : > { %v4982_v6 = vmul.f32 0.5, %v4976_v53  ;;  %5473 = vmatpush.bf16.msra.mxu1 %v8550_v24 }
 0x343   : > { %v4947_v23 = vmul.f32 %v4941_v47, %v4934_v39  ;;  %8700 = vtanh.f32 %v4962_v52  ;;  %v8549_v52 = vld [vmem:[#allocation11 + $0x40] sm:$0xff] }
 0x344   : > { %v4988_v1 = vmul.f32 %v4982_v6, %v10473_v61  ;;  %5291 = vmatpush.bf16.msrb.mxu3 %v7791_v62 }
 0x345   : > { %v4953_v57 = vmul.f32 0.044715, %v4947_v23  ;;  %5457 = vmatpush.bf16.msrb.mxu2 %v8544_v60 }
 0x346   : > { %v4991_v25 = vpack.c.bf16 %v4988_v1, %v4985_v56  ;;  %5474 = vmatpush.bf16.msra.mxu1 %v8549_v52 }
 0x347   : > { %v4959_v42 = vadd.f32 %v4953_v57, %v4934_v39 }
 0x348   : > { %5265 = vmatmul.bf16.vlgmr.msra.gmra.mxu2 %v4991_v25  ;;  %5307 = vmatmul.bf16.vlgmr.msrb.gmra.mxu0 %v4991_v25 }
 0x349   : > { %v4965_v63 = vmul.f32 0.7978846, %v4959_v42  ;;  %5292 = vmatpush.bf16.msrb.mxu3 %v7783_v13  ;;  %v8701_v26 = vpop.eup %8700  ;;  %5458 = vmatpush.bf16.msrb.mxu2 %v8543_v4 }
 0x34a   : > { %v4974_v18 = vadd.f32 1.0, %v8701_v26 }
 0x34b   : > { %8702 = vtanh.f32 %v4965_v63 }
 0x34c   : > { %v4980_v41 = vmul.f32 0.5, %v4974_v18 }
 0x34d   : > { %5459 = vmatpush.bf16.msrb.mxu2 %v8542_v7 }
 0x34e   : > { %v4986_v15 = vmul.f32 %v4980_v41, %v4932_v45 }
 0x351   : > { %v8703_v17 = vpop.eup %8702  ;;  %5460 = vmatpush.bf16.msrb.mxu2 %v8541_v19 }
 0x352   : > { %v4977_v43 = vadd.f32 1.0, %v8703_v17 }
 0x354   : > { %v4983_v22 = vmul.f32 0.5, %v4977_v43 }
 0x356   : > { %v4989_v49 = vmul.f32 %v4983_v22, %v4934_v39 }
 0x358   : > { %v4992_v61 = vpack.c.bf16 %v4989_v49, %v4986_v15 }
 0x35a   : > { %7936 = vmatmul.msk.bf16.vlgmr.msra.gmra.mxu3 %vm5239_vm0, %v4992_v61  ;;  %7937 = vmatmul.msk.bf16.vlgmr.msrb.gmra.mxu1 %vm5239_vm0, %v4992_v61 }
 0x36a   : > { %5293 = vmatmul.bf16.vlgmr.msrb.gmra.mxu3 %v10505_v16 }
 0x3b3   : > { %v5252_v40 = vpop.f32.mrf.mxu1 }
 0x3b4   : > { %v5253_v20 = vadd.f32 %v5252_v40, %v5035_v8 }
 0x3bb   : > { %v5254_v28 = vpop.f32.mrf.mxu1 }
 0x3bc   : > { %v5255_v27 = vadd.f32 %v5254_v28, %v5035_v8 }
 0x3c5   : > { %v5308_v59 = vpop.f32.mrf.mxu0 }
 0x3cb   : > { %v5266_v2 = vpop.f32.mrf.mxu2 }
 0x3cc   : > { %v5267_v45 = vadd.f32 %v5266_v2, %v5253_v20 }
 0x3cd   : > { %v5310_v36 = vpop.f32.mrf.mxu0 }
 0x3d3   : > { %v5268_v3 = vpop.f32.mrf.mxu2 }
 0x3d4   : > { %v5269_v48 = vadd.f32 %v5268_v3, %v5255_v27 }
 0x3d7   : > { %v5322_v39 = vpop.f32.mrf.mxu1 }
 0x3dd   : > { %v5280_v16 = vpop.f32.mrf.mxu3 }
 0x3de   : > { %v5281_v10 = vadd.f32 %v5280_v16, %v5267_v45  ;;  %v8670_v45 = vld [vmem:[#allocation13] ss:$0 sm:$0xff] }
 0x3df   : > { %v5324_v13 = vpop.f32.mrf.mxu1 }
 0x3e0   : > { %v5327_v21 = vmul.f32 %v5281_v10, %v5281_v10 }
 0x3e2   : > { %v5331_v51 = vmul.f32 %v5327_v21, %v5281_v10 }
 0x3e4   : > { %v5335_v32 = vmul.f32 0.044715, %v5331_v51 }
 0x3e5   : > { %v5282_v44 = vpop.f32.mrf.mxu3 }
 0x3e6   : > { %v5339_v9 = vadd.f32 %v5335_v32, %v5281_v10  ;;  %v5283_v0 = vadd.f32 %v5282_v44, %v5269_v48 }
 0x3e8   : > { %v5343_v54 = vmul.f32 0.7978846, %v5339_v9  ;;  %v5329_v31 = vmul.f32 %v5283_v0, %v5283_v0 }
 0x3ea   : > { %v5333_v29 = vmul.f32 %v5329_v31, %v5283_v0  ;;  %8704 = vtanh.f32 %v5343_v54 }
 0x3ec   : > { %v5337_v38 = vmul.f32 0.044715, %v5333_v29  ;;  %v5499_v29 = vld [vmem:[#allocation14] sm:$0x1] }
 0x3ed   : > { %v5294_v37 = vpop.f32.mrf.mxu3 }
 0x3ee   : > { %v5341_v14 = vadd.f32 %v5337_v38, %v5283_v0  ;;  %v5295_v58 = vadd.f32 %v5294_v37, %v5036_v34  ;;  %v5500_v38 = vunpack.c.l.bf16 %v5499_v29 }
 0x3f0   : > { %v5345_v55 = vmul.f32 0.7978846, %v5341_v14  ;;  %v5309_v5 = vadd.f32 %v5308_v59, %v5295_v58  ;;  %v8705_v11 = vpop.eup %8704  ;;  %v5501_v24 = vperm.slane %v5500_v38, 0 }
 0x3f1   : > { %v5351_v6 = vadd.f32 1.0, %v8705_v11 }
 0x3f2   : > { %8706 = vtanh.f32 %v5345_v55  ;;  %v5323_v53 = vadd.f32 %v5322_v39, %v5309_v5 }
 0x3f3   : > { %v5355_v25 = vmul.f32 0.5, %v5351_v6 }
 0x3f4   : > { %v5328_v47 = vmul.f32 %v5323_v53, %v5323_v53 }
 0x3f5   : > { %v5296_v62 = vpop.f32.mrf.mxu3  ;;  %v5359_v43 = vmul.f32 %v5355_v25, %v5281_v10 }
 0x3f6   : > { %v5332_v23 = vmul.f32 %v5328_v47, %v5323_v53  ;;  %v5297_v46 = vadd.f32 %v5296_v62, %v5036_v34 }
 0x3f8   : > { %v8707_v56 = vpop.eup %8706  ;;  %v5336_v1 = vmul.f32 0.044715, %v5332_v23  ;;  %v5311_v57 = vadd.f32 %v5310_v36, %v5297_v46  ;;  %v8671_v23 = vld [vmem:[#allocation2] ss:$0 sm:$0xff] }
 0x3f9   : > { %v5353_v42 = vadd.f32 1.0, %v8707_v56 }
 0x3fa   : > { %v5340_v63 = vadd.f32 %v5336_v1, %v5323_v53  ;;  %v5325_v26 = vadd.f32 %v5324_v13, %v5311_v57 }
 0x3fb   : > { %v5357_v18 = vmul.f32 0.5, %v5353_v42 }
 0x3fc   : > { %v5344_v17 = vmul.f32 0.7978846, %v5340_v63  ;;  %v5330_v41 = vmul.f32 %v5325_v26, %v5325_v26 }
 0x3fd   : > { %v5361_v22 = vmul.f32 %v5357_v18, %v5283_v0 }
 0x3fe   : > { %v5334_v15 = vmul.f32 %v5330_v41, %v5325_v26  ;;  %8708 = vtanh.f32 %v5344_v17 }
 0x3ff   : > { %v5363_v49 = vpack.c.bf16 %v5361_v22, %v5359_v43 }
 0x400   : > { %v5338_v61 = vmul.f32 0.044715, %v5334_v15 }
 0x401   : > { %5461 = vmatmul.bf16.vlgmr.msrb.gmra.mxu2 %v5363_v49 }
 0x402   : > { %v5342_v33 = vadd.f32 %v5338_v61, %v5325_v26 }
 0x404   : > { %v5346_v50 = vmul.f32 0.7978846, %v5342_v33  ;;  %v8709_v35 = vpop.eup %8708 }
 0x405   : > { %v5352_v12 = vadd.f32 1.0, %v8709_v35 }
 0x406   : > { %8710 = vtanh.f32 %v5346_v50 }
 0x407   : > { %v5356_v30 = vmul.f32 0.5, %v5352_v12 }
 0x409   : > { %v5360_v4 = vmul.f32 %v5356_v30, %v5323_v53 }
 0x40c   : > { %v8711_v60 = vpop.eup %8710 }
 0x40d   : > { %v5354_v40 = vadd.f32 1.0, %v8711_v60 }
 0x40f   : > { %v5358_v8 = vmul.f32 0.5, %v5354_v40 }
 0x411   : > { %v5362_v2 = vmul.f32 %v5358_v8, %v5325_v26 }
 0x413   : > { %v5364_v20 = vpack.c.bf16 %v5362_v2, %v5360_v4 }
 0x415   : > { %7978 = vmatmul.msk.bf16.vlgmr.msra.gmra.mxu1 %vm5449_vm1, %v5364_v20 }
 0x484   : > { %v5462_v7 = vpop.f32.mrf.mxu2 }
 0x485   : > { %v5463_v16 = vadd.f32 %v8670_v45, %v5462_v7 }
 0x48c   : > { %v5464_v21 = vpop.f32.mrf.mxu2 }
 0x48d   : > { %v5465_v27 = vadd.f32 %v8670_v45, %v5464_v21 }
 0x492   : > { %v5476_v10 = vpop.f32.mrf.mxu1 }
 0x493   : > { %v5477_v19 = vadd.f32 %v5476_v10, %v5463_v16 }
 0x495   : > { %v5481_v28 = vmul.f32 %v5477_v19, %v5477_v19 }
 0x497   : > { %v5483_v3 = vmul.f32 %v5481_v28, %v5477_v19 }
 0x499   : > { %v5485_v51 = vmul.f32 0.044715, %v5483_v3 }
 0x49a   : > { %v5478_v48 = vpop.f32.mrf.mxu1 }
 0x49b   : > { %v5487_v32 = vadd.f32 %v5485_v51, %v5477_v19  ;;  %v5479_v44 = vadd.f32 %v5478_v48, %v5465_v27 }
 0x49d   : > { %v5482_v9 = vmul.f32 %v5479_v44, %v5479_v44  ;;  %v5489_v0 = vmul.f32 0.7978846, %v5487_v32 }
 0x49f   : > { %v5484_v54 = vmul.f32 %v5482_v9, %v5479_v44  ;;  %8712 = vtanh.f32 %v5489_v0 }
 0x4a1   : > { %v5486_v31 = vmul.f32 0.044715, %v5484_v54 }
 0x4a3   : > { %v5488_v34 = vadd.f32 %v5486_v31, %v5479_v44 }
 0x4a5   : > { %v8713_v59 = vpop.eup %8712  ;;  %v5490_v37 = vmul.f32 0.7978846, %v5488_v34 }
 0x4a6   : > { %v5493_v14 = vadd.f32 1.0, %v8713_v59 }
 0x4a7   : > { %8714 = vtanh.f32 %v5490_v37 }
 0x4a8   : > { %v5495_v58 = vmul.f32 0.5, %v5493_v14 }
 0x4aa   : > { %v5497_v39 = vmul.f32 %v5495_v58, %v5477_v19 }
 0x4ac   : > { %v5502_v55 = vmul.f32 %v5501_v24, %v5497_v39 }
 0x4ad   : > { %v8715_v5 = vpop.eup %8714 }
 0x4ae   : > { %v5505_v11 = vsel %vm5504_vm2, %v5502_v55, 0.0  ;;  %v5494_v53 = vadd.f32 1.0, %v8715_v5 }
 0x4af   : > { %5506 = vadd.xlane.f32.xlu0 %v5505_v11 }
 0x4b0   : > { %v5496_v52 = vmul.f32 0.5, %v5494_v53 }
 0x4b2   : > { %v5498_v47 = vmul.f32 %v5496_v52, %v5479_v44 }
 0x4b4   : > { %v5503_v6 = vmul.f32 %v5501_v24, %v5498_v47 }
 0x4b6   : > { %v5508_v62 = vsel %vm5504_vm2, %v5503_v6, 0.0 }
 0x4b7   : > { %5509 = vadd.xlane.f32.xlu0 %v5508_v62 }
 0x522   : > { %v5507_v46 = vpop.xlane.xlu0 %5506 }
 0x523   : > { %v5515_v36 = vadd.f32 %v8671_v23, %v5507_v46 }
 0x525   : > { %v5517_v56 = vmul.f32 %v5515_v36, %v5515_v36 }
 0x527   : > { %v5519_v1 = vmul.f32 %v5517_v56, %v5515_v36 }
 0x529   : > { %v5521_v57 = vmul.f32 0.044715, %v5519_v1 }
 0x52a   : > { %v5510_v25 = vpop.xlane.xlu0 %5509 }
 0x52b   : > { %v5523_v13 = vadd.f32 %v5521_v57, %v5515_v36  ;;  %v5516_v42 = vadd.f32 %v8671_v23, %v5510_v25 }
 0x52d   : > { %v5525_v63 = vmul.f32 0.7978846, %v5523_v13  ;;  %v5518_v26 = vmul.f32 %v5516_v42, %v5516_v42 }
 0x52f   : > { %8716 = vtanh.f32 %v5525_v63  ;;  %v5520_v18 = vmul.f32 %v5518_v26, %v5516_v42 }
 0x531   : > { %v5522_v17 = vmul.f32 0.044715, %v5520_v18 }
 0x533   : > { %v5524_v41 = vadd.f32 %v5522_v17, %v5516_v42 }
 0x535   : > { %v8717_v43 = vpop.eup %8716  ;;  %v5526_v22 = vmul.f32 0.7978846, %v5524_v41 }
 0x536   : > { %v5529_v15 = vadd.f32 1.0, %v8717_v43 }
 0x537   : > { %8718 = vtanh.f32 %v5526_v22 }
 0x538   : > { %v5531_v49 = vmul.f32 0.5, %v5529_v15 }
 0x53a   : > { %v5533_v61 = vmul.f32 %v5531_v49, %v5515_v36 }
 0x53c   : > { %5536 = vst.msk [vmem:[%s518_s22] sm:$0xff] %vm5535_vm3, %v5533_v61 }
 0x53d   : > { %v8719_v33 = vpop.eup %8718 }
 0x53e   : > { %v5530_v50 = vadd.f32 1.0, %v8719_v33 }
 0x540   : > { %v5532_v35 = vmul.f32 0.5, %v5530_v50 }
 0x542   : > { %v5534_v12 = vmul.f32 %v5532_v35, %v5516_v42 }
 0x544   : > { %5537 = vst.msk [vmem:[%s518_s22 + $0x8] sm:$0xff] %vm5535_vm3, %v5534_v12 }
 0x545 PF: > { %p27_p3 = scmp.ge.s32.totalorder %s9167_s29, 5   ;;  %s10593_s19 = smov %s9004_s20 }
 0x546   : > { %s10594_s20 = smov %s9008_s21  ;;  %s10595_s21 = smov %s9178_s10 }
 0x547   : > { %s10596_s22 = smov %s9167_s29  ;;  %29 = sbr.rel (!%p27_p3) target bundleno = 11 (0xb), region = 132 }
 0x54c   :  { %5560 = vsyncpa [#allocation4], 1 }
 0x54d   :  { %5562 = vsyncpa [#allocation4 + $0x1], 1 }
 0x54e   :  { %5563 = vsyncpa [#allocation6], 1 }
 0x54f   :  { %5564 = vsyncpa [#allocation9], 1 }
 0x550   :  { %5565 = vsyncpa [#allocation12], 1 }
 0x551   :  { %5566 = vsyncpa [#allocation15], 1 }

</bundles_post_ra>
